<compile_context>
chip_gen: v5e
topology: v5e:2x2
jax: 0.10.0
libtpu: 0.0.40
codegen_flags: <defaults>
</compile_context>

<pallas_src>
import jax
import jax.numpy as jnp
from jax.experimental import pallas as pl
from jax.experimental.pallas import tpu as pltpu

STATE_SIZE = 768
HIDDEN_SIZE = 256
N_ACTIONS = 4
N_BLOCKS = 4
N_PROJ = 1 + 2 * N_BLOCKS            # 9 action projections (pre + 2 per block)
ACT_CAT = N_PROJ * HIDDEN_SIZE       # 2304


def _leaky_relu(x, slope=0.2):
    # max(x, slope*x) == LeakyReLU for 0 < slope < 1; one VALU op cheaper than
    # cmp+select on the serial epilogue chain.
    return jnp.maximum(x, slope * x)


def _round_up(x, m):
    return ((x + m - 1) // m) * m


def forward_dynamics_kernel(
    s_ref,        # (BM, 768)        bf16
    a_ref,        # (BM, A)          f32
    wa_cat_ref,   # (A, 2304)        f32  all 9 action projections, concatenated
    b_cat_ref,    # (1, 2304)        f32  all 9 biases, concatenated
    pre_ws_ref,   # (768, 256)       bf16
    w1s_ref,      # (4, 256, 256)    bf16
    w2s_ref,      # (4, 256, 256)    bf16
    post_w_ref,   # (256, 768)       bf16
    post_b_ref,   # (1, 768)         f32
    out_ref,      # (BM, 768)        f32 or bf16
):
    a = a_ref[...].astype(jnp.float32)
    wa = wa_cat_ref[...]

    # All 9 action projections + biases, hoisted and computed once.  K=4 wastes
    # >98% of the MXU depth, so do it as 4 unrolled broadcast-FMAs on the VPU
    # (which has slack) and keep the action path in full f32.
    act = b_cat_ref[...] + a[:, 0:1] * wa[0:1, :]
    for k in range(1, N_ACTIONS):
        act = act + a[:, k:k + 1] * wa[k:k + 1, :]       # (BM, 2304) f32

    # pre_rb: Linear(768+A -> 256) + LeakyReLU(0.2)   (s arrives already bf16)
    x = jnp.dot(s_ref[...], pre_ws_ref[...], preferred_element_type=jnp.float32)
    x = _leaky_relu(x + act[:, 0:HIDDEN_SIZE])           # f32 accumulator

    # 4 residual blocks: only the two 256x256 state matmuls remain per block.
    for i in range(N_BLOCKS):
        off = (1 + 2 * i) * HIDDEN_SIZE
        h = jnp.dot(x.astype(jnp.bfloat16), w1s_ref[i],
                    preferred_element_type=jnp.float32)
        h = _leaky_relu(h + act[:, off:off + HIDDEN_SIZE])
        y = jnp.dot(h.astype(jnp.bfloat16), w2s_ref[i],
                    preferred_element_type=jnp.float32)
        x = x + y + act[:, off + HIDDEN_SIZE:off + 2 * HIDDEN_SIZE]

    # post_rb: Linear(256 -> 768)
    sp = jnp.dot(x.astype(jnp.bfloat16), post_w_ref[...],
                 preferred_element_type=jnp.float32) + post_b_ref[...]
    out_ref[...] = sp.astype(out_ref.dtype)


def pack_params(p):
    """Rearrange the raw f32 parameters into the kernel's fused / bf16 layout."""
    wa_parts = [p["pre_wa"]]
    b_parts = [p["pre_b"]]
    for i in range(N_BLOCKS):
        wa_parts += [p["w1a"][i], p["w2a"][i]]
        b_parts += [p["b1"][i], p["b2"][i]]
    return {
        "wa_cat": jnp.concatenate(wa_parts, axis=1).astype(jnp.float32),
        "b_cat": jnp.concatenate(b_parts, axis=1).astype(jnp.float32),
        "pre_ws": p["pre_ws"].astype(jnp.bfloat16),
        "w1s": p["w1s"].astype(jnp.bfloat16),
        "w2s": p["w2s"].astype(jnp.bfloat16),
        "post_w": p["post_w"].astype(jnp.bfloat16),
        "post_b": p["post_b"].astype(jnp.float32),
    }


def _choose_bm(bs, block_m):
    """Batch-tile size: big enough to amortize per-step overhead, but capped so
    the grid has >= 2 steps whenever possible (keeps both v7x TCs busy)."""
    if bs <= 8:
        return bs                                  # one full (untiled) block
    return max(8, min(block_m, _round_up(pl.cdiv(bs, 2), 8)))


def forward_dynamics(s, a, kp, *, block_m=512, out_dtype=jnp.float32):
    bs = s.shape[0]
    bm = _choose_bm(bs, block_m)
    grid = (pl.cdiv(bs, bm),)

    # s is consumed in bf16 by the MXU; feed it as bf16 to halve the input DMA.
    s_bf16 = s.astype(jnp.bfloat16)

    batch_map = lambda i: (i, 0)
    const2 = lambda i: (0, 0)
    const3 = lambda i: (0, 0, 0)

    in_specs = [
        pl.BlockSpec((bm, STATE_SIZE), batch_map),                     # s (bf16)
        pl.BlockSpec((bm, N_ACTIONS), batch_map),                      # a
        pl.BlockSpec((N_ACTIONS, ACT_CAT), const2),                    # wa_cat
        pl.BlockSpec((1, ACT_CAT), const2),                            # b_cat
        pl.BlockSpec((STATE_SIZE, HIDDEN_SIZE), const2),               # pre_ws
        pl.BlockSpec((N_BLOCKS, HIDDEN_SIZE, HIDDEN_SIZE), const3),    # w1s
        pl.BlockSpec((N_BLOCKS, HIDDEN_SIZE, HIDDEN_SIZE), const3),    # w2s
        pl.BlockSpec((HIDDEN_SIZE, STATE_SIZE), const2),               # post_w
        pl.BlockSpec((1, STATE_SIZE), const2),                         # post_b
    ]
    out_spec = pl.BlockSpec((bm, STATE_SIZE), batch_map)

    vmem_limit = (64 << 20) if bm > 512 else (32 << 20)

    return pl.pallas_call(
        forward_dynamics_kernel,
        out_shape=jax.ShapeDtypeStruct((bs, STATE_SIZE), out_dtype),
        grid=grid,
        in_specs=in_specs,
        out_specs=out_spec,
        compiler_params=pltpu.CompilerParams(
            dimension_semantics=("parallel",),
            vmem_limit_bytes=vmem_limit,
        ),
    )(s_bf16, a, kp["wa_cat"], kp["b_cat"], kp["pre_ws"],
      kp["w1s"], kp["w2s"], kp["post_w"], kp["post_b"])


def init_params(key):
    """Deterministic synthetic f32 parameters in (in_features, out_features)
    layout, with every concat-Linear split into a state part and action part."""
    keys = jax.random.split(key, 8)

    def glorot(k, shape):
        fan_in, fan_out = shape[-2], shape[-1]
        scale = jnp.sqrt(2.0 / (fan_in + fan_out))
        return jax.random.normal(k, shape, dtype=jnp.float32) * scale

    return {
        "pre_ws": glorot(keys[0], (STATE_SIZE, HIDDEN_SIZE)),
        "pre_wa": glorot(keys[1], (N_ACTIONS, HIDDEN_SIZE)),
        "pre_b": jnp.zeros((1, HIDDEN_SIZE), jnp.float32),
        "w1s": glorot(keys[2], (N_BLOCKS, HIDDEN_SIZE, HIDDEN_SIZE)),
        "w1a": glorot(keys[3], (N_BLOCKS, N_ACTIONS, HIDDEN_SIZE)),
        "b1": jnp.zeros((N_BLOCKS, 1, HIDDEN_SIZE), jnp.float32),
        "w2s": glorot(keys[4], (N_BLOCKS, HIDDEN_SIZE, HIDDEN_SIZE)),
        "w2a": glorot(keys[5], (N_BLOCKS, N_ACTIONS, HIDDEN_SIZE)),
        "b2": jnp.zeros((N_BLOCKS, 1, HIDDEN_SIZE), jnp.float32),
        "post_w": glorot(keys[6], (HIDDEN_SIZE, STATE_SIZE)),
        "post_b": jnp.zeros((1, STATE_SIZE), jnp.float32),
    }


def reference_forward_f32(s, a, p):
    """Pure-f32 JAX reference (mirrors the PyTorch forward exactly)."""
    lrelu = lambda x: jnp.where(x > 0, x, 0.2 * x)
    x = lrelu(s @ p["pre_ws"] + a @ p["pre_wa"] + p["pre_b"])
    for i in range(N_BLOCKS):
        h = lrelu(x @ p["w1s"][i] + a @ p["w1a"][i] + p["b1"][i])
        x = x + (h @ p["w2s"][i] + a @ p["w2a"][i] + p["b2"][i])
    return x @ p["post_w"] + p["post_b"]


def reference_forward_bf16(s, a, p):
    """Reference mirroring the kernel numerics: bf16 matmul inputs on the
    state path, f32 accumulation, f32 action path / biases / residual."""
    bf = lambda t: t.astype(jnp.bfloat16)
    dot = lambda u, v: jnp.dot(bf(u), bf(v), preferred_element_type=jnp.float32)
    lrelu = lambda x: jnp.maximum(x, 0.2 * x)
    x = lrelu(dot(s, p["pre_ws"]) + a @ p["pre_wa"] + p["pre_b"])
    for i in range(N_BLOCKS):
        h = lrelu(dot(x, p["w1s"][i]) + a @ p["w1a"][i] + p["b1"][i])
        x = x + dot(h, p["w2s"][i]) + a @ p["w2a"][i] + p["b2"][i]
    return dot(x, p["post_w"]) + p["post_b"]


if __name__ == "__main__":
    key = jax.random.PRNGKey(0)
    k_s, k_a, k_p = jax.random.split(key, 3)

    bs = 8
    s = jax.random.normal(k_s, (bs, STATE_SIZE), dtype=jnp.float32)
    act_idx = jax.random.randint(k_a, (bs,), 0, N_ACTIONS)
    a = jax.nn.one_hot(act_idx, N_ACTIONS, dtype=jnp.float32)   # one-hot actions

    raw_params = init_params(k_p)
    kernel_params = pack_params(raw_params)

    sp = jax.block_until_ready(forward_dynamics(s, a, kernel_params))
    assert sp.shape == (bs, STATE_SIZE)
    assert sp.dtype == jnp.float32

    # Tight check against a reference that mirrors the kernel's bf16-weight /
    # f32-accumulate numerics.
    sp_bf16 = reference_forward_bf16(s, a, raw_params)
    err_bf16 = float(jnp.max(jnp.abs(sp - sp_bf16)))
    assert jnp.allclose(sp, sp_bf16, atol=1e-2, rtol=1e-2), err_bf16

    # Loose check against the exact f32 PyTorch-equivalent math (bf16 weight
    # storage loosens the tolerance).
    sp_f32 = reference_forward_f32(s, a, raw_params)
    err_f32 = float(jnp.max(jnp.abs(sp - sp_f32)))
    assert jnp.allclose(sp, sp_f32, atol=0.25, rtol=0.1), err_f32

    print("KERNEL_OK")
</pallas_src>

<mosaic_0001>
module attributes {stable_mosaic.version = 11 : i64} {
  func.func @forward_dynamics_kernel(%arg0: i32, %arg1: memref<8x768xbf16, #tpu.memory_space<vmem>>, %arg2: memref<8x4xf32, #tpu.memory_space<vmem>>, %arg3: memref<4x2304xf32, #tpu.memory_space<vmem>>, %arg4: memref<1x2304xf32, #tpu.memory_space<vmem>>, %arg5: memref<768x256xbf16, #tpu.memory_space<vmem>>, %arg6: memref<4x256x256xbf16, #tpu.memory_space<vmem>>, %arg7: memref<4x256x256xbf16, #tpu.memory_space<vmem>>, %arg8: memref<256x768xbf16, #tpu.memory_space<vmem>>, %arg9: memref<1x768xf32, #tpu.memory_space<vmem>>, %arg10: memref<8x768xf32, #tpu.memory_space<vmem>>) attributes {dimension_semantics = [#tpu.dimension_semantics<parallel>], iteration_bounds = array<i64: 1>, scalar_prefetch = 0 : i64, scratch_operands = 0 : i64, tpu.core_type = #tpu.core_type<tc>, window_params = [{transform_indices = @transform_0, window_bounds = array<i64: 8, 768>}, {transform_indices = @transform_1, window_bounds = array<i64: 8, 4>}, {pipeline_mode = #tpu.pipeline_mode<synchronous>, transform_indices = @transform_2, window_bounds = array<i64: 4, 2304>}, {pipeline_mode = #tpu.pipeline_mode<synchronous>, transform_indices = @transform_3, window_bounds = array<i64: 1, 2304>}, {pipeline_mode = #tpu.pipeline_mode<synchronous>, transform_indices = @transform_4, window_bounds = array<i64: 768, 256>}, {pipeline_mode = #tpu.pipeline_mode<synchronous>, transform_indices = @transform_5, window_bounds = array<i64: 4, 256, 256>}, {pipeline_mode = #tpu.pipeline_mode<synchronous>, transform_indices = @transform_6, window_bounds = array<i64: 4, 256, 256>}, {pipeline_mode = #tpu.pipeline_mode<synchronous>, transform_indices = @transform_7, window_bounds = array<i64: 256, 768>}, {pipeline_mode = #tpu.pipeline_mode<synchronous>, transform_indices = @transform_8, window_bounds = array<i64: 1, 768>}, {transform_indices = @transform_9, window_bounds = array<i64: 8, 768>}]} {
    %c0 = arith.constant 0 : index
    %c0_0 = arith.constant 0 : index
    %0 = vector.load %arg2[%c0, %c0_0] : memref<8x4xf32, #tpu.memory_space<vmem>>, vector<8x4xf32>
    %c0_1 = arith.constant 0 : index
    %c0_2 = arith.constant 0 : index
    %1 = vector.load %arg3[%c0_1, %c0_2] : memref<4x2304xf32, #tpu.memory_space<vmem>>, vector<4x2304xf32>
    %c0_3 = arith.constant 0 : index
    %c0_4 = arith.constant 0 : index
    %2 = vector.load %arg4[%c0_3, %c0_4] : memref<1x2304xf32, #tpu.memory_space<vmem>>, vector<1x2304xf32>
    %3 = vector.extract_strided_slice %0 {offsets = [0, 0], sizes = [8, 1], strides = [1, 1]} : vector<8x4xf32> to vector<8x1xf32>
    %4 = vector.extract_strided_slice %1 {offsets = [0, 0], sizes = [1, 2304], strides = [1, 1]} : vector<4x2304xf32> to vector<1x2304xf32>
    %5 = vector.broadcast %3 : vector<8x1xf32> to vector<8x2304xf32>
    %6 = vector.broadcast %4 : vector<1x2304xf32> to vector<8x2304xf32>
    %7 = arith.mulf %5, %6 : vector<8x2304xf32>
    %8 = vector.broadcast %2 : vector<1x2304xf32> to vector<8x2304xf32>
    %9 = arith.addf %8, %7 : vector<8x2304xf32>
    %10 = vector.extract_strided_slice %0 {offsets = [0, 1], sizes = [8, 1], strides = [1, 1]} : vector<8x4xf32> to vector<8x1xf32>
    %11 = vector.extract_strided_slice %1 {offsets = [1, 0], sizes = [1, 2304], strides = [1, 1]} : vector<4x2304xf32> to vector<1x2304xf32>
    %12 = vector.broadcast %10 : vector<8x1xf32> to vector<8x2304xf32>
    %13 = vector.broadcast %11 : vector<1x2304xf32> to vector<8x2304xf32>
    %14 = arith.mulf %12, %13 : vector<8x2304xf32>
    %15 = arith.addf %9, %14 : vector<8x2304xf32>
    %16 = vector.extract_strided_slice %0 {offsets = [0, 2], sizes = [8, 1], strides = [1, 1]} : vector<8x4xf32> to vector<8x1xf32>
    %17 = vector.extract_strided_slice %1 {offsets = [2, 0], sizes = [1, 2304], strides = [1, 1]} : vector<4x2304xf32> to vector<1x2304xf32>
    %18 = vector.broadcast %16 : vector<8x1xf32> to vector<8x2304xf32>
    %19 = vector.broadcast %17 : vector<1x2304xf32> to vector<8x2304xf32>
    %20 = arith.mulf %18, %19 : vector<8x2304xf32>
    %21 = arith.addf %15, %20 : vector<8x2304xf32>
    %22 = vector.extract_strided_slice %0 {offsets = [0, 3], sizes = [8, 1], strides = [1, 1]} : vector<8x4xf32> to vector<8x1xf32>
    %23 = vector.extract_strided_slice %1 {offsets = [3, 0], sizes = [1, 2304], strides = [1, 1]} : vector<4x2304xf32> to vector<1x2304xf32>
    %24 = vector.broadcast %22 : vector<8x1xf32> to vector<8x2304xf32>
    %25 = vector.broadcast %23 : vector<1x2304xf32> to vector<8x2304xf32>
    %26 = arith.mulf %24, %25 : vector<8x2304xf32>
    %27 = arith.addf %21, %26 : vector<8x2304xf32>
    %c0_5 = arith.constant 0 : index
    %c0_6 = arith.constant 0 : index
    %28 = vector.load %arg1[%c0_5, %c0_6] : memref<8x768xbf16, #tpu.memory_space<vmem>>, vector<8x768xbf16>
    %c0_7 = arith.constant 0 : index
    %c0_8 = arith.constant 0 : index
    %29 = vector.load %arg5[%c0_7, %c0_8] : memref<768x256xbf16, #tpu.memory_space<vmem>>, vector<768x256xbf16>
    %cst = arith.constant dense<0.000000e+00> : vector<8x256xf32>
    %30 = tpu.matmul %28, %29, %cst {dimension_numbers = #tpu.dot_dimension_numbers<[1], [0], [0], [1], [0, 0, 1, 1], [], []>} : vector<8x768xbf16>, vector<768x256xbf16>, vector<8x256xf32> -> vector<8x256xf32>
    %31 = vector.extract_strided_slice %27 {offsets = [0, 0], sizes = [8, 256], strides = [1, 1]} : vector<8x2304xf32> to vector<8x256xf32>
    %32 = arith.addf %30, %31 : vector<8x256xf32>
    %cst_9 = arith.constant 2.000000e-01 : f32
    %33 = vector.broadcast %cst_9 : f32 to vector<8x256xf32>
    %34 = arith.mulf %33, %32 : vector<8x256xf32>
    %35 = arith.maximumf %32, %34 : vector<8x256xf32>
    %36 = arith.truncf %35 : vector<8x256xf32> to vector<8x256xbf16>
    %c0_10 = arith.constant 0 : index
    %c0_11 = arith.constant 0 : index
    %c0_12 = arith.constant 0 : index
    %37 = vector.load %arg6[%c0_10, %c0_11, %c0_12] : memref<4x256x256xbf16, #tpu.memory_space<vmem>>, vector<1x256x256xbf16>
    %38 = vector.shape_cast %37 : vector<1x256x256xbf16> to vector<256x256xbf16>
    %cst_13 = arith.constant dense<0.000000e+00> : vector<8x256xf32>
    %39 = tpu.matmul %36, %38, %cst_13 {dimension_numbers = #tpu.dot_dimension_numbers<[1], [0], [0], [1], [0, 0, 1, 1], [], []>} : vector<8x256xbf16>, vector<256x256xbf16>, vector<8x256xf32> -> vector<8x256xf32>
    %40 = vector.extract_strided_slice %27 {offsets = [0, 256], sizes = [8, 256], strides = [1, 1]} : vector<8x2304xf32> to vector<8x256xf32>
    %41 = arith.addf %39, %40 : vector<8x256xf32>
    %cst_14 = arith.constant 2.000000e-01 : f32
    %42 = vector.broadcast %cst_14 : f32 to vector<8x256xf32>
    %43 = arith.mulf %42, %41 : vector<8x256xf32>
    %44 = arith.maximumf %41, %43 : vector<8x256xf32>
    %45 = arith.truncf %44 : vector<8x256xf32> to vector<8x256xbf16>
    %c0_15 = arith.constant 0 : index
    %c0_16 = arith.constant 0 : index
    %c0_17 = arith.constant 0 : index
    %46 = vector.load %arg7[%c0_15, %c0_16, %c0_17] : memref<4x256x256xbf16, #tpu.memory_space<vmem>>, vector<1x256x256xbf16>
    %47 = vector.shape_cast %46 : vector<1x256x256xbf16> to vector<256x256xbf16>
    %cst_18 = arith.constant dense<0.000000e+00> : vector<8x256xf32>
    %48 = tpu.matmul %45, %47, %cst_18 {dimension_numbers = #tpu.dot_dimension_numbers<[1], [0], [0], [1], [0, 0, 1, 1], [], []>} : vector<8x256xbf16>, vector<256x256xbf16>, vector<8x256xf32> -> vector<8x256xf32>
    %49 = arith.addf %35, %48 : vector<8x256xf32>
    %50 = vector.extract_strided_slice %27 {offsets = [0, 512], sizes = [8, 256], strides = [1, 1]} : vector<8x2304xf32> to vector<8x256xf32>
    %51 = arith.addf %49, %50 : vector<8x256xf32>
    %52 = arith.truncf %51 : vector<8x256xf32> to vector<8x256xbf16>
    %c1 = arith.constant 1 : index
    %c0_19 = arith.constant 0 : index
    %c0_20 = arith.constant 0 : index
    %53 = vector.load %arg6[%c1, %c0_19, %c0_20] : memref<4x256x256xbf16, #tpu.memory_space<vmem>>, vector<1x256x256xbf16>
    %54 = vector.shape_cast %53 : vector<1x256x256xbf16> to vector<256x256xbf16>
    %cst_21 = arith.constant dense<0.000000e+00> : vector<8x256xf32>
    %55 = tpu.matmul %52, %54, %cst_21 {dimension_numbers = #tpu.dot_dimension_numbers<[1], [0], [0], [1], [0, 0, 1, 1], [], []>} : vector<8x256xbf16>, vector<256x256xbf16>, vector<8x256xf32> -> vector<8x256xf32>
    %56 = vector.extract_strided_slice %27 {offsets = [0, 768], sizes = [8, 256], strides = [1, 1]} : vector<8x2304xf32> to vector<8x256xf32>
    %57 = arith.addf %55, %56 : vector<8x256xf32>
    %cst_22 = arith.constant 2.000000e-01 : f32
    %58 = vector.broadcast %cst_22 : f32 to vector<8x256xf32>
    %59 = arith.mulf %58, %57 : vector<8x256xf32>
    %60 = arith.maximumf %57, %59 : vector<8x256xf32>
    %61 = arith.truncf %60 : vector<8x256xf32> to vector<8x256xbf16>
    %c1_23 = arith.constant 1 : index
    %c0_24 = arith.constant 0 : index
    %c0_25 = arith.constant 0 : index
    %62 = vector.load %arg7[%c1_23, %c0_24, %c0_25] : memref<4x256x256xbf16, #tpu.memory_space<vmem>>, vector<1x256x256xbf16>
    %63 = vector.shape_cast %62 : vector<1x256x256xbf16> to vector<256x256xbf16>
    %cst_26 = arith.constant dense<0.000000e+00> : vector<8x256xf32>
    %64 = tpu.matmul %61, %63, %cst_26 {dimension_numbers = #tpu.dot_dimension_numbers<[1], [0], [0], [1], [0, 0, 1, 1], [], []>} : vector<8x256xbf16>, vector<256x256xbf16>, vector<8x256xf32> -> vector<8x256xf32>
    %65 = arith.addf %51, %64 : vector<8x256xf32>
    %66 = vector.extract_strided_slice %27 {offsets = [0, 1024], sizes = [8, 256], strides = [1, 1]} : vector<8x2304xf32> to vector<8x256xf32>
    %67 = arith.addf %65, %66 : vector<8x256xf32>
    %68 = arith.truncf %67 : vector<8x256xf32> to vector<8x256xbf16>
    %c2 = arith.constant 2 : index
    %c0_27 = arith.constant 0 : index
    %c0_28 = arith.constant 0 : index
    %69 = vector.load %arg6[%c2, %c0_27, %c0_28] : memref<4x256x256xbf16, #tpu.memory_space<vmem>>, vector<1x256x256xbf16>
    %70 = vector.shape_cast %69 : vector<1x256x256xbf16> to vector<256x256xbf16>
    %cst_29 = arith.constant dense<0.000000e+00> : vector<8x256xf32>
    %71 = tpu.matmul %68, %70, %cst_29 {dimension_numbers = #tpu.dot_dimension_numbers<[1], [0], [0], [1], [0, 0, 1, 1], [], []>} : vector<8x256xbf16>, vector<256x256xbf16>, vector<8x256xf32> -> vector<8x256xf32>
    %72 = vector.extract_strided_slice %27 {offsets = [0, 1280], sizes = [8, 256], strides = [1, 1]} : vector<8x2304xf32> to vector<8x256xf32>
    %73 = arith.addf %71, %72 : vector<8x256xf32>
    %cst_30 = arith.constant 2.000000e-01 : f32
    %74 = vector.broadcast %cst_30 : f32 to vector<8x256xf32>
    %75 = arith.mulf %74, %73 : vector<8x256xf32>
    %76 = arith.maximumf %73, %75 : vector<8x256xf32>
    %77 = arith.truncf %76 : vector<8x256xf32> to vector<8x256xbf16>
    %c2_31 = arith.constant 2 : index
    %c0_32 = arith.constant 0 : index
    %c0_33 = arith.constant 0 : index
    %78 = vector.load %arg7[%c2_31, %c0_32, %c0_33] : memref<4x256x256xbf16, #tpu.memory_space<vmem>>, vector<1x256x256xbf16>
    %79 = vector.shape_cast %78 : vector<1x256x256xbf16> to vector<256x256xbf16>
    %cst_34 = arith.constant dense<0.000000e+00> : vector<8x256xf32>
    %80 = tpu.matmul %77, %79, %cst_34 {dimension_numbers = #tpu.dot_dimension_numbers<[1], [0], [0], [1], [0, 0, 1, 1], [], []>} : vector<8x256xbf16>, vector<256x256xbf16>, vector<8x256xf32> -> vector<8x256xf32>
    %81 = arith.addf %67, %80 : vector<8x256xf32>
    %82 = vector.extract_strided_slice %27 {offsets = [0, 1536], sizes = [8, 256], strides = [1, 1]} : vector<8x2304xf32> to vector<8x256xf32>
    %83 = arith.addf %81, %82 : vector<8x256xf32>
    %84 = arith.truncf %83 : vector<8x256xf32> to vector<8x256xbf16>
    %c3 = arith.constant 3 : index
    %c0_35 = arith.constant 0 : index
    %c0_36 = arith.constant 0 : index
    %85 = vector.load %arg6[%c3, %c0_35, %c0_36] : memref<4x256x256xbf16, #tpu.memory_space<vmem>>, vector<1x256x256xbf16>
    %86 = vector.shape_cast %85 : vector<1x256x256xbf16> to vector<256x256xbf16>
    %cst_37 = arith.constant dense<0.000000e+00> : vector<8x256xf32>
    %87 = tpu.matmul %84, %86, %cst_37 {dimension_numbers = #tpu.dot_dimension_numbers<[1], [0], [0], [1], [0, 0, 1, 1], [], []>} : vector<8x256xbf16>, vector<256x256xbf16>, vector<8x256xf32> -> vector<8x256xf32>
    %88 = vector.extract_strided_slice %27 {offsets = [0, 1792], sizes = [8, 256], strides = [1, 1]} : vector<8x2304xf32> to vector<8x256xf32>
    %89 = arith.addf %87, %88 : vector<8x256xf32>
    %cst_38 = arith.constant 2.000000e-01 : f32
    %90 = vector.broadcast %cst_38 : f32 to vector<8x256xf32>
    %91 = arith.mulf %90, %89 : vector<8x256xf32>
    %92 = arith.maximumf %89, %91 : vector<8x256xf32>
    %93 = arith.truncf %92 : vector<8x256xf32> to vector<8x256xbf16>
    %c3_39 = arith.constant 3 : index
    %c0_40 = arith.constant 0 : index
    %c0_41 = arith.constant 0 : index
    %94 = vector.load %arg7[%c3_39, %c0_40, %c0_41] : memref<4x256x256xbf16, #tpu.memory_space<vmem>>, vector<1x256x256xbf16>
    %95 = vector.shape_cast %94 : vector<1x256x256xbf16> to vector<256x256xbf16>
    %cst_42 = arith.constant dense<0.000000e+00> : vector<8x256xf32>
    %96 = tpu.matmul %93, %95, %cst_42 {dimension_numbers = #tpu.dot_dimension_numbers<[1], [0], [0], [1], [0, 0, 1, 1], [], []>} : vector<8x256xbf16>, vector<256x256xbf16>, vector<8x256xf32> -> vector<8x256xf32>
    %97 = arith.addf %83, %96 : vector<8x256xf32>
    %98 = vector.extract_strided_slice %27 {offsets = [0, 2048], sizes = [8, 256], strides = [1, 1]} : vector<8x2304xf32> to vector<8x256xf32>
    %99 = arith.addf %97, %98 : vector<8x256xf32>
    %100 = arith.truncf %99 : vector<8x256xf32> to vector<8x256xbf16>
    %c0_43 = arith.constant 0 : index
    %c0_44 = arith.constant 0 : index
    %101 = vector.load %arg8[%c0_43, %c0_44] : memref<256x768xbf16, #tpu.memory_space<vmem>>, vector<256x768xbf16>
    %cst_45 = arith.constant dense<0.000000e+00> : vector<8x768xf32>
    %102 = tpu.matmul %100, %101, %cst_45 {dimension_numbers = #tpu.dot_dimension_numbers<[1], [0], [0], [1], [0, 0, 1, 1], [], []>} : vector<8x256xbf16>, vector<256x768xbf16>, vector<8x768xf32> -> vector<8x768xf32>
    %c0_46 = arith.constant 0 : index
    %c0_47 = arith.constant 0 : index
    %103 = vector.load %arg9[%c0_46, %c0_47] : memref<1x768xf32, #tpu.memory_space<vmem>>, vector<1x768xf32>
    %104 = vector.broadcast %103 : vector<1x768xf32> to vector<8x768xf32>
    %105 = arith.addf %102, %104 : vector<8x768xf32>
    %c0_48 = arith.constant 0 : index
    %c0_49 = arith.constant 0 : index
    %106 = vector.load %arg10[%c0_48, %c0_49] : memref<8x768xf32, #tpu.memory_space<vmem>>, vector<8x768xf32>
    tpu.vector_store %arg10[%c0_48, %c0_49], %105 {strides = array<i32>} : memref<8x768xf32, #tpu.memory_space<vmem>>, vector<8x768xf32>,
    return
  }
  func.func @transform_0(%arg0: i32) -> (i32, i32) {
    %c0_i32 = arith.constant 0 : i32
    %c0_i32_0 = arith.constant 0 : i32
    return %arg0, %c0_i32 : i32, i32
  }
  func.func @transform_1(%arg0: i32) -> (i32, i32) {
    %c0_i32 = arith.constant 0 : i32
    %c0_i32_0 = arith.constant 0 : i32
    return %arg0, %c0_i32 : i32, i32
  }
  func.func @transform_2(%arg0: i32) -> (i32, i32) {
    %c0_i32 = arith.constant 0 : i32
    %c0_i32_0 = arith.constant 0 : i32
    %c0_i32_1 = arith.constant 0 : i32
    return %c0_i32, %c0_i32_0 : i32, i32
  }
  func.func @transform_3(%arg0: i32) -> (i32, i32) {
    %c0_i32 = arith.constant 0 : i32
    %c0_i32_0 = arith.constant 0 : i32
    %c0_i32_1 = arith.constant 0 : i32
    return %c0_i32, %c0_i32_0 : i32, i32
  }
  func.func @transform_4(%arg0: i32) -> (i32, i32) {
    %c0_i32 = arith.constant 0 : i32
    %c0_i32_0 = arith.constant 0 : i32
    %c0_i32_1 = arith.constant 0 : i32
    return %c0_i32, %c0_i32_0 : i32, i32
  }
  func.func @transform_5(%arg0: i32) -> (i32, i32, i32) {
    %c0_i32 = arith.constant 0 : i32
    %c0_i32_0 = arith.constant 0 : i32
    %c0_i32_1 = arith.constant 0 : i32
    %c0_i32_2 = arith.constant 0 : i32
    return %c0_i32, %c0_i32_0, %c0_i32_1 : i32, i32, i32
  }
  func.func @transform_6(%arg0: i32) -> (i32, i32, i32) {
    %c0_i32 = arith.constant 0 : i32
    %c0_i32_0 = arith.constant 0 : i32
    %c0_i32_1 = arith.constant 0 : i32
    %c0_i32_2 = arith.constant 0 : i32
    return %c0_i32, %c0_i32_0, %c0_i32_1 : i32, i32, i32
  }
  func.func @transform_7(%arg0: i32) -> (i32, i32) {
    %c0_i32 = arith.constant 0 : i32
    %c0_i32_0 = arith.constant 0 : i32
    %c0_i32_1 = arith.constant 0 : i32
    return %c0_i32, %c0_i32_0 : i32, i32
  }
  func.func @transform_8(%arg0: i32) -> (i32, i32) {
    %c0_i32 = arith.constant 0 : i32
    %c0_i32_0 = arith.constant 0 : i32
    %c0_i32_1 = arith.constant 0 : i32
    return %c0_i32, %c0_i32_0 : i32, i32
  }
  func.func @transform_9(%arg0: i32) -> (i32, i32) {
    %c0_i32 = arith.constant 0 : i32
    %c0_i32_0 = arith.constant 0 : i32
    return %arg0, %c0_i32 : i32, i32
  }
}

</mosaic_0001>

<bundles_post_ra>
// kernel: tpu_custom_call.1
= control target key start
LH: loop header
LB: loop body
LE: loop exit
PB: predicated region body
PF: predicated region fallthrough
CT: control target
= control target key end

     0   :  { %14 = vsyncpa [#allocation3], 0  ;;  %s7005_s0 = inlined_call_operand.hbm [shape: bf16[8,768], index: 0, kind: input, shape index: {}]   ;;  %s7006_s1 = inlined_call_operand.vmem [shape: f32[8,4], index: 1, kind: input, shape index: {}]   ;;  %s7007_s2 = inlined_call_operand.hbm [shape: f32[4,2304], index: 2, kind: input, shape index: {}]   ;;  %s7008_s3 = inlined_call_operand.hbm [shape: f32[1,2304], index: 3, kind: input, shape index: {}]   ;;  %s7009_s4 = inlined_call_operand.hbm [shape: bf16[768,256], index: 4, kind: input, shape index: {}]   ;;  %s7010_s5 = inlined_call_operand.hbm [shape: bf16[4,256,256], index: 5, kind: input, shape index: {}]   ;;  %s7011_s6 = inlined_call_operand.hbm [shape: bf16[4,256,256], index: 6, kind: input, shape index: {}]   ;;  %s7012_s7 = inlined_call_operand.hbm [shape: bf16[256,768], index: 7, kind: input, shape index: {}]   ;;  %s7013_s8 = inlined_call_operand.vmem [shape: f32[1,768], index: 8, kind: input, shape index: {}]   ;;  %s7014_s9 = inlined_call_operand.hbm [shape: f32[8,768], index: 9, kind: output, shape index: {}]  }
   0x1   :  { %15 = vsyncpa [#allocation6], 0 }
   0x2   :  { %16 = vsyncpa [#allocation9], 0 }
   0x3   :  { %17 = vsyncpa [#allocation12], 0  ;;  %s37_s11 = sshll.u32 %s7007_s2, 4  ;;  %s38_s11 = int_to_ptr.hbm [resolvable:$true] %s37_s11 }
   0x4   :  { %18 = vsyncpa [#allocation4], 0  ;;  %s6579_s12 = smov [#allocation5]   ;;  %s58_s16 = sshll.u32 %s7009_s4, 4  ;;  %s59_s16 = int_to_ptr.hbm [resolvable:$true] %s58_s16 }
   0x5   :  { %s39_s13 = sshll.u32 %s6579_s12, 4  ;;  %s6580_s17 = smov [#allocation8]   ;;  %s40_s13 = int_to_ptr.vmem [resolvable:$true] %s39_s13 }
   0x6   :  { %42 = dma.hbm_to_vmem [thread:$0]  %s38_s11, 1152, %s40_s13, [#allocation6]  }
   0x7   :  { %s60_s18 = sshll.u32 %s6580_s17, 4  ;;  %s6581_s19 = smov 128   ;;  %s61_s18 = int_to_ptr.vmem [resolvable:$true] %s60_s18 }
   0x8   :  { %s6582_s20 = smov 8   ;;  %s84_s22 = sshll.u32 %s7011_s6, 4  ;;  %s85_s22 = int_to_ptr.hbm [resolvable:$true] %s84_s22 }
   0x9   :  { %66 = dma.hbm_to_vmem [thread:$0]  %s59_s16, 12288, %s61_s18, [#allocation9], %s6581_s19, %s6581_s19, %s6582_s20  }
   0xa   :  { %s6583_s23 = smov [#allocation11]   ;;  %s24_s26 = sshll.u32 %s7005_s0, 4  ;;  %s25_s26 = int_to_ptr.hbm [resolvable:$true] %s24_s26 }
   0xb   :  { %s86_s24 = sshll.u32 %s6583_s23, 4  ;;  %s6584_s27 = smov [#allocation2]   ;;  %s87_s24 = int_to_ptr.vmem [resolvable:$true] %s86_s24 }
   0xc   :  { %92 = dma.hbm_to_vmem [thread:$0]  %s85_s22, 16384, %s87_s24, [#allocation12], %s6581_s19, %s6581_s19, %s6582_s20  }
   0xd   :  { %s26_s28 = sshll.u32 %s6584_s27, 4  ;;  %s48_s10 = sshll.u32 %s7008_s3, 4  ;;  %s27_s28 = int_to_ptr.vmem [resolvable:$true] %s26_s28  ;;  %s49_s10 = int_to_ptr.hbm [resolvable:$true] %s48_s10 }
   0xe   :  { %29 = dma.hbm_to_vmem [thread:$0]  %s25_s26, 384, %s27_s28, [#allocation3]  }
   0xf   :  { %s71_s12 = sshll.u32 %s7010_s5, 4  ;;  %s6585_s13 = smov [#allocation7]   ;;  %s72_s12 = int_to_ptr.hbm [resolvable:$true] %s71_s12 }
  0x10   :  { %s50_s0 = sshll.u32 %s6585_s13, 4  ;;  %s6586_s14 = smov [#allocation10]   ;;  %s51_s0 = int_to_ptr.vmem [resolvable:$true] %s50_s0 }
  0x11   :  { %53 = dma.hbm_to_vmem [thread:$0]  %s49_s10, 288, %s51_s0, [#allocation6]  }
  0x12   :  { %s73_s15 = sshll.u32 %s6586_s14, 4  ;;  %s97_s18 = sshll.u32 %s7012_s7, 4  ;;  %s74_s15 = int_to_ptr.vmem [resolvable:$true] %s73_s15  ;;  %s98_s18 = int_to_ptr.hbm [resolvable:$true] %s97_s18 }
  0x13   :  { %79 = dma.hbm_to_vmem [thread:$0]  %s72_s12, 16384, %s74_s15, [#allocation9], %s6581_s19, %s6581_s19, %s6582_s20  }
  0x14   :  { %s6587_s3 = smov [#allocation13]   ;;  %s6588_s5 = smov 384  }
  0x15   :  { %s99_s2 = sshll.u32 %s6587_s3, 4  ;;  %s6589_s21 = smov 24   ;;  %s100_s2 = int_to_ptr.vmem [resolvable:$true] %s99_s2 }
  0x16   :  { %105 = dma.hbm_to_vmem [thread:$0]  %s98_s18, 12288, %s100_s2, [#allocation12], %s6588_s5, %s6588_s5, %s6589_s21  }
  0x17   :  { %6569 = dma.done.wait [#allocation3], 384  }
  0x18   :  { %6570 = vsyncadd [#allocation3], 4294966912 }
  0x19   :  { %6571 = dma.done.wait [#allocation6], 1440  }
  0x1a   :  { %6572 = vsyncadd [#allocation6], 4294965856 }
  0x1b   :  { %6573 = dma.done.wait [#allocation9], 28672  }
  0x1c   :  { %6574 = vsyncadd [#allocation9], 4294938624 }
  0x1d   :  { %6575 = dma.done.wait [#allocation12], 28672  }
  0x1e   :  { %6576 = vsyncadd [#allocation12], 4294938624  ;;  %v4172_v0 = vld [vmem:[#allocation8 + $0x70] sm:$0xf]  ;;  %v5921_v1 = vld [vmem:[#allocation8 + $0x74] sm:$0xf0] }
  0x1f   :  { %v4236_v2 = vld [vmem:[#allocation8 + $0xf0] sm:$0xf]  ;;  %v4173_v3 = vor.u32 %v5921_v1, %v4172_v0  ;;  %v5937_v4 = vld [vmem:[#allocation8 + $0xf4] sm:$0xf0]  ;;  %v4164_v11 = vld [vmem:[#allocation8 + $0x60] sm:$0xf] }
  0x20   :  { %v4300_v5 = vld [vmem:[#allocation8 + $0x170] sm:$0xf]  ;;  %v5953_v6 = vld [vmem:[#allocation8 + $0x174] sm:$0xf0]  ;;  %v4237_v7 = vor.u32 %v5937_v4, %v4236_v2  ;;  %v5919_v13 = vld [vmem:[#allocation8 + $0x64] sm:$0xf0] }
  0x21   :  { %v4301_v8 = vor.u32 %v5953_v6, %v4300_v5  ;;  %v4364_v9 = vld [vmem:[#allocation8 + $0x1f0] sm:$0xf]  ;;  %v5969_v10 = vld [vmem:[#allocation8 + $0x1f4] sm:$0xf0]  ;;  %1174 = vmatpush.bf16.msra.mxu0 %v4173_v3  ;;  %v4228_v14 = vld [vmem:[#allocation8 + $0xe0] sm:$0xf]  ;;  %v4165_v16 = vor.u32 %v5919_v13, %v4164_v11 }
  0x22   :  { %v4365_v12 = vor.u32 %v5969_v10, %v4364_v9  ;;  %v5935_v15 = vld [vmem:[#allocation8 + $0xe4] sm:$0xf0]  ;;  %1187 = vmatpush.bf16.msra.mxu1 %v4237_v7  ;;  %v4292_v18 = vld [vmem:[#allocation8 + $0x160] sm:$0xf]  ;;  %v4156_v23 = vld [vmem:[#allocation8 + $0x50] sm:$0xf] }
  0x23   :  { %1200 = vmatpush.bf16.msra.mxu2 %v4301_v8  ;;  %v4229_v17 = vor.u32 %v5935_v15, %v4228_v14  ;;  %v5951_v19 = vld [vmem:[#allocation8 + $0x164] sm:$0xf0]  ;;  %v4356_v20 = vld [vmem:[#allocation8 + $0x1e0] sm:$0xf]  ;;  %v5917_v24 = vld [vmem:[#allocation8 + $0x54] sm:$0xf0] }
  0x24   :  { %1213 = vmatpush.bf16.msra.mxu3 %v4365_v12  ;;  %v4293_v21 = vor.u32 %v5951_v19, %v4292_v18  ;;  %v5967_v22 = vld [vmem:[#allocation8 + $0x1e4] sm:$0xf0]  ;;  %v4220_v26 = vld [vmem:[#allocation8 + $0xd0] sm:$0xf]  ;;  %v5933_v27 = vld [vmem:[#allocation8 + $0xd4] sm:$0xf0]  ;;  %v4157_v29 = vor.u32 %v5917_v24, %v4156_v23 }
  0x25   :  { %v4357_v25 = vor.u32 %v5967_v22, %v4356_v20  ;;  %v4284_v28 = vld [vmem:[#allocation8 + $0x150] sm:$0xf]  ;;  %1175 = vmatpush.bf16.msra.mxu0 %v4165_v16  ;;  %v5949_v30 = vld [vmem:[#allocation8 + $0x154] sm:$0xf0]  ;;  %v4221_v33 = vor.u32 %v5933_v27, %v4220_v26  ;;  %v4148_v35 = vld [vmem:[#allocation8 + $0x40] sm:$0xf] }
  0x26   :  { %v4348_v31 = vld [vmem:[#allocation8 + $0x1d0] sm:$0xf]  ;;  %v5965_v32 = vld [vmem:[#allocation8 + $0x1d4] sm:$0xf0]  ;;  %1188 = vmatpush.bf16.msra.mxu1 %v4229_v17  ;;  %v4285_v34 = vor.u32 %v5949_v30, %v4284_v28  ;;  %v5915_v36 = vld [vmem:[#allocation8 + $0x44] sm:$0xf0] }
  0x27   :  { %1201 = vmatpush.bf16.msra.mxu2 %v4293_v21  ;;  %v4212_v37 = vld [vmem:[#allocation8 + $0xc0] sm:$0xf]  ;;  %v4349_v38 = vor.u32 %v5965_v32, %v4348_v31  ;;  %v5931_v39 = vld [vmem:[#allocation8 + $0xc4] sm:$0xf0]  ;;  %v4149_v44 = vor.u32 %v5915_v36, %v4148_v35  ;;  %v4140_v47 = vld [vmem:[#allocation8 + $0x30] sm:$0xf] }
  0x28   :  { %1214 = vmatpush.bf16.msra.mxu3 %v4357_v25  ;;  %v4276_v40 = vld [vmem:[#allocation8 + $0x140] sm:$0xf]  ;;  %v5947_v41 = vld [vmem:[#allocation8 + $0x144] sm:$0xf0]  ;;  %v4213_v45 = vor.u32 %v5931_v39, %v4212_v37  ;;  %v5913_v48 = vld [vmem:[#allocation8 + $0x34] sm:$0xf0] }
  0x29   :  { %v4340_v42 = vld [vmem:[#allocation8 + $0x1c0] sm:$0xf]  ;;  %v5963_v43 = vld [vmem:[#allocation8 + $0x1c4] sm:$0xf0]  ;;  %1176 = vmatpush.bf16.msra.mxu0 %v4157_v29  ;;  %v4277_v46 = vor.u32 %v5947_v41, %v4276_v40  ;;  %v4204_v49 = vld [vmem:[#allocation8 + $0xb0] sm:$0xf]  ;;  %v4141_v56 = vor.u32 %v5913_v48, %v4140_v47 }
  0x2a   :  { %1189 = vmatpush.bf16.msra.mxu1 %v4221_v33  ;;  %v4341_v50 = vor.u32 %v5963_v43, %v4340_v42  ;;  %v5929_v51 = vld [vmem:[#allocation8 + $0xb4] sm:$0xf0]  ;;  %v4268_v52 = vld [vmem:[#allocation8 + $0x130] sm:$0xf]  ;;  %v4132_v59 = vld [vmem:[#allocation8 + $0x20] sm:$0xf] }
  0x2b   :  { %1202 = vmatpush.bf16.msra.mxu2 %v4285_v34  ;;  %v5945_v53 = vld [vmem:[#allocation8 + $0x134] sm:$0xf0]  ;;  %v4332_v54 = vld [vmem:[#allocation8 + $0x1b0] sm:$0xf]  ;;  %v4205_v57 = vor.u32 %v5929_v51, %v4204_v49  ;;  %v5911_v60 = vld [vmem:[#allocation8 + $0x24] sm:$0xf0] }
  0x2c   :  { %1215 = vmatpush.bf16.msra.mxu3 %v4349_v38  ;;  %v5961_v55 = vld [vmem:[#allocation8 + $0x1b4] sm:$0xf0]  ;;  %v4269_v58 = vor.u32 %v5945_v53, %v4268_v52  ;;  %v4196_v61 = vld [vmem:[#allocation8 + $0xa0] sm:$0xf]  ;;  %v5927_v63 = vld [vmem:[#allocation8 + $0xa4] sm:$0xf0]  ;;  %v4133_v4 = vor.u32 %v5911_v60, %v4132_v59 }
  0x2d   :  { %1177 = vmatpush.bf16.msra.mxu0 %v4149_v44  ;;  %v4333_v62 = vor.u32 %v5961_v55, %v4332_v54  ;;  %v4260_v0 = vld [vmem:[#allocation8 + $0x120] sm:$0xf]  ;;  %v5943_v1 = vld [vmem:[#allocation8 + $0x124] sm:$0xf0]  ;;  %v4197_v5 = vor.u32 %v5927_v63, %v4196_v61  ;;  %v4124_v7 = vld [vmem:[#allocation8 + $0x10] sm:$0xf] }
  0x2e   :  { %1190 = vmatpush.bf16.msra.mxu1 %v4213_v45  ;;  %v4324_v2 = vld [vmem:[#allocation8 + $0x1a0] sm:$0xf]  ;;  %v5959_v3 = vld [vmem:[#allocation8 + $0x1a4] sm:$0xf0]  ;;  %v4261_v6 = vor.u32 %v5943_v1, %v4260_v0  ;;  %v5909_v8 = vld [vmem:[#allocation8 + $0x14] sm:$0xf0] }
  0x2f   :  { %1203 = vmatpush.bf16.msra.mxu2 %v4277_v46  ;;  %v4188_v9 = vld [vmem:[#allocation8 + $0x90] sm:$0xf]  ;;  %v4325_v10 = vor.u32 %v5959_v3, %v4324_v2  ;;  %v5925_v11 = vld [vmem:[#allocation8 + $0x94] sm:$0xf0]  ;;  %v4125_v16 = vor.u32 %v5909_v8, %v4124_v7  ;;  %v4116_v17 = vld [vmem:[#allocation8] sm:$0xf] }
  0x30   :  { %1216 = vmatpush.bf16.msra.mxu3 %v4341_v50  ;;  %v4252_v12 = vld [vmem:[#allocation8 + $0x110] sm:$0xf]  ;;  %v5941_v13 = vld [vmem:[#allocation8 + $0x114] sm:$0xf0]  ;;  %v5907_v18 = vld [vmem:[#allocation8 + $0x4] sm:$0xf0]  ;;  %v4189_v19 = vor.u32 %v5925_v11, %v4188_v9 }
  0x31   :  { %1178 = vmatpush.bf16.msra.mxu0 %v4141_v56  ;;  %v4316_v14 = vld [vmem:[#allocation8 + $0x190] sm:$0xf]  ;;  %v5957_v15 = vld [vmem:[#allocation8 + $0x194] sm:$0xf0]  ;;  %v4253_v20 = vor.u32 %v5941_v13, %v4252_v12  ;;  %v4180_v21 = vld [vmem:[#allocation8 + $0x80] sm:$0xf]  ;;  %v4117_v31 = vor.u32 %v5907_v18, %v4116_v17 }
  0x32   :  { %1191 = vmatpush.bf16.msra.mxu1 %v4205_v57  ;;  %v5923_v22 = vld [vmem:[#allocation8 + $0x84] sm:$0xf0]  ;;  %v4244_v23 = vld [vmem:[#allocation8 + $0x100] sm:$0xf]  ;;  %v4317_v24 = vor.u32 %v5957_v15, %v4316_v14  ;;  %v4428_v28 = vld [vmem:[#allocation8 + $0x270] sm:$0xf] }
  0x33   :  { %1204 = vmatpush.bf16.msra.mxu2 %v4269_v58  ;;  %v5939_v25 = vld [vmem:[#allocation8 + $0x104] sm:$0xf0]  ;;  %v4308_v26 = vld [vmem:[#allocation8 + $0x180] sm:$0xf]  ;;  %v5985_v29 = vld [vmem:[#allocation8 + $0x274] sm:$0xf0]  ;;  %v4181_v35 = vor.u32 %v5923_v22, %v4180_v21 }
  0x34   :  { %1217 = vmatpush.bf16.msra.mxu3 %v4333_v62  ;;  %v5955_v27 = vld [vmem:[#allocation8 + $0x184] sm:$0xf0]  ;;  %v4492_v30 = vld [vmem:[#allocation8 + $0x2f0] sm:$0xf]  ;;  %v6001_v32 = vld [vmem:[#allocation8 + $0x2f4] sm:$0xf0]  ;;  %v4245_v36 = vor.u32 %v5939_v25, %v4244_v23  ;;  %v4429_v40 = vor.u32 %v5985_v29, %v4428_v28 }
  0x35   :  { %1179 = vmatpush.bf16.msra.mxu0 %v4133_v4  ;;  %v5920_v33 = vld [vmem:[#allocation8 + $0x74] sm:$0xf]  ;;  %v4174_v34 = vld [vmem:[#allocation8 + $0x78] sm:$0xf0]  ;;  %v4309_v39 = vor.u32 %v5955_v27, %v4308_v26  ;;  %v4493_v41 = vor.u32 %v6001_v32, %v4492_v30  ;;  %v4420_v43 = vld [vmem:[#allocation8 + $0x260] sm:$0xf] }
  0x36   :  { %1192 = vmatpush.bf16.msra.mxu1 %v4197_v5  ;;  %v5936_v37 = vld [vmem:[#allocation8 + $0xf4] sm:$0xf]  ;;  %v4238_v38 = vld [vmem:[#allocation8 + $0xf8] sm:$0xf0]  ;;  %v4177_v42 = vor.u32 %v5920_v33, %v4174_v34  ;;  %v5983_v44 = vld [vmem:[#allocation8 + $0x264] sm:$0xf0] }
  0x37   :  { %1205 = vmatpush.bf16.msra.mxu2 %v4261_v6  ;;  %v4484_v45 = vld [vmem:[#allocation8 + $0x2e0] sm:$0xf]  ;;  %v4241_v46 = vor.u32 %v5936_v37, %v4238_v38  ;;  %v5999_v47 = vld [vmem:[#allocation8 + $0x2e4] sm:$0xf0]  ;;  %v5918_v48 = vld [vmem:[#allocation8 + $0x64] sm:$0xf]  ;;  %v4421_v53 = vor.u32 %v5983_v44, %v4420_v43 }
  0x38   :  { %1218 = vmatpush.bf16.msra.mxu3 %v4325_v10  ;;  %v4166_v49 = vld [vmem:[#allocation8 + $0x68] sm:$0xf0]  ;;  %v5934_v50 = vld [vmem:[#allocation8 + $0xe4] sm:$0xf]  ;;  %v4412_v54 = vld [vmem:[#allocation8 + $0x250] sm:$0xf]  ;;  %v4485_v58 = vor.u32 %v5999_v47, %v4484_v45 }
  0x39   :  { %1180 = vmatpush.bf16.msra.mxu0 %v4125_v16  ;;  %v4230_v51 = vld [vmem:[#allocation8 + $0xe8] sm:$0xf0]  ;;  %v5981_v55 = vld [vmem:[#allocation8 + $0x254] sm:$0xf0]  ;;  %v4169_v59 = vor.u32 %v5918_v48, %v4166_v49  ;;  %v4476_v60 = vld [vmem:[#allocation8 + $0x2d0] sm:$0xf] }
  0x3a   :  { %1193 = vmatpush.bf16.msra.mxu1 %v4189_v19  ;;  %v574_v52 = vld [vmem:[#allocation2] sm:$0xff]  ;;  %v5997_v61 = vld [vmem:[#allocation8 + $0x2d4] sm:$0xf0]  ;;  %v4233_v63 = vor.u32 %v5934_v50, %v4230_v51  ;;  %v4158_v0 = vld [vmem:[#allocation8 + $0x58] sm:$0xf0]  ;;  %v6590_v2 = vmov 0   ;;  %v4413_v11 = vor.u32 %v5981_v55, %v4412_v54 }
  0x3b   :  { %1206 = vmatpush.bf16.msra.mxu2 %v4253_v20  ;;  %v676_v56 = vunpack.c.l.b16 %v574_v52  ;;  %v677_v57 = vunpack.c.h.b16 %v574_v52  ;;  %v5916_v62 = vld [vmem:[#allocation8 + $0x54] sm:$0xf]  ;;  %6370 = vset.pattern.permute.xlu0 %v6590_v2  ;;  %v4222_v6 = vld [vmem:[#allocation8 + $0xd8] sm:$0xf0]  ;;  %v6591_v8 = vmov 2   ;;  %v4477_v12 = vor.u32 %v5997_v61, %v4476_v60  ;;  %s4101_s4 = sshll.u32 %s7014_s9, 4  ;;  %s4102_s4 = int_to_ptr.hbm [resolvable:$true] %s4101_s4 }
  0x3c   :  { %1219 = vmatpush.bf16.msra.mxu3 %v4317_v24  ;;  %v6680_v3 = vld [vmem:[%s7006_s1] sm:$0xff]  ;;  %v575_v4 = vld [vmem:[#allocation2 + $0x8] sm:$0xff]  ;;  %6372 = vset.pattern.permute.xlu1 %v6591_v8  ;;  %v4161_v13 = vor.u32 %v5916_v62, %v4158_v0  ;;  %v4404_v14 = vld [vmem:[#allocation8 + $0x240] sm:$0xf]  ;;  %v6592_v37 = vmov 1   ;;  %v6593_v48 = vmov 3  }
  0x3d   :  { %1181 = vmatpush.bf16.msra.mxu0 %v4117_v31  ;;  %v6675_v1 = vpack.c.b16 %v676_v56, %v676_v56  ;;  %v5932_v5 = vld [vmem:[#allocation8 + $0xd4] sm:$0xf]  ;;  %v6682_v7 = vpack.c.b16 %v677_v57, %v677_v57  ;;  %151 = vperm.xlu0 %6370, %v6680_v3   ;;  %v678_v9 = vunpack.c.l.b16 %v575_v4  ;;  %v679_v10 = vunpack.c.h.b16 %v575_v4  ;;  %v5979_v15 = vld [vmem:[#allocation8 + $0x244] sm:$0xf0]  ;;  %v4468_v16 = vld [vmem:[#allocation8 + $0x2c0] sm:$0xf] }
  0x3e   :  { %1194 = vmatpush.bf16.msra.mxu1 %v4181_v35  ;;  %387 = vperm.xlu1 %6372, %v6680_v3   ;;  %v4225_v19 = vor.u32 %v5932_v5, %v4222_v6  ;;  %v5995_v20 = vld [vmem:[#allocation8 + $0x2c4] sm:$0xf0]  ;;  %v5914_v21 = vld [vmem:[#allocation8 + $0x44] sm:$0xf]  ;;  %v4150_v22 = vld [vmem:[#allocation8 + $0x48] sm:$0xf0]  ;;  %v4405_v25 = vor.u32 %v5979_v15, %v4404_v14 }
  0x3f   :  { %1207 = vmatpush.bf16.msra.mxu2 %v4245_v36  ;;  %v6686_v17 = vpack.c.b16 %v678_v9, %v678_v9  ;;  %v6688_v18 = vpack.c.b16 %v679_v10, %v679_v10  ;;  %v5930_v23 = vld [vmem:[#allocation8 + $0xc4] sm:$0xf]  ;;  %v4214_v24 = vld [vmem:[#allocation8 + $0xc8] sm:$0xf0]  ;;  %v4469_v26 = vor.u32 %v5995_v20, %v4468_v16  ;;  %v4153_v27 = vor.u32 %v5914_v21, %v4150_v22  ;;  %v4396_v28 = vld [vmem:[#allocation8 + $0x230] sm:$0xf] }
  0x40   :  { %1220 = vmatpush.bf16.msra.mxu3 %v4309_v39  ;;  %1182 = vmatmul.bf16.vlgmr.msra.gmra.mxu0 %v6675_v1  ;;  %v5977_v29 = vld [vmem:[#allocation8 + $0x234] sm:$0xf0]  ;;  %v4460_v30 = vld [vmem:[#allocation8 + $0x2b0] sm:$0xf]  ;;  %v4217_v31 = vor.u32 %v5930_v23, %v4214_v24  ;;  %v5912_v33 = vld [vmem:[#allocation8 + $0x34] sm:$0xf] }
  0x41   :  { %1226 = vmatpush.bf16.msrb.mxu0 %v4429_v40  ;;  %1195 = vmatmul.bf16.vlgmr.msra.gmra.mxu1 %v6682_v7  ;;  %v5993_v32 = vld [vmem:[#allocation8 + $0x2b4] sm:$0xf0]  ;;  %v4142_v34 = vld [vmem:[#allocation8 + $0x38] sm:$0xf0]  ;;  %v5928_v35 = vld [vmem:[#allocation8 + $0xb4] sm:$0xf]  ;;  %v4397_v38 = vor.u32 %v5977_v29, %v4396_v28 }
  0x42   :  { %1239 = vmatpush.bf16.msrb.mxu1 %v4493_v41  ;;  %1208 = vmatmul.bf16.vlgmr.msra.gmra.mxu2 %v6686_v17  ;;  %v4206_v36 = vld [vmem:[#allocation8 + $0xb8] sm:$0xf0]  ;;  %v4461_v39 = vor.u32 %v5993_v32, %v4460_v30  ;;  %v4145_v40 = vor.u32 %v5912_v33, %v4142_v34  ;;  %v4388_v41 = vld [vmem:[#allocation8 + $0x220] sm:$0xf]  ;;  %v5991_v45 = vld [vmem:[#allocation8 + $0x2a4] sm:$0xf0] }
  0x43   :  { %1252 = vmatpush.bf16.msrb.mxu2 %v4177_v42  ;;  %1221 = vmatmul.bf16.vlgmr.msra.gmra.mxu3 %v6688_v18  ;;  %v5975_v42 = vld [vmem:[#allocation8 + $0x224] sm:$0xf0]  ;;  %v4452_v43 = vld [vmem:[#allocation8 + $0x2a0] sm:$0xf]  ;;  %v4209_v44 = vor.u32 %v5928_v35, %v4206_v36  ;;  %v4134_v47 = vld [vmem:[#allocation8 + $0x28] sm:$0xf0] }
  0x44   :  { %1265 = vmatpush.bf16.msrb.mxu3 %v4241_v46  ;;  %v5910_v46 = vld [vmem:[#allocation8 + $0x24] sm:$0xf]  ;;  %v4198_v50 = vld [vmem:[#allocation8 + $0xa8] sm:$0xf0]  ;;  %v4389_v51 = vor.u32 %v5975_v42, %v4388_v41  ;;  %v4453_v52 = vor.u32 %v5991_v45, %v4452_v43  ;;  %v4380_v54 = vld [vmem:[#allocation8 + $0x210] sm:$0xf] }
  0x45   :  { %1227 = vmatpush.bf16.msrb.mxu0 %v4421_v53  ;;  %6371 = vset.pattern.permute.xlu0 %v6592_v37  ;;  %v5926_v49 = vld [vmem:[#allocation8 + $0xa4] sm:$0xf]  ;;  %v4137_v53 = vor.u32 %v5910_v46, %v4134_v47  ;;  %v5973_v55 = vld [vmem:[#allocation8 + $0x214] sm:$0xf0]  ;;  %v4444_v56 = vld [vmem:[#allocation8 + $0x290] sm:$0xf] }
  0x46   :  { %1240 = vmatpush.bf16.msrb.mxu1 %v4485_v58  ;;  %293 = vperm.xlu0 %6371, %v6680_v3   ;;  %v4201_v57 = vor.u32 %v5926_v49, %v4198_v50  ;;  %v5989_v58 = vld [vmem:[#allocation8 + $0x294] sm:$0xf0]  ;;  %v4126_v60 = vld [vmem:[#allocation8 + $0x18] sm:$0xf0]  ;;  %v5924_v61 = vld [vmem:[#allocation8 + $0x94] sm:$0xf] }
  0x47   :  { %1253 = vmatpush.bf16.msrb.mxu2 %v4169_v59  ;;  %6373 = vset.pattern.permute.xlu1 %v6593_v48  ;;  %v5908_v59 = vld [vmem:[#allocation8 + $0x14] sm:$0xf]  ;;  %v4190_v62 = vld [vmem:[#allocation8 + $0x98] sm:$0xf0]  ;;  %v4372_v0 = vld [vmem:[#allocation8 + $0x200] sm:$0xf]  ;;  %v4445_v4 = vor.u32 %v5989_v58, %v4444_v56 }
  0x48   :  { %1266 = vmatpush.bf16.msrb.mxu3 %v4233_v63  ;;  %481 = vperm.xlu1 %6373, %v6680_v3   ;;  %v4381_v63 = vor.u32 %v5973_v55, %v4380_v54  ;;  %v5971_v2 = vld [vmem:[#allocation8 + $0x204] sm:$0xf0]  ;;  %v4436_v3 = vld [vmem:[#allocation8 + $0x280] sm:$0xf]  ;;  %v4129_v5 = vor.u32 %v5908_v59, %v4126_v60  ;;  %v5906_v8 = vld [vmem:[#allocation8 + $0x4] sm:$0xf]  ;;  %v4193_v10 = vor.u32 %v5924_v61, %v4190_v62 }
  0x49   :  { %1228 = vmatpush.bf16.msrb.mxu0 %v4413_v11  ;;  %v5987_v6 = vld [vmem:[#allocation8 + $0x284] sm:$0xf0]  ;;  %v576_v9 = vld [vmem:[#allocation2 + $0x10] sm:$0xff]  ;;  %v4118_v11 = vld [vmem:[#allocation8 + $0x8] sm:$0xf0] }
  0x4a   :  { %1241 = vmatpush.bf16.msrb.mxu1 %v4477_v12  ;;  %v5922_v12 = vld [vmem:[#allocation8 + $0x84] sm:$0xf]  ;;  %v5952_v14 = vld [vmem:[#allocation8 + $0x174] sm:$0xf]  ;;  %v4302_v15 = vld [vmem:[#allocation8 + $0x178] sm:$0xf0]  ;;  %v680_v23 = vunpack.c.l.b16 %v576_v9  ;;  %v4437_v24 = vor.u32 %v5987_v6, %v4436_v3  ;;  %v681_v28 = vunpack.c.h.b16 %v576_v9 }
  0x4b   :  { %1254 = vmatpush.bf16.msrb.mxu2 %v4161_v13  ;;  %v4182_v13 = vld [vmem:[#allocation8 + $0x88] sm:$0xf0]  ;;  %v5968_v16 = vld [vmem:[#allocation8 + $0x1f4] sm:$0xf]  ;;  %v4366_v20 = vld [vmem:[#allocation8 + $0x1f8] sm:$0xf0]  ;;  %v4305_v30 = vor.u32 %v5952_v14, %v4302_v15 }
  0x4c   :  { %1267 = vmatpush.bf16.msrb.mxu3 %v4225_v19  ;;  %v4373_v19 = vor.u32 %v5971_v2, %v4372_v0  ;;  %v5984_v21 = vld [vmem:[#allocation8 + $0x274] sm:$0xf]  ;;  %v4430_v22 = vld [vmem:[#allocation8 + $0x278] sm:$0xf0]  ;;  %v4185_v29 = vor.u32 %v5922_v12, %v4182_v13  ;;  %v5950_v33 = vld [vmem:[#allocation8 + $0x164] sm:$0xf]  ;;  %v6696_v37 = vpack.c.b16 %v680_v23, %v680_v23  ;;  %v6698_v41 = vpack.c.b16 %v681_v28, %v681_v28 }
  0x4d   :  { %1229 = vmatpush.bf16.msrb.mxu0 %v4405_v25  ;;  %v4121_v25 = vor.u32 %v5906_v8, %v4118_v11  ;;  %v4433_v32 = vor.u32 %v5984_v21, %v4430_v22  ;;  %v4294_v34 = vld [vmem:[#allocation8 + $0x168] sm:$0xf0]  ;;  %v5966_v35 = vld [vmem:[#allocation8 + $0x1e4] sm:$0xf]  ;;  %v5948_v47 = vld [vmem:[#allocation8 + $0x154] sm:$0xf] }
  0x4e   :  { %1242 = vmatpush.bf16.msrb.mxu1 %v4469_v26  ;;  %6374 = vset.pattern.permute.xlu0 %v6593_v48  ;;  %v6000_v26 = vld [vmem:[#allocation8 + $0x2f4] sm:$0xf]  ;;  %v5998_v42 = vld [vmem:[#allocation8 + $0x2e4] sm:$0xf]  ;;  %v4486_v43 = vld [vmem:[#allocation8 + $0x2e8] sm:$0xf0] }
  0x4f   :  { %1255 = vmatpush.bf16.msrb.mxu2 %v4153_v27  ;;  %v4494_v27 = vld [vmem:[#allocation8 + $0x2f8] sm:$0xf0]  ;;  %v5964_v49 = vld [vmem:[#allocation8 + $0x1d4] sm:$0xf]  ;;  %v4489_v50 = vor.u32 %v5998_v42, %v4486_v43  ;;  %v5946_v59 = vld [vmem:[#allocation8 + $0x144] sm:$0xf] }
  0x50   :  { %1268 = vmatpush.bf16.msrb.mxu3 %v4217_v31  ;;  %v4369_v31 = vor.u32 %v5968_v16, %v4366_v20  ;;  %v4497_v36 = vor.u32 %v6000_v26, %v4494_v27  ;;  %v4286_v48 = vld [vmem:[#allocation8 + $0x158] sm:$0xf0]  ;;  %v5996_v54 = vld [vmem:[#allocation8 + $0x2d4] sm:$0xf]  ;;  %v4278_v60 = vld [vmem:[#allocation8 + $0x148] sm:$0xf0] }
  0x51   :  { %1230 = vmatpush.bf16.msrb.mxu0 %v4397_v38  ;;  %v4358_v38 = vld [vmem:[#allocation8 + $0x1e8] sm:$0xf0]  ;;  %v4478_v55 = vld [vmem:[#allocation8 + $0x2d8] sm:$0xf0]  ;;  %v4289_v56 = vor.u32 %v5948_v47, %v4286_v48  ;;  %v5962_v61 = vld [vmem:[#allocation8 + $0x1c4] sm:$0xf] }
  0x52   :  { %1243 = vmatpush.bf16.msrb.mxu1 %v4461_v39  ;;  %v5982_v39 = vld [vmem:[#allocation8 + $0x264] sm:$0xf]  ;;  %v4361_v45 = vor.u32 %v5966_v35, %v4358_v38  ;;  %v4481_v62 = vor.u32 %v5996_v54, %v4478_v55  ;;  %v4406_v2 = vld [vmem:[#allocation8 + $0x248] sm:$0xf0]  ;;  %v5944_v6 = vld [vmem:[#allocation8 + $0x134] sm:$0xf] }
  0x53   :  { %1256 = vmatpush.bf16.msrb.mxu2 %v4145_v40  ;;  %v4422_v40 = vld [vmem:[#allocation8 + $0x268] sm:$0xf0]  ;;  %v5978_v0 = vld [vmem:[#allocation8 + $0x244] sm:$0xf]  ;;  %v4270_v8 = vld [vmem:[#allocation8 + $0x138] sm:$0xf0] }
  0x54   :  { %1269 = vmatpush.bf16.msrb.mxu3 %v4209_v44  ;;  %v4297_v44 = vor.u32 %v5950_v33, %v4294_v34  ;;  %v4425_v46 = vor.u32 %v5982_v39, %v4422_v40  ;;  %v5994_v3 = vld [vmem:[#allocation8 + $0x2c4] sm:$0xf]  ;;  %v5960_v9 = vld [vmem:[#allocation8 + $0x1b4] sm:$0xf]  ;;  %v4334_v11 = vld [vmem:[#allocation8 + $0x1b8] sm:$0xf0]  ;;  %v4273_v16 = vor.u32 %v5944_v6, %v4270_v8 }
  0x55   :  { %1231 = vmatpush.bf16.msrb.mxu0 %v4389_v51  ;;  %v4350_v51 = vld [vmem:[#allocation8 + $0x1d8] sm:$0xf0]  ;;  %v5976_v12 = vld [vmem:[#allocation8 + $0x234] sm:$0xf]  ;;  %v5942_v21 = vld [vmem:[#allocation8 + $0x124] sm:$0xf] }
  0x56   :  { %1244 = vmatpush.bf16.msrb.mxu1 %v4453_v52  ;;  %v5980_v52 = vld [vmem:[#allocation8 + $0x254] sm:$0xf]  ;;  %v4398_v13 = vld [vmem:[#allocation8 + $0x238] sm:$0xf0]  ;;  %v4262_v22 = vld [vmem:[#allocation8 + $0x128] sm:$0xf0] }
  0x57   :  { %1257 = vmatpush.bf16.msrb.mxu2 %v4137_v53  ;;  %v4414_v53 = vld [vmem:[#allocation8 + $0x258] sm:$0xf0]  ;;  %v5992_v14 = vld [vmem:[#allocation8 + $0x2b4] sm:$0xf]  ;;  %v4401_v20 = vor.u32 %v5976_v12, %v4398_v13  ;;  %v5958_v23 = vld [vmem:[#allocation8 + $0x1a4] sm:$0xf] }
  0x58   :  { %1270 = vmatpush.bf16.msrb.mxu3 %v4201_v57  ;;  %v4353_v57 = vor.u32 %v5964_v49, %v4350_v51  ;;  %v4417_v58 = vor.u32 %v5980_v52, %v4414_v53  ;;  %v4462_v15 = vld [vmem:[#allocation8 + $0x2b8] sm:$0xf0]  ;;  %v5974_v26 = vld [vmem:[#allocation8 + $0x224] sm:$0xf]  ;;  %v4390_v27 = vld [vmem:[#allocation8 + $0x228] sm:$0xf0] }
  0x59   :  { %1232 = vmatpush.bf16.msrb.mxu0 %v4381_v63  ;;  %v4342_v63 = vld [vmem:[#allocation8 + $0x1c8] sm:$0xf0]  ;;  %v5990_v28 = vld [vmem:[#allocation8 + $0x2a4] sm:$0xf]  ;;  %v5940_v33 = vld [vmem:[#allocation8 + $0x114] sm:$0xf] }
  0x5a   :  { %1245 = vmatpush.bf16.msrb.mxu1 %v4445_v4  ;;  %v4281_v4 = vor.u32 %v5946_v59, %v4278_v60  ;;  %v4254_v34 = vld [vmem:[#allocation8 + $0x118] sm:$0xf0]  ;;  %v5956_v35 = vld [vmem:[#allocation8 + $0x194] sm:$0xf]  ;;  %v5938_v47 = vld [vmem:[#allocation8 + $0x104] sm:$0xf] }
  0x5b   :  { %1258 = vmatpush.bf16.msrb.mxu2 %v4129_v5  ;;  %v4345_v5 = vor.u32 %v5962_v61, %v4342_v63  ;;  %v4318_v38 = vld [vmem:[#allocation8 + $0x198] sm:$0xf0]  ;;  %v5972_v39 = vld [vmem:[#allocation8 + $0x214] sm:$0xf]  ;;  %v4246_v48 = vld [vmem:[#allocation8 + $0x108] sm:$0xf0] }
  0x5c   :  { %1271 = vmatpush.bf16.msrb.mxu3 %v4193_v10  ;;  %v4382_v40 = vld [vmem:[#allocation8 + $0x218] sm:$0xf0]  ;;  %v5988_v42 = vld [vmem:[#allocation8 + $0x294] sm:$0xf]  ;;  %v5954_v49 = vld [vmem:[#allocation8 + $0x184] sm:$0xf] }
  0x5d   :  { %1233 = vmatpush.bf16.msrb.mxu0 %v4373_v19  ;;  %v4337_v19 = vor.u32 %v5960_v9, %v4334_v11  ;;  %v4446_v43 = vld [vmem:[#allocation8 + $0x298] sm:$0xf0]  ;;  %v4310_v51 = vld [vmem:[#allocation8 + $0x188] sm:$0xf0]  ;;  %v5970_v52 = vld [vmem:[#allocation8 + $0x204] sm:$0xf] }
  0x5e   :  { %1246 = vmatpush.bf16.msrb.mxu1 %v4437_v24  ;;  %v4465_v24 = vor.u32 %v5992_v14, %v4462_v15  ;;  %v4374_v53 = vld [vmem:[#allocation8 + $0x208] sm:$0xf0]  ;;  %v5986_v54 = vld [vmem:[#allocation8 + $0x284] sm:$0xf]  ;;  %v4556_v60 = vld [vmem:[#allocation10 + $0x70] sm:$0xf] }
  0x5f   :  { %1259 = vmatpush.bf16.msrb.mxu2 %v4121_v25  ;;  %v4326_v25 = vld [vmem:[#allocation8 + $0x1a8] sm:$0xf0]  ;;  %v6017_v61 = vld [vmem:[#allocation10 + $0x74] sm:$0xf0]  ;;  %v6012_v8 = vld [vmem:[#allocation10 + $0x54] sm:$0xf] }
  0x60   :  { %1272 = vmatpush.bf16.msrb.mxu3 %v4185_v29  ;;  %1234 = vmatmul.bf16.vlgmr.msrb.gmra.mxu0 %v6696_v37  ;;  %v4454_v29 = vld [vmem:[#allocation8 + $0x2a8] sm:$0xf0]  ;;  %v4557_v63 = vor.u32 %v6017_v61, %v4556_v60  ;;  %v6013_v6 = vld [vmem:[#allocation10 + $0x54] sm:$0xf0]  ;;  %v6011_v11 = vld [vmem:[#allocation10 + $0x44] sm:$0xf0] }
  0x61   :  { %1278 = vmatpush.bf16.msra.mxu0 %v4305_v30  ;;  %1247 = vmatmul.bf16.vlgmr.msrb.gmra.mxu1 %v6698_v41  ;;  %v4265_v30 = vor.u32 %v5942_v21, %v4262_v22  ;;  %v4438_v55 = vld [vmem:[#allocation8 + $0x288] sm:$0xf0]  ;;  %v6010_v12 = vld [vmem:[#allocation10 + $0x44] sm:$0xf]  ;;  %v6008_v21 = vld [vmem:[#allocation10 + $0x34] sm:$0xf] }
  0x62   :  { %1291 = vmatpush.bf16.msra.mxu1 %v4369_v31  ;;  %1260 = vmatmul.bf16.vlgmr.msrb.gmra.mxu2 %v6675_v1  ;;  %v4470_v1 = vld [vmem:[#allocation8 + $0x2c8] sm:$0xf0]  ;;  %v4329_v31 = vor.u32 %v5958_v23, %v4326_v25  ;;  %v4441_v59 = vor.u32 %v5986_v54, %v4438_v55  ;;  %v4526_v22 = vld [vmem:[#allocation10 + $0x38] sm:$0xf0]  ;;  %v4500_v60 = vld [vmem:[#allocation10] sm:$0xf] }
  0x63   :  { %1304 = vmatpush.bf16.msra.mxu2 %v4433_v32  ;;  %1273 = vmatmul.bf16.vlgmr.msrb.gmra.mxu3 %v6682_v7  ;;  %v4409_v7 = vor.u32 %v5978_v0, %v4406_v2  ;;  %v4473_v10 = vor.u32 %v5994_v3, %v4470_v1  ;;  %v4393_v32 = vor.u32 %v5974_v26, %v4390_v27  ;;  %v4558_v0 = vld [vmem:[#allocation10 + $0x78] sm:$0xf0]  ;;  %v4548_v3 = vld [vmem:[#allocation10 + $0x60] sm:$0xf]  ;;  %v6015_v1 = vld [vmem:[#allocation10 + $0x64] sm:$0xf0] }
  0x64   :  { %1317 = vmatpush.bf16.msra.mxu3 %v4497_v36  ;;  %v4457_v36 = vor.u32 %v5990_v28, %v4454_v29  ;;  %v4534_v14 = vld [vmem:[#allocation10 + $0x48] sm:$0xf0]  ;;  %v6003_v61 = vld [vmem:[#allocation10 + $0x4] sm:$0xf0] }
  0x65   :  { %1279 = vmatpush.bf16.msra.mxu0 %v4297_v44  ;;  %v4257_v44 = vor.u32 %v5940_v33, %v4254_v34  ;;  %v4537_v15 = vor.u32 %v6010_v12, %v4534_v14  ;;  %v6708_v23 = vld [vmem:[#allocation5] sm:$0xff]  ;;  %v6713_v28 = vld [vmem:[#allocation7] sm:$0xff] }
  0x66   :  { %1292 = vmatpush.bf16.msra.mxu1 %v4361_v45  ;;  %v4321_v45 = vor.u32 %v5956_v35, %v4318_v38  ;;  %v163_v25 = vperm.slane %v6708_v23, 0  ;;  %v296_v29 = vperm.slane %v6708_v23, 1  ;;  %v390_v33 = vperm.slane %v6708_v23, 2  ;;  %v4516_v35 = vld [vmem:[#allocation10 + $0x20] sm:$0xf] }
  0x67   :  { %1305 = vmatpush.bf16.msra.mxu2 %v4425_v46  ;;  %v4385_v46 = vor.u32 %v5972_v39, %v4382_v40  ;;  %v6006_v38 = vld [vmem:[#allocation10 + $0x24] sm:$0xf]  ;;  %v4518_v40 = vld [vmem:[#allocation10 + $0x28] sm:$0xf0]  ;;  %v6031_v12 = vld [vmem:[#allocation10 + $0xe4] sm:$0xf0] }
  0x68   :  { %1318 = vmatpush.bf16.msra.mxu3 %v4489_v50  ;;  %v4449_v50 = vor.u32 %v5988_v42, %v4446_v43  ;;  %v199_v27 = vperm.slane %v163_v25, 0  ;;  %v332_v34 = vperm.slane %v296_v29, 1  ;;  %v4596_v29 = vld [vmem:[#allocation10 + $0xc0] sm:$0xf] }
  0x69   :  { %1280 = vmatpush.bf16.msra.mxu0 %v4289_v56  ;;  %v4249_v56 = vor.u32 %v5938_v47, %v4246_v48  ;;  %v4508_v48 = vld [vmem:[#allocation10 + $0x10] sm:$0xf] }
  0x6a   :  { %1293 = vmatpush.bf16.msra.mxu1 %v4353_v57  ;;  %v4313_v57 = vor.u32 %v5954_v49, %v4310_v51  ;;  %v6005_v49 = vld [vmem:[#allocation10 + $0x14] sm:$0xf0] }
  0x6b   :  { %1306 = vmatpush.bf16.msra.mxu2 %v4417_v58  ;;  %v4377_v58 = vor.u32 %v5970_v52, %v4374_v53  ;;  %v4509_v51 = vor.u32 %v6005_v49, %v4508_v48  ;;  %v4510_v52 = vld [vmem:[#allocation10 + $0x18] sm:$0xf0] }
  0x6c   :  { %1319 = vmatpush.bf16.msra.mxu3 %v4481_v62  ;;  %v6016_v62 = vld [vmem:[#allocation10 + $0x74] sm:$0xf]  ;;  %v4590_v49 = vld [vmem:[#allocation10 + $0xb8] sm:$0xf0] }
  0x6d   :  { %1281 = vmatpush.bf16.msra.mxu0 %v4281_v4  ;;  %v4561_v2 = vor.u32 %v6016_v62, %v4558_v0  ;;  %v6014_v4 = vld [vmem:[#allocation10 + $0x64] sm:$0xf]  ;;  %v4502_v0 = vld [vmem:[#allocation10 + $0x8] sm:$0xf0] }
  0x6e   :  { %1294 = vmatpush.bf16.msra.mxu1 %v4345_v5  ;;  %v4549_v5 = vor.u32 %v6015_v1, %v4548_v3  ;;  %v6002_v62 = vld [vmem:[#allocation10 + $0x4] sm:$0xf] }
  0x6f   :  { %1307 = vmatpush.bf16.msra.mxu2 %v4409_v7  ;;  %v4550_v7 = vld [vmem:[#allocation10 + $0x68] sm:$0xf0]  ;;  %v4505_v1 = vor.u32 %v6002_v62, %v4502_v0 }
  0x70   :  { %1320 = vmatpush.bf16.msra.mxu3 %v4473_v10  ;;  %v4532_v10 = vld [vmem:[#allocation10 + $0x40] sm:$0xf]  ;;  %v4582_v62 = vld [vmem:[#allocation10 + $0xa8] sm:$0xf0] }
  0x71   :  { %1282 = vmatpush.bf16.msra.mxu0 %v4273_v16  ;;  %v4533_v13 = vor.u32 %v6011_v11, %v4532_v10  ;;  %v4524_v16 = vld [vmem:[#allocation10 + $0x30] sm:$0xf]  ;;  %v4612_v11 = vld [vmem:[#allocation10 + $0xe0] sm:$0xf] }
  0x72   :  { %1295 = vmatpush.bf16.msra.mxu1 %v4337_v19  ;;  %v6009_v19 = vld [vmem:[#allocation10 + $0x34] sm:$0xf0]  ;;  %v4613_v14 = vor.u32 %v6031_v12, %v4612_v11 }
  0x73   :  { %1308 = vmatpush.bf16.msra.mxu2 %v4401_v20  ;;  %v4525_v20 = vor.u32 %v6009_v19, %v4524_v16  ;;  %v4604_v16 = vld [vmem:[#allocation10 + $0xd0] sm:$0xf]  ;;  %v6029_v19 = vld [vmem:[#allocation10 + $0xd4] sm:$0xf0] }
  0x74   :  { %1321 = vmatpush.bf16.msra.mxu3 %v4465_v24  ;;  %v4529_v24 = vor.u32 %v6008_v21, %v4526_v22  ;;  %v6028_v22 = vld [vmem:[#allocation10 + $0xd4] sm:$0xf]  ;;  %v4605_v25 = vor.u32 %v6029_v19, %v4604_v16  ;;  %v4564_v19 = vld [vmem:[#allocation10 + $0x80] sm:$0xf] }
  0x75   :  { %1283 = vmatpush.bf16.msra.mxu0 %v4265_v30 }
  0x76   :  { %1296 = vmatpush.bf16.msra.mxu1 %v4329_v31 }
  0x77   :  { %1309 = vmatpush.bf16.msra.mxu2 %v4393_v32  ;;  %v238_v32 = vperm.slane %v6713_v28, 0 }
  0x78   :  { %1322 = vmatpush.bf16.msra.mxu3 %v4457_v36  ;;  %v6007_v36 = vld [vmem:[#allocation10 + $0x24] sm:$0xf0] }
  0x79   :  { %1284 = vmatpush.bf16.msra.mxu0 %v4257_v44  ;;  %v4517_v39 = vor.u32 %v6007_v36, %v4516_v35  ;;  %v426_v44 = vperm.slane %v390_v33, 2  ;;  %v4598_v33 = vld [vmem:[#allocation10 + $0xc8] sm:$0xf0] }
  0x7a   :  { %1297 = vmatpush.bf16.msra.mxu1 %v4321_v45  ;;  %v484_v45 = vperm.slane %v6708_v23, 3 }
  0x7b   :  { %1310 = vmatpush.bf16.msra.mxu2 %v4385_v46  ;;  %v4521_v46 = vor.u32 %v6006_v38, %v4518_v40 }
  0x7c   :  { %1323 = vmatpush.bf16.msra.mxu3 %v4449_v50  ;;  %v6004_v50 = vld [vmem:[#allocation10 + $0x14] sm:$0xf]  ;;  %v520_v55 = vperm.slane %v484_v45, 3  ;;  %v4588_v45 = vld [vmem:[#allocation10 + $0xb0] sm:$0xf] }
  0x7d   :  { %1285 = vmatpush.bf16.msra.mxu0 %v4249_v56  ;;  %v4513_v56 = vor.u32 %v6004_v50, %v4510_v52 }
  0x7e   :  { %1298 = vmatpush.bf16.msra.mxu1 %v4313_v57 }
  0x7f   :  { %1311 = vmatpush.bf16.msra.mxu2 %v4377_v58 }
  0x80   :  { %1324 = vmatpush.bf16.msra.mxu3 %v4441_v59  ;;  %1286 = vmatmul.bf16.vlgmr.msra.gmra.mxu0 %v6686_v17  ;;  %v4540_v17 = vld [vmem:[#allocation10 + $0x50] sm:$0xf] }
  0x81   :  { %1299 = vmatmul.bf16.vlgmr.msra.gmra.mxu1 %v6688_v18  ;;  %1528 = vmatpush.bf16.msrb.mxu0 %v4557_v63  ;;  %v4553_v18 = vor.u32 %v6014_v4, %v4550_v7  ;;  %v4501_v63 = vor.u32 %v6003_v61, %v4500_v60  ;;  %v4620_v4 = vld [vmem:[#allocation10 + $0xf0] sm:$0xf] }
  0x82   :  { %1312 = vmatmul.bf16.vlgmr.msra.gmra.mxu2 %v6696_v37  ;;  %v4542_v37 = vld [vmem:[#allocation10 + $0x58] sm:$0xf0] }
  0x83   :  { %1325 = vmatmul.bf16.vlgmr.msra.gmra.mxu3 %v6698_v41  ;;  %1554 = vmatpush.bf16.msrb.mxu2 %v4561_v2  ;;  %v4541_v41 = vor.u32 %v6013_v6, %v4540_v17  ;;  %v4545_v9 = vor.u32 %v6012_v8, %v4542_v37  ;;  %v6032_v17 = vld [vmem:[#allocation10 + $0xf4] sm:$0xf]  ;;  %v4622_v6 = vld [vmem:[#allocation10 + $0xf8] sm:$0xf0] }
  0x84   :  { %v4625_v37 = vor.u32 %v6032_v17, %v4622_v6  ;;  %v6020_v17 = vld [vmem:[#allocation10 + $0x94] sm:$0xf] }
  0x85   :  { %1529 = vmatpush.bf16.msrb.mxu0 %v4549_v5  ;;  %v6033_v5 = vld [vmem:[#allocation10 + $0xf4] sm:$0xf0] }
  0x86   :  { %v4621_v7 = vor.u32 %v6033_v5, %v4620_v4  ;;  %1567 = vmatpush.bf16.msrb.mxu3 %v4625_v37  ;;  %v391_v4 = vperm.slane %v6708_v23, 6  ;;  %v4572_v5 = vld [vmem:[#allocation10 + $0x90] sm:$0xf]  ;;  %v4574_v37 = vld [vmem:[#allocation10 + $0x98] sm:$0xf0] }
  0x87   :  { %1555 = vmatpush.bf16.msrb.mxu2 %v4553_v18  ;;  %v4577_v11 = vor.u32 %v6020_v17, %v4574_v37  ;;  %v4668_v37 = vld [vmem:[#allocation11 + $0x50] sm:$0xf] }
  0x88   :  { %1541 = vmatpush.bf16.msrb.mxu1 %v4621_v7  ;;  %v6021_v7 = vld [vmem:[#allocation10 + $0x94] sm:$0xf0] }
  0x89   :  { %1530 = vmatpush.bf16.msrb.mxu0 %v4541_v41 }
  0x8b   :  { %1556 = vmatpush.bf16.msrb.mxu2 %v4545_v9 }
  0x8c   :  { %1542 = vmatpush.bf16.msrb.mxu1 %v4613_v14 }
  0x8d   :  { %1531 = vmatpush.bf16.msrb.mxu0 %v4533_v13  ;;  %v6030_v13 = vld [vmem:[#allocation10 + $0xe4] sm:$0xf] }
  0x8f   :  { %1557 = vmatpush.bf16.msrb.mxu2 %v4537_v15  ;;  %v4614_v15 = vld [vmem:[#allocation10 + $0xe8] sm:$0xf0] }
  0x90   :  { %v4617_v21 = vor.u32 %v6030_v13, %v4614_v15  ;;  %1543 = vmatpush.bf16.msrb.mxu1 %v4605_v25  ;;  %v427_v15 = vperm.slane %v391_v4, 2  ;;  %v4748_v4 = vld [vmem:[#allocation11 + $0xf0] sm:$0xf] }
  0x91   :  { %1532 = vmatpush.bf16.msrb.mxu0 %v4525_v20 }
  0x92   :  { %1568 = vmatpush.bf16.msrb.mxu3 %v4617_v21  ;;  %v6018_v21 = vld [vmem:[#allocation10 + $0x84] sm:$0xf] }
  0x93   :  { %1558 = vmatpush.bf16.msrb.mxu2 %v4529_v24  ;;  %v4606_v24 = vld [vmem:[#allocation10 + $0xd8] sm:$0xf0] }
  0x95   :  { %1533 = vmatpush.bf16.msrb.mxu0 %v4517_v39 }
  0x97   :  { %1559 = vmatpush.bf16.msrb.mxu2 %v4521_v46  ;;  %v6025_v46 = vld [vmem:[#allocation10 + $0xb4] sm:$0xf0] }
  0x98   :  { %v4589_v48 = vor.u32 %v6025_v46, %v4588_v45 }
  0x99   :  { %1534 = vmatpush.bf16.msrb.mxu0 %v4509_v51 }
  0x9b   :  { %1560 = vmatpush.bf16.msrb.mxu2 %v4513_v56  ;;  %v4580_v56 = vld [vmem:[#allocation10 + $0xa0] sm:$0xf] }
  0x9d   :  { %1535 = vmatpush.bf16.msrb.mxu0 %v4501_v63  ;;  %v239_v63 = vperm.slane %v6713_v28, 1 }
  0x9f   :  { %1561 = vmatpush.bf16.msrb.mxu2 %v4505_v1 }
  0xaf   :  { %v6711_v26 = vpop.permute.xlu0 %151 }
  0xb0   :  { %v6716_v30 = vpop.permute.xlu1 %387  ;;  %v217_v31 = vmul.f32 %v199_v27, %v6711_v26  ;;  %v4609_v27 = vor.u32 %v6028_v22, %v4606_v24 }
  0xb1   :  { %v444_v54 = vmul.f32 %v426_v44, %v6716_v30  ;;  %v164_v44 = vperm.slane %v6708_v23, 4 }
  0xb2   :  { %v274_v43 = vadd.f32 %v238_v32, %v217_v31  ;;  %v6027_v31 = vld [vmem:[#allocation10 + $0xc4] sm:$0xf0]  ;;  %v6026_v32 = vld [vmem:[#allocation10 + $0xc4] sm:$0xf]  ;;  %1569 = vmatpush.bf16.msrb.mxu3 %v4609_v27  ;;  %v445_v27 = vmul.f32 %v427_v15, %v6716_v30 }
  0xb3   :  { %v4597_v38 = vor.u32 %v6027_v31, %v4596_v29  ;;  %v4601_v39 = vor.u32 %v6026_v32, %v4598_v33  ;;  %v6063_v15 = vld [vmem:[#allocation11 + $0xe4] sm:$0xf0] }
  0xb5   :  { %1544 = vmatpush.bf16.msrb.mxu1 %v4597_v38 }
  0xb6   :  { %1570 = vmatpush.bf16.msrb.mxu3 %v4601_v39 }
  0xb8   :  { %v6721_v42 = vpop.permute.xlu0 %293 }
  0xb9   :  { %v350_v47 = vmul.f32 %v332_v34, %v6721_v42  ;;  %1545 = vmatpush.bf16.msrb.mxu1 %v4589_v48 }
  0xba   :  { %v6726_v58 = vpop.permute.xlu1 %481 }
  0xbb   :  { %v368_v53 = vadd.f32 %v350_v47, %v274_v43  ;;  %v538_v3 = vmul.f32 %v520_v55, %v6726_v58  ;;  %v6024_v47 = vld [vmem:[#allocation10 + $0xb4] sm:$0xf]  ;;  %v297_v55 = vperm.slane %v6708_v23, 5 }
  0xbc   :  { %v4593_v51 = vor.u32 %v6024_v47, %v4590_v49 }
  0xbd   :  { %v1183_v57 = vpop.f32.mrf.mxu0  ;;  %v462_v2 = vadd.f32 %v444_v54, %v368_v53  ;;  %v200_v54 = vperm.slane %v164_v44, 0  ;;  %v333_v1 = vperm.slane %v297_v55, 1 }
  0xbe   :  { %v1196_v59 = vpop.f32.mrf.mxu1  ;;  %1571 = vmatpush.bf16.msrb.mxu3 %v4593_v51 }
  0xbf   :  { %v556_v18 = vadd.f32 %v538_v3, %v462_v2  ;;  %v218_v3 = vmul.f32 %v200_v54, %v6711_v26  ;;  %v351_v14 = vmul.f32 %v333_v1, %v6721_v42  ;;  %v4678_v1 = vld [vmem:[#allocation11 + $0x68] sm:$0xf0] }
  0xc1   :  { %v1184_v20 = vadd.f32 %v1183_v57, %v556_v18  ;;  %v6023_v57 = vld [vmem:[#allocation10 + $0xa4] sm:$0xf0]  ;;  %v275_v13 = vadd.f32 %v239_v63, %v218_v3  ;;  %v4676_v63 = vld [vmem:[#allocation11 + $0x60] sm:$0xf] }
  0xc2   :  { %v4581_v61 = vor.u32 %v6023_v57, %v4580_v56  ;;  %v4684_v56 = vld [vmem:[#allocation11 + $0x70] sm:$0xf]  ;;  %v6049_v57 = vld [vmem:[#allocation11 + $0x74] sm:$0xf0] }
  0xc3   :  { %v1197_v34 = vadd.f32 %v1196_v59, %v1184_v20  ;;  %v6022_v59 = vld [vmem:[#allocation10 + $0xa4] sm:$0xf]  ;;  %v6019_v20 = vld [vmem:[#allocation10 + $0x84] sm:$0xf0]  ;;  %v369_v25 = vadd.f32 %v351_v14, %v275_v13  ;;  %v4740_v14 = vld [vmem:[#allocation11 + $0xe0] sm:$0xf] }
  0xc4   :  { %v4585_v0 = vor.u32 %v6022_v59, %v4582_v62  ;;  %1546 = vmatpush.bf16.msrb.mxu1 %v4581_v61  ;;  %v4565_v22 = vor.u32 %v6019_v20, %v4564_v19  ;;  %v6048_v59 = vld [vmem:[#allocation11 + $0x74] sm:$0xf]  ;;  %v4686_v61 = vld [vmem:[#allocation11 + $0x78] sm:$0xf0]  ;;  %v4741_v19 = vor.u32 %v6063_v15, %v4740_v14  ;;  %v4742_v20 = vld [vmem:[#allocation11 + $0xe8] sm:$0xf0] }
  0xc5   :  { %v1209_v8 = vpop.f32.mrf.mxu2  ;;  %v1185_v41 = vpop.f32.mrf.mxu0  ;;  %v463_v33 = vadd.f32 %v445_v27, %v369_v25  ;;  %v4689_v62 = vor.u32 %v6048_v59, %v4686_v61  ;;  %v4662_v25 = vld [vmem:[#allocation11 + $0x48] sm:$0xf0]  ;;  %v4732_v27 = vld [vmem:[#allocation11 + $0xd0] sm:$0xf] }
  0xc6   :  { %v1222_v9 = vpop.f32.mrf.mxu3  ;;  %v1198_v10 = vpop.f32.mrf.mxu1  ;;  %v1210_v40 = vadd.f32 %v1209_v8, %v1197_v34  ;;  %1572 = vmatpush.bf16.msrb.mxu3 %v4585_v0  ;;  %v4573_v8 = vor.u32 %v6021_v7, %v4572_v5  ;;  %v485_v41 = vperm.slane %v6708_v23, 7  ;;  %v4566_v23 = vld [vmem:[#allocation10 + $0x88] sm:$0xf0]  ;;  %v6047_v0 = vld [vmem:[#allocation11 + $0x64] sm:$0xf0] }
  0xc7   :  { %v4569_v24 = vor.u32 %v6018_v21, %v4566_v23  ;;  %1804 = vmatpush.bf16.msra.mxu2 %v4689_v62  ;;  %v4677_v3 = vor.u32 %v6047_v0, %v4676_v63  ;;  %v6065_v5 = vld [vmem:[#allocation11 + $0xf4] sm:$0xf0]  ;;  %v4660_v21 = vld [vmem:[#allocation11 + $0x40] sm:$0xf]  ;;  %v4716_v61 = vld [vmem:[#allocation11 + $0xb0] sm:$0xf] }
  0xc8   :  { %v1223_v43 = vadd.f32 %v1222_v9, %v1210_v40  ;;  %1547 = vmatpush.bf16.msrb.mxu1 %v4573_v8  ;;  %v521_v29 = vperm.slane %v485_v41, 3  ;;  %v4749_v17 = vor.u32 %v6065_v5, %v4748_v4  ;;  %v4750_v8 = vld [vmem:[#allocation11 + $0xf8] sm:$0xf0]  ;;  %v6057_v62 = vld [vmem:[#allocation11 + $0xb4] sm:$0xf0]  ;;  %v6748_v0 = vld [vmem:[#allocation5 + $0x8] sm:$0xff] }
  0xc9   :  { %v6056_v63 = vld [vmem:[#allocation11 + $0xb4] sm:$0xf]  ;;  %v4636_v4 = vld [vmem:[#allocation11 + $0x10] sm:$0xf]  ;;  %v6037_v5 = vld [vmem:[#allocation11 + $0x14] sm:$0xf0] }
  0xca   :  { %1573 = vmatpush.bf16.msrb.mxu3 %v4577_v11  ;;  %v539_v34 = vmul.f32 %v521_v29, %v6726_v58  ;;  %v4670_v11 = vld [vmem:[#allocation11 + $0x58] sm:$0xf0] }
  0xcc   :  { %1548 = vmatpush.bf16.msrb.mxu1 %v4565_v22  ;;  %v6043_v22 = vld [vmem:[#allocation11 + $0x44] sm:$0xf0] }
  0xcd   :  { %v1211_v35 = vpop.f32.mrf.mxu2  ;;  %v4661_v29 = vor.u32 %v6043_v22, %v4660_v21  ;;  %v4630_v22 = vld [vmem:[#allocation11 + $0x8] sm:$0xf0] }
  0xce   :  { %v1224_v36 = vpop.f32.mrf.mxu3  ;;  %1574 = vmatpush.bf16.msrb.mxu3 %v4569_v24  ;;  %v557_v35 = vadd.f32 %v539_v34, %v463_v33  ;;  %v6042_v24 = vld [vmem:[#allocation11 + $0x44] sm:$0xf]  ;;  %v4734_v33 = vld [vmem:[#allocation11 + $0xd8] sm:$0xf0] }
  0xcf   :  { %v4665_v34 = vor.u32 %v6042_v24, %v4662_v25  ;;  %v4700_v24 = vld [vmem:[#allocation11 + $0x90] sm:$0xf]  ;;  %v6053_v25 = vld [vmem:[#allocation11 + $0x94] sm:$0xf0] }
  0xd0   :  { %1791 = vmatpush.bf16.msra.mxu1 %v4749_v17  ;;  %v4637_v17 = vor.u32 %v6037_v5, %v4636_v4  ;;  %v6079_v4 = vld [vmem:[#allocation10 + $0x164] sm:$0xf0] }
  0xd4   :  { %1792 = vmatpush.bf16.msra.mxu1 %v4741_v19  ;;  %v6035_v19 = vld [vmem:[#allocation11 + $0x4] sm:$0xf0] }
  0xdd   :  { %v1235_v50 = vpop.f32.mrf.mxu0 }
  0xde   :  { %v1236_v52 = vadd.f32 %v1235_v50, %v1223_v43  ;;  %v1248_v53 = vpop.f32.mrf.mxu1 }
  0xe0   :  { %v1249_v60 = vadd.f32 %v1248_v53, %v1236_v52 }
  0xe2   :  { %v1330_v2 = vmul.f32 0.2, %v1249_v60 }
  0xe4   :  { %v6734_v6 = vmax.f32 %v1249_v60, %v1330_v2  ;;  %v4685_v60 = vor.u32 %v6049_v57, %v4684_v56  ;;  %v6046_v2 = vld [vmem:[#allocation11 + $0x64] sm:$0xf]  ;;  %v4646_v56 = vld [vmem:[#allocation11 + $0x28] sm:$0xf0] }
  0xe5   :  { %v1261_v18 = vpop.f32.mrf.mxu2  ;;  %v1237_v10 = vpop.f32.mrf.mxu0  ;;  %v4681_v7 = vor.u32 %v6046_v2, %v4678_v1  ;;  %v4717_v2 = vor.u32 %v6057_v62, %v4716_v61  ;;  %v4812_v61 = vld [vmem:[#allocation10 + $0x170] sm:$0xf]  ;;  %v6081_v62 = vld [vmem:[#allocation10 + $0x174] sm:$0xf0] }
  0xe6   :  { %v1274_v9 = vpop.f32.mrf.mxu3  ;;  %v1334_v12 = vpack.c.bf16 %v6734_v6, %v6734_v6  ;;  %v1250_v16 = vpop.f32.mrf.mxu1  ;;  %v1262_v36 = vadd.f32 %v1261_v18, %v557_v35  ;;  %1778 = vmatpush.bf16.msra.mxu0 %v4685_v60  ;;  %v6064_v18 = vld [vmem:[#allocation11 + $0xf4] sm:$0xf] }
  0xe7   :  { %v4753_v41 = vor.u32 %v6064_v18, %v4750_v8  ;;  %v6044_v10 = vld [vmem:[#allocation11 + $0x54] sm:$0xf]  ;;  %1805 = vmatpush.bf16.msra.mxu2 %v4681_v7  ;;  %v6062_v16 = vld [vmem:[#allocation11 + $0xe4] sm:$0xf]  ;;  %v4638_v18 = vld [vmem:[#allocation11 + $0x18] sm:$0xf0] }
  0xe8   :  { %1536 = vmatmul.bf16.vlgmr.msrb.gmra.mxu0 %v1334_v12  ;;  %1562 = vmatmul.bf16.vlgmr.msrb.gmra.mxu2 %v1334_v12  ;;  %v1275_v38 = vadd.f32 %v1274_v9, %v1262_v36  ;;  %v6045_v9 = vld [vmem:[#allocation11 + $0x54] sm:$0xf0]  ;;  %v4673_v13 = vor.u32 %v6044_v10, %v4670_v11  ;;  %v4745_v23 = vor.u32 %v6062_v16, %v4742_v20  ;;  %v4652_v36 = vld [vmem:[#allocation11 + $0x30] sm:$0xf]  ;;  %v6036_v7 = vld [vmem:[#allocation11 + $0x14] sm:$0xf] }
  0xe9   :  { %v4669_v12 = vor.u32 %v6045_v9, %v4668_v37  ;;  %1817 = vmatpush.bf16.msra.mxu3 %v4753_v41  ;;  %v4641_v37 = vor.u32 %v6036_v7, %v4638_v18  ;;  %v4708_v41 = vld [vmem:[#allocation11 + $0xa0] sm:$0xf]  ;;  %v6055_v9 = vld [vmem:[#allocation11 + $0xa4] sm:$0xf0]  ;;  %v6054_v10 = vld [vmem:[#allocation11 + $0xa4] sm:$0xf] }
  0xea   :  { %1779 = vmatpush.bf16.msra.mxu0 %v4677_v3  ;;  %v4718_v3 = vld [vmem:[#allocation11 + $0xb8] sm:$0xf0]  ;;  %v165_v11 = vperm.slane %v6748_v0, 0  ;;  %v4628_v16 = vld [vmem:[#allocation11] sm:$0xf] }
  0xeb   :  { %1806 = vmatpush.bf16.msra.mxu2 %v4673_v13  ;;  %v4721_v1 = vor.u32 %v6056_v63, %v4718_v3  ;;  %v4710_v13 = vld [vmem:[#allocation11 + $0xa8] sm:$0xf0]  ;;  %v6034_v20 = vld [vmem:[#allocation11 + $0x4] sm:$0xf]  ;;  %v4629_v21 = vor.u32 %v6035_v19, %v4628_v16  ;;  %v6080_v63 = vld [vmem:[#allocation10 + $0x174] sm:$0xf] }
  0xec   :  { %v4713_v15 = vor.u32 %v6054_v10, %v4710_v13  ;;  %v4814_v3 = vld [vmem:[#allocation10 + $0x178] sm:$0xf0]  ;;  %v6078_v18 = vld [vmem:[#allocation10 + $0x164] sm:$0xf]  ;;  %v6097_v10 = vld [vmem:[#allocation10 + $0x1f4] sm:$0xf0] }
  0xed   :  { %v1263_v31 = vpop.f32.mrf.mxu2  ;;  %1818 = vmatpush.bf16.msra.mxu3 %v4745_v23  ;;  %v4633_v23 = vor.u32 %v6034_v20, %v4630_v22  ;;  %v4796_v19 = vld [vmem:[#allocation10 + $0x150] sm:$0xf]  ;;  %v6077_v20 = vld [vmem:[#allocation10 + $0x154] sm:$0xf0]  ;;  %v4798_v22 = vld [vmem:[#allocation10 + $0x158] sm:$0xf0] }
  0xee   :  { %v1276_v32 = vpop.f32.mrf.mxu3  ;;  %1780 = vmatpush.bf16.msra.mxu0 %v4669_v12  ;;  %v6061_v31 = vld [vmem:[#allocation11 + $0xd4] sm:$0xf0]  ;;  %v4709_v12 = vor.u32 %v6055_v9, %v4708_v41  ;;  %v4876_v41 = vld [vmem:[#allocation10 + $0x1f0] sm:$0xf] }
  0xef   :  { %v6060_v32 = vld [vmem:[#allocation11 + $0xd4] sm:$0xf]  ;;  %v4733_v35 = vor.u32 %v6061_v31, %v4732_v27  ;;  %1807 = vmatpush.bf16.msra.mxu2 %v4665_v34  ;;  %v4702_v31 = vld [vmem:[#allocation11 + $0x98] sm:$0xf0] }
  0xf0   :  { %v6052_v27 = vld [vmem:[#allocation11 + $0x94] sm:$0xf] }
  0xf1   :  { %1793 = vmatpush.bf16.msra.mxu1 %v4733_v35  ;;  %v4705_v34 = vor.u32 %v6052_v27, %v4702_v31  ;;  %v392_v35 = vperm.slane %v6748_v0, 2  ;;  %v6094_v31 = vld [vmem:[#allocation10 + $0x1e4] sm:$0xf] }
  0xf2   :  { %1781 = vmatpush.bf16.msra.mxu0 %v4661_v29  ;;  %v4701_v29 = vor.u32 %v6053_v25, %v4700_v24  ;;  %v6095_v24 = vld [vmem:[#allocation10 + $0x1e4] sm:$0xf0] }
  0xfd   :  { %v1287_v39 = vpop.f32.mrf.mxu0 }
  0xfe   :  { %v1300_v40 = vpop.f32.mrf.mxu1  ;;  %v1288_v43 = vadd.f32 %v1287_v39, %v1275_v38  ;;  %v6041_v38 = vld [vmem:[#allocation11 + $0x34] sm:$0xf0]  ;;  %v6040_v39 = vld [vmem:[#allocation11 + $0x34] sm:$0xf] }
 0x100   :  { %v1301_v44 = vadd.f32 %v1300_v40, %v1288_v43  ;;  %v4737_v40 = vor.u32 %v6060_v32, %v4734_v33  ;;  %v4654_v43 = vld [vmem:[#allocation11 + $0x38] sm:$0xf0]  ;;  %v201_v32 = vperm.slane %v165_v11, 0  ;;  %v298_v33 = vperm.slane %v6748_v0, 1  ;;  %v6096_v11 = vld [vmem:[#allocation10 + $0x1f4] sm:$0xf] }
 0x102   :  { %1819 = vmatpush.bf16.msra.mxu3 %v4737_v40 }
 0x105   :  { %v1313_v45 = vpop.f32.mrf.mxu2  ;;  %v1289_v48 = vpop.f32.mrf.mxu0 }
 0x106   :  { %v1314_v46 = vadd.f32 %v1313_v45, %v1301_v44  ;;  %v1326_v47 = vpop.f32.mrf.mxu3  ;;  %v1302_v49 = vpop.f32.mrf.mxu1  ;;  %v4724_v44 = vld [vmem:[#allocation11 + $0xc0] sm:$0xf]  ;;  %v6059_v45 = vld [vmem:[#allocation11 + $0xc4] sm:$0xf0]  ;;  %v4653_v48 = vor.u32 %v6041_v38, %v4652_v36  ;;  %v486_v36 = vperm.slane %v6748_v0, 3  ;;  %v166_v38 = vperm.slane %v6748_v0, 4 }
 0x107   :  { %v4657_v49 = vor.u32 %v6040_v39, %v4654_v43  ;;  %v299_v39 = vperm.slane %v6748_v0, 5  ;;  %v4692_v43 = vld [vmem:[#allocation11 + $0x80] sm:$0xf] }
 0x108   :  { %v1327_v50 = vadd.f32 %v1326_v47, %v1314_v46  ;;  %v6058_v46 = vld [vmem:[#allocation11 + $0xc4] sm:$0xf]  ;;  %v4726_v47 = vld [vmem:[#allocation11 + $0xc8] sm:$0xf0]  ;;  %1782 = vmatpush.bf16.msra.mxu0 %v4653_v48  ;;  %v219_v48 = vmul.f32 %v201_v32, %v6711_v26 }
 0x109   :  { %1808 = vmatpush.bf16.msra.mxu2 %v4657_v49  ;;  %v4870_v32 = vld [vmem:[#allocation10 + $0x1e8] sm:$0xf0] }
 0x10a   :  { %v1331_v51 = vmul.f32 0.2, %v1327_v50 }
 0x10c   :  { %v6742_v52 = vmax.f32 %v1327_v50, %v1331_v51  ;;  %v4725_v50 = vor.u32 %v6059_v45, %v4724_v44  ;;  %v4644_v51 = vld [vmem:[#allocation11 + $0x20] sm:$0xf]  ;;  %v6051_v44 = vld [vmem:[#allocation11 + $0x84] sm:$0xf0]  ;;  %v6050_v45 = vld [vmem:[#allocation11 + $0x84] sm:$0xf] }
 0x10d   :  { %v1315_v53 = vpop.f32.mrf.mxu2 }
 0x10e   :  { %v1335_v54 = vpack.c.bf16 %v6742_v52, %v6742_v52  ;;  %v1328_v55 = vpop.f32.mrf.mxu3  ;;  %v6039_v53 = vld [vmem:[#allocation11 + $0x24] sm:$0xf0]  ;;  %1794 = vmatpush.bf16.msra.mxu1 %v4725_v50  ;;  %v240_v50 = vperm.slane %v6713_v28, 2 }
 0x10f   :  { %v6038_v55 = vld [vmem:[#allocation11 + $0x24] sm:$0xf]  ;;  %v4645_v57 = vor.u32 %v6039_v53, %v4644_v51  ;;  %v334_v51 = vperm.slane %v298_v33, 1  ;;  %v428_v53 = vperm.slane %v392_v35, 2  ;;  %v4797_v35 = vor.u32 %v6077_v20, %v4796_v19  ;;  %v4782_v20 = vld [vmem:[#allocation10 + $0x138] sm:$0xf0] }
 0x110   :  { %1549 = vmatmul.bf16.vlgmr.msrb.gmra.mxu1 %v1335_v54  ;;  %1575 = vmatmul.bf16.vlgmr.msrb.gmra.mxu3 %v1335_v54  ;;  %v4729_v54 = vor.u32 %v6058_v46, %v4726_v47  ;;  %v4649_v59 = vor.u32 %v6038_v55, %v4646_v56  ;;  %v4693_v46 = vor.u32 %v6051_v44, %v4692_v43  ;;  %v4694_v47 = vld [vmem:[#allocation11 + $0x88] sm:$0xf0]  ;;  %v522_v55 = vperm.slane %v486_v36, 3 }
 0x111   :  { %1783 = vmatpush.bf16.msra.mxu0 %v4645_v57  ;;  %v4697_v49 = vor.u32 %v6050_v45, %v4694_v47  ;;  %v202_v56 = vperm.slane %v166_v38, 0  ;;  %v335_v57 = vperm.slane %v299_v39, 1  ;;  %v276_v5 = vadd.f32 %v240_v50, %v219_v48  ;;  %v4788_v38 = vld [vmem:[#allocation10 + $0x140] sm:$0xf]  ;;  %v6075_v39 = vld [vmem:[#allocation10 + $0x144] sm:$0xf0] }
 0x112   :  { %1820 = vmatpush.bf16.msra.mxu3 %v4729_v54  ;;  %1809 = vmatpush.bf16.msra.mxu2 %v4649_v59  ;;  %v241_v54 = vperm.slane %v6713_v28, 3  ;;  %v393_v59 = vperm.slane %v6748_v0, 6  ;;  %v352_v7 = vmul.f32 %v334_v51, %v6721_v42  ;;  %v446_v27 = vmul.f32 %v428_v53, %v6716_v30  ;;  %v4860_v45 = vld [vmem:[#allocation10 + $0x1d0] sm:$0xf]  ;;  %v6092_v47 = vld [vmem:[#allocation10 + $0x1d4] sm:$0xf] }
 0x113   :  { %1795 = vmatpush.bf16.msra.mxu1 %v4717_v2  ;;  %v4813_v2 = vor.u32 %v6081_v62, %v4812_v61  ;;  %v220_v13 = vmul.f32 %v202_v56, %v6711_v26  ;;  %v4873_v36 = vor.u32 %v6094_v31, %v4870_v32  ;;  %v353_v43 = vmul.f32 %v335_v57, %v6721_v42  ;;  %v4790_v50 = vld [vmem:[#allocation10 + $0x148] sm:$0xf0]  ;;  %v4862_v51 = vld [vmem:[#allocation10 + $0x1d8] sm:$0xf0] }
 0x114   :  { %v370_v25 = vadd.f32 %v352_v7, %v276_v5  ;;  %v429_v33 = vperm.slane %v393_v59, 2  ;;  %v540_v48 = vmul.f32 %v522_v55, %v6726_v58  ;;  %v4865_v56 = vor.u32 %v6092_v47, %v4862_v51  ;;  %v6068_v47 = vld [vmem:[#allocation10 + $0x114] sm:$0xf]  ;;  %v4836_v51 = vld [vmem:[#allocation10 + $0x1a0] sm:$0xf] }
 0x115   :  { %1784 = vmatpush.bf16.msra.mxu0 %v4637_v17  ;;  %v4817_v17 = vor.u32 %v6080_v63, %v4814_v3  ;;  %v4789_v59 = vor.u32 %v6075_v39, %v4788_v38  ;;  %v6089_v38 = vld [vmem:[#allocation10 + $0x1b4] sm:$0xf0]  ;;  %v6088_v39 = vld [vmem:[#allocation10 + $0x1b4] sm:$0xf] }
 0x116   :  { %1821 = vmatpush.bf16.msra.mxu3 %v4721_v1  ;;  %1810 = vmatpush.bf16.msra.mxu2 %v4641_v37  ;;  %v4804_v1 = vld [vmem:[#allocation10 + $0x160] sm:$0xf]  ;;  %v4806_v37 = vld [vmem:[#allocation10 + $0x168] sm:$0xf0]  ;;  %v464_v53 = vadd.f32 %v446_v27, %v370_v25  ;;  %v447_v57 = vmul.f32 %v429_v33, %v6716_v30  ;;  %v6070_v33 = vld [vmem:[#allocation10 + $0x124] sm:$0xf] }
 0x117   :  { %1796 = vmatpush.bf16.msra.mxu1 %v4709_v12  ;;  %v4805_v9 = vor.u32 %v6079_v4, %v4804_v1  ;;  %v4878_v12 = vld [vmem:[#allocation10 + $0x1f8] sm:$0xf0]  ;;  %v4854_v25 = vld [vmem:[#allocation10 + $0x1c8] sm:$0xf0]  ;;  %v4772_v27 = vld [vmem:[#allocation10 + $0x120] sm:$0xf] }
 0x118   :  { %v4881_v16 = vor.u32 %v6096_v11, %v4878_v12  ;;  %v558_v63 = vadd.f32 %v540_v48, %v464_v53  ;;  %v6087_v53 = vld [vmem:[#allocation10 + $0x1a4] sm:$0xf0] }
 0x119   :  { %1785 = vmatpush.bf16.msra.mxu0 %v4629_v21  ;;  %v6076_v21 = vld [vmem:[#allocation10 + $0x154] sm:$0xf] }
 0x11a   :  { %1822 = vmatpush.bf16.msra.mxu3 %v4713_v15  ;;  %1811 = vmatpush.bf16.msra.mxu2 %v4633_v23  ;;  %v4877_v15 = vor.u32 %v6097_v10, %v4876_v41  ;;  %v4868_v23 = vld [vmem:[#allocation10 + $0x1e0] sm:$0xf]  ;;  %v4801_v44 = vor.u32 %v6076_v21, %v4798_v22  ;;  %v6091_v22 = vld [vmem:[#allocation10 + $0x1c4] sm:$0xf0] }
 0x11b   :  { %1797 = vmatpush.bf16.msra.mxu1 %v4701_v29  ;;  %v4869_v29 = vor.u32 %v6095_v24, %v4868_v23  ;;  %v6090_v23 = vld [vmem:[#allocation10 + $0x1c4] sm:$0xf] }
 0x11c   :  { %v4857_v31 = vor.u32 %v6090_v23, %v4854_v25  ;;  %v6112_v23 = vld [vmem:[#allocation11 + $0x174] sm:$0xf]  ;;  %v4942_v25 = vld [vmem:[#allocation11 + $0x178] sm:$0xf0] }
 0x11d   :  { %2029 = vmatpush.bf16.msrb.mxu0 %v4813_v2 }
 0x11e   :  { %1823 = vmatpush.bf16.msra.mxu3 %v4705_v34  ;;  %2055 = vmatpush.bf16.msrb.mxu2 %v4817_v17  ;;  %v487_v34 = vperm.slane %v6748_v0, 7 }
 0x11f   :  { %1798 = vmatpush.bf16.msra.mxu1 %v4693_v46  ;;  %v6093_v46 = vld [vmem:[#allocation10 + $0x1d4] sm:$0xf0] }
 0x120   :  { %v4861_v0 = vor.u32 %v6093_v46, %v4860_v45  ;;  %v523_v61 = vperm.slane %v487_v34, 3  ;;  %v4774_v34 = vld [vmem:[#allocation10 + $0x128] sm:$0xf0]  ;;  %v4764_v45 = vld [vmem:[#allocation10 + $0x110] sm:$0xf] }
 0x121   :  { %2030 = vmatpush.bf16.msrb.mxu0 %v4805_v9  ;;  %v6069_v46 = vld [vmem:[#allocation10 + $0x114] sm:$0xf0] }
 0x122   :  { %1824 = vmatpush.bf16.msra.mxu3 %v4697_v49  ;;  %v6074_v49 = vld [vmem:[#allocation10 + $0x144] sm:$0xf]  ;;  %v541_v3 = vmul.f32 %v523_v61, %v6726_v58  ;;  %v4765_v48 = vor.u32 %v6069_v46, %v4764_v45  ;;  %v6067_v61 = vld [vmem:[#allocation10 + $0x104] sm:$0xf0]  ;;  %v4924_v45 = vld [vmem:[#allocation11 + $0x150] sm:$0xf] }
 0x123   :  { %2042 = vmatpush.bf16.msrb.mxu1 %v4877_v15  ;;  %v4793_v62 = vor.u32 %v6074_v49, %v4790_v50  ;;  %v6073_v15 = vld [vmem:[#allocation10 + $0x134] sm:$0xf0]  ;;  %v4766_v49 = vld [vmem:[#allocation10 + $0x118] sm:$0xf0] }
 0x124   :  { %v4769_v50 = vor.u32 %v6068_v47, %v4766_v49  ;;  %v6109_v46 = vld [vmem:[#allocation11 + $0x154] sm:$0xf0]  ;;  %v6108_v47 = vld [vmem:[#allocation11 + $0x154] sm:$0xf]  ;;  %v4996_v49 = vld [vmem:[#allocation11 + $0x1e0] sm:$0xf] }
 0x125   :  { %2031 = vmatpush.bf16.msrb.mxu0 %v4797_v35  ;;  %v4777_v35 = vor.u32 %v6070_v33, %v4774_v34  ;;  %v4934_v33 = vld [vmem:[#allocation11 + $0x168] sm:$0xf0]  ;;  %v5004_v34 = vld [vmem:[#allocation11 + $0x1f0] sm:$0xf] }
 0x126   :  { %2068 = vmatpush.bf16.msrb.mxu3 %v4881_v16  ;;  %v6072_v16 = vld [vmem:[#allocation10 + $0x134] sm:$0xf] }
 0x127   :  { %2043 = vmatpush.bf16.msrb.mxu1 %v4869_v29  ;;  %v4785_v21 = vor.u32 %v6072_v16, %v4782_v20  ;;  %v6071_v29 = vld [vmem:[#allocation10 + $0x124] sm:$0xf0]  ;;  %v242_v16 = vperm.slane %v6713_v28, 4  ;;  %v6128_v28 = vld [vmem:[#allocation11 + $0x1f4] sm:$0xf] }
 0x128   :  { %v4773_v32 = vor.u32 %v6071_v29, %v4772_v27  ;;  %v4932_v27 = vld [vmem:[#allocation11 + $0x160] sm:$0xf]  ;;  %v6111_v29 = vld [vmem:[#allocation11 + $0x164] sm:$0xf0] }
 0x129   :  { %2032 = vmatpush.bf16.msrb.mxu0 %v4789_v59  ;;  %v4838_v59 = vld [vmem:[#allocation10 + $0x1a8] sm:$0xf0] }
 0x12a   :  { %2069 = vmatpush.bf16.msrb.mxu3 %v4873_v36  ;;  %v4844_v36 = vld [vmem:[#allocation10 + $0x1b0] sm:$0xf] }
 0x12b   :  { %2044 = vmatpush.bf16.msrb.mxu1 %v4861_v0  ;;  %v6086_v0 = vld [vmem:[#allocation10 + $0x1a4] sm:$0xf] }
 0x12e   :  { %2070 = vmatpush.bf16.msrb.mxu3 %v4865_v56  ;;  %v4837_v56 = vor.u32 %v6087_v53, %v4836_v51 }
 0x132   :  { %2071 = vmatpush.bf16.msrb.mxu3 %v4857_v31  ;;  %v4945_v31 = vor.u32 %v6112_v23, %v4942_v25 }
 0x165   :  { %v6746_v60 = vpop.f32.mrf.mxu0 }
 0x166   :  { %v1538_v55 = vadd.f32 %v6746_v60, %v558_v63  ;;  %v6772_v63 = vld [vmem:[#allocation5 + $0x10] sm:$0xff] }
 0x167   :  { %v394_v20 = vperm.slane %v6772_v63, 2  ;;  %v488_v51 = vperm.slane %v6772_v63, 3  ;;  %v301_v53 = vperm.slane %v6772_v63, 5 }
 0x16b   :  { %v6750_v8 = vpop.f32.mrf.mxu2 }
 0x16d   :  { %v1539_v14 = vpop.f32.mrf.mxu0 }
 0x16e   :  { %v4809_v14 = vor.u32 %v6078_v18, %v4806_v37 }
 0x170   :  { %2056 = vmatpush.bf16.msrb.mxu2 %v4809_v14  ;;  %v4780_v14 = vld [vmem:[#allocation10 + $0x130] sm:$0xf] }
 0x171   :  { %v4781_v19 = vor.u32 %v6073_v15, %v4780_v14 }
 0x173   :  { %v1565_v40 = vpop.f32.mrf.mxu2  ;;  %2033 = vmatpush.bf16.msrb.mxu0 %v4781_v19 }
 0x174   :  { %v277_v40 = vadd.f32 %v241_v54, %v220_v13  ;;  %2057 = vmatpush.bf16.msrb.mxu2 %v4801_v44 }
 0x176   :  { %v371_v54 = vadd.f32 %v353_v43, %v277_v40  ;;  %v4845_v40 = vor.u32 %v6089_v38, %v4844_v36  ;;  %v4846_v43 = vld [vmem:[#allocation10 + $0x1b8] sm:$0xf0]  ;;  %v6129_v36 = vld [vmem:[#allocation11 + $0x1f4] sm:$0xf0] }
 0x177   :  { %2034 = vmatpush.bf16.msrb.mxu0 %v4773_v32  ;;  %v4849_v44 = vor.u32 %v6088_v39, %v4846_v43  ;;  %v6110_v32 = vld [vmem:[#allocation11 + $0x164] sm:$0xf]  ;;  %v5006_v38 = vld [vmem:[#allocation11 + $0x1f8] sm:$0xf0]  ;;  %v5005_v43 = vor.u32 %v6129_v36, %v5004_v34 }
 0x178   :  { %v465_v2 = vadd.f32 %v447_v57, %v371_v54  ;;  %2058 = vmatpush.bf16.msrb.mxu2 %v4793_v62  ;;  %v4841_v54 = vor.u32 %v6086_v0, %v4838_v59  ;;  %v4756_v57 = vld [vmem:[#allocation10 + $0x100] sm:$0xf]  ;;  %v6066_v62 = vld [vmem:[#allocation10 + $0x104] sm:$0xf]  ;;  %v4998_v59 = vld [vmem:[#allocation11 + $0x1e8] sm:$0xf0] }
 0x179   :  { %2072 = vmatpush.bf16.msrb.mxu3 %v4849_v44  ;;  %v5009_v44 = vor.u32 %v6128_v28, %v5006_v38 }
 0x17a   :  { %v559_v5 = vadd.f32 %v541_v3, %v465_v2  ;;  %v4758_v2 = vld [vmem:[#allocation10 + $0x108] sm:$0xf0] }
 0x17b   :  { %2035 = vmatpush.bf16.msrb.mxu0 %v4765_v48  ;;  %v4761_v3 = vor.u32 %v6066_v62, %v4758_v2  ;;  %v4926_v48 = vld [vmem:[#allocation11 + $0x158] sm:$0xf0]  ;;  %v4925_v62 = vor.u32 %v6109_v46, %v4924_v45  ;;  %v4916_v2 = vld [vmem:[#allocation11 + $0x140] sm:$0xf] }
 0x17c   :  { %v1564_v17 = vadd.f32 %v6750_v8, %v559_v5  ;;  %v4852_v8 = vld [vmem:[#allocation10 + $0x1c0] sm:$0xf]  ;;  %2059 = vmatpush.bf16.msrb.mxu2 %v4785_v21  ;;  %v6084_v5 = vld [vmem:[#allocation10 + $0x194] sm:$0xf] }
 0x17d   :  { %v4853_v24 = vor.u32 %v6091_v22, %v4852_v8  ;;  %2073 = vmatpush.bf16.msrb.mxu3 %v4841_v54  ;;  %v4940_v8 = vld [vmem:[#allocation11 + $0x170] sm:$0xf]  ;;  %v6113_v22 = vld [vmem:[#allocation11 + $0x174] sm:$0xf0]  ;;  %v430_v54 = vperm.slane %v394_v20, 2  ;;  %v524_v20 = vperm.slane %v488_v51, 3 }
 0x17f   :  { %2045 = vmatpush.bf16.msrb.mxu1 %v4853_v24  ;;  %v4941_v24 = vor.u32 %v6113_v22, %v4940_v8 }
 0x180   :  { %2060 = vmatpush.bf16.msrb.mxu2 %v4777_v35  ;;  %v4933_v35 = vor.u32 %v6111_v29, %v4932_v27  ;;  %v542_v27 = vmul.f32 %v524_v20, %v6726_v58 }
 0x183   :  { %2046 = vmatpush.bf16.msrb.mxu1 %v4845_v40  ;;  %v4937_v40 = vor.u32 %v6110_v32, %v4934_v33 }
 0x184   :  { %2061 = vmatpush.bf16.msrb.mxu2 %v4769_v50  ;;  %v6127_v50 = vld [vmem:[#allocation11 + $0x1e4] sm:$0xf0] }
 0x185   :  { %v4997_v0 = vor.u32 %v6127_v50, %v4996_v49 }
 0x187   :  { %2047 = vmatpush.bf16.msrb.mxu1 %v4837_v56  ;;  %v6126_v56 = vld [vmem:[#allocation11 + $0x1e4] sm:$0xf] }
 0x188   :  { %2062 = vmatpush.bf16.msrb.mxu2 %v4761_v3  ;;  %v6107_v3 = vld [vmem:[#allocation11 + $0x144] sm:$0xf0] }
 0x18d   :  { %v1550_v1 = vpop.f32.mrf.mxu1 }
 0x18e   :  { %v1551_v4 = vadd.f32 %v1550_v1, %v1538_v55  ;;  %v4757_v55 = vor.u32 %v6067_v61, %v4756_v57  ;;  %v4828_v1 = vld [vmem:[#allocation10 + $0x190] sm:$0xf] }
 0x18f   :  { %v6782_v57 = vld [vmem:[#allocation7] sm:$0xff] }
 0x190   :  { %v1580_v7 = vmul.f32 0.2, %v1551_v4  ;;  %2036 = vmatpush.bf16.msrb.mxu0 %v4757_v55  ;;  %v243_v61 = vperm.slane %v6782_v57, 5  ;;  %v5001_v55 = vor.u32 %v6126_v56, %v4998_v59  ;;  %v6104_v56 = vld [vmem:[#allocation11 + $0x134] sm:$0xf]  ;;  %v244_v20 = vperm.slane %v6782_v57, 6 }
 0x192   :  { %v1582_v18 = vmax.f32 %v1551_v4, %v1580_v7  ;;  %v6085_v4 = vld [vmem:[#allocation10 + $0x194] sm:$0xf0] }
 0x193   :  { %v1576_v37 = vpop.f32.mrf.mxu3  ;;  %v4829_v7 = vor.u32 %v6085_v4, %v4828_v1 }
 0x194   :  { %v1584_v41 = vpack.c.bf16 %v1582_v18, %v1582_v18  ;;  %v1577_v9 = vadd.f32 %v1576_v37, %v1564_v17  ;;  %v4830_v17 = vld [vmem:[#allocation10 + $0x198] sm:$0xf0]  ;;  %v167_v37 = vperm.slane %v6772_v63, 0 }
 0x195   :  { %v1552_v10 = vpop.f32.mrf.mxu1  ;;  %v4833_v18 = vor.u32 %v6084_v5, %v4830_v17  ;;  %2048 = vmatpush.bf16.msrb.mxu1 %v4829_v7  ;;  %v4929_v5 = vor.u32 %v6108_v47, %v4926_v48  ;;  %v4988_v7 = vld [vmem:[#allocation11 + $0x1d0] sm:$0xf]  ;;  %v6125_v17 = vld [vmem:[#allocation11 + $0x1d4] sm:$0xf0] }
 0x196   :  { %v1581_v11 = vmul.f32 0.2, %v1577_v9  ;;  %1786 = vmatmul.bf16.vlgmr.msra.gmra.mxu0 %v1584_v41  ;;  %1812 = vmatmul.bf16.vlgmr.msra.gmra.mxu2 %v1584_v41  ;;  %v300_v41 = vperm.slane %v6772_v63, 1  ;;  %v4820_v10 = vld [vmem:[#allocation10 + $0x180] sm:$0xf]  ;;  %v203_v15 = vperm.slane %v167_v37, 0 }
 0x197   :  { %2074 = vmatpush.bf16.msrb.mxu3 %v4833_v18  ;;  %2280 = vmatpush.bf16.msra.mxu0 %v4941_v24  ;;  %v6124_v18 = vld [vmem:[#allocation11 + $0x1d4] sm:$0xf]  ;;  %v489_v24 = vperm.slane %v6772_v63, 7 }
 0x198   :  { %v1583_v12 = vmax.f32 %v1577_v9, %v1581_v11  ;;  %v168_v9 = vperm.slane %v6772_v63, 4  ;;  %v6083_v11 = vld [vmem:[#allocation10 + $0x184] sm:$0xf0]  ;;  %v336_v19 = vperm.slane %v300_v41, 1  ;;  %v221_v39 = vmul.f32 %v203_v15, %v6711_v26  ;;  %2306 = vmatpush.bf16.msra.mxu2 %v4945_v31  ;;  %v6106_v41 = vld [vmem:[#allocation11 + $0x144] sm:$0xf] }
 0x199   :  { %v4917_v15 = vor.u32 %v6107_v3, %v4916_v2  ;;  %v6122_v2 = vld [vmem:[#allocation11 + $0x1c4] sm:$0xf]  ;;  %v4982_v3 = vld [vmem:[#allocation11 + $0x1c8] sm:$0xf0] }
 0x19a   :  { %v1585_v60 = vpack.c.bf16 %v1583_v12, %v1583_v12  ;;  %v6082_v12 = vld [vmem:[#allocation10 + $0x184] sm:$0xf]  ;;  %v204_v21 = vperm.slane %v168_v9, 0  ;;  %v278_v1 = vadd.f32 %v242_v16, %v221_v39  ;;  %v354_v4 = vmul.f32 %v336_v19, %v6721_v42  ;;  %v4918_v9 = vld [vmem:[#allocation11 + $0x148] sm:$0xf0] }
 0x19b   :  { %v1578_v13 = vpop.f32.mrf.mxu3  ;;  %2281 = vmatpush.bf16.msra.mxu0 %v4933_v35  ;;  %v448_v19 = vmul.f32 %v430_v54, %v6716_v30  ;;  %v4921_v8 = vor.u32 %v6106_v41, %v4918_v9  ;;  %v525_v35 = vperm.slane %v489_v24, 3  ;;  %v4910_v54 = vld [vmem:[#allocation11 + $0x138] sm:$0xf0]  ;;  %v4972_v9 = vld [vmem:[#allocation11 + $0x1b0] sm:$0xf] }
 0x19c   :  { %1799 = vmatmul.bf16.vlgmr.msra.gmra.mxu1 %v1585_v60  ;;  %1825 = vmatmul.bf16.vlgmr.msra.gmra.mxu3 %v1585_v60  ;;  %v4821_v60 = vor.u32 %v6083_v11, %v4820_v10  ;;  %v4822_v13 = vld [vmem:[#allocation10 + $0x188] sm:$0xf0]  ;;  %v222_v37 = vmul.f32 %v204_v21, %v6711_v26  ;;  %v4990_v10 = vld [vmem:[#allocation11 + $0x1d8] sm:$0xf0]  ;;  %v337_v11 = vperm.slane %v301_v53, 1  ;;  %v372_v16 = vadd.f32 %v354_v4, %v278_v1 }
 0x19d   :  { %v4825_v14 = vor.u32 %v6082_v12, %v4822_v13  ;;  %2307 = vmatpush.bf16.msra.mxu2 %v4937_v40  ;;  %v395_v12 = vperm.slane %v6772_v63, 6  ;;  %v4993_v13 = vor.u32 %v6124_v18, %v4990_v10  ;;  %v543_v40 = vmul.f32 %v525_v35, %v6726_v58  ;;  %v4908_v53 = vld [vmem:[#allocation11 + $0x130] sm:$0xf]  ;;  %v4900_v1 = vld [vmem:[#allocation11 + $0x120] sm:$0xf] }
 0x19e   :  { %2049 = vmatpush.bf16.msrb.mxu1 %v4821_v60  ;;  %v4989_v60 = vor.u32 %v6125_v17, %v4988_v7  ;;  %v279_v21 = vadd.f32 %v243_v61, %v222_v37  ;;  %v355_v22 = vmul.f32 %v337_v11, %v6721_v42  ;;  %v466_v25 = vadd.f32 %v448_v19, %v372_v16  ;;  %v6103_v4 = vld [vmem:[#allocation11 + $0x124] sm:$0xf0]  ;;  %v6102_v17 = vld [vmem:[#allocation11 + $0x124] sm:$0xf]  ;;  %v4902_v18 = vld [vmem:[#allocation11 + $0x128] sm:$0xf0] }
 0x19f   :  { %2075 = vmatpush.bf16.msrb.mxu3 %v4825_v14  ;;  %2282 = vmatpush.bf16.msra.mxu0 %v4925_v62  ;;  %v431_v23 = vperm.slane %v395_v12, 2  ;;  %v4913_v61 = vor.u32 %v6104_v56, %v4910_v54  ;;  %v4980_v62 = vld [vmem:[#allocation11 + $0x1c0] sm:$0xf]  ;;  %v4901_v7 = vor.u32 %v6103_v4, %v4900_v1  ;;  %v4905_v37 = vor.u32 %v6102_v17, %v4902_v18  ;;  %v6121_v10 = vld [vmem:[#allocation11 + $0x1b4] sm:$0xf0] }
 0x1a0   :  { %v373_v33 = vadd.f32 %v355_v22, %v279_v21  ;;  %v560_v28 = vadd.f32 %v542_v27, %v466_v25  ;;  %v6804_v41 = vld [vmem:[#allocation5 + $0x18] sm:$0xff]  ;;  %v6120_v11 = vld [vmem:[#allocation11 + $0x1b4] sm:$0xf]  ;;  %v6101_v16 = vld [vmem:[#allocation11 + $0x114] sm:$0xf0] }
 0x1a1   :  { %2308 = vmatpush.bf16.msra.mxu2 %v4929_v5  ;;  %v449_v34 = vmul.f32 %v431_v23, %v6716_v30  ;;  %v4985_v5 = vor.u32 %v6122_v2, %v4982_v3  ;;  %v169_v12 = vperm.slane %v6804_v41, 0  ;;  %v6100_v19 = vld [vmem:[#allocation11 + $0x114] sm:$0xf]  ;;  %v4894_v22 = vld [vmem:[#allocation11 + $0x118] sm:$0xf0]  ;;  %v397_v3 = vperm.slane %v6804_v41, 6 }
 0x1a2   :  { %2293 = vmatpush.bf16.msra.mxu1 %v5005_v43  ;;  %v4897_v23 = vor.u32 %v6100_v19, %v4894_v22  ;;  %v4964_v24 = vld [vmem:[#allocation11 + $0x1a0] sm:$0xf]  ;;  %v6119_v25 = vld [vmem:[#allocation11 + $0x1a4] sm:$0xf0]  ;;  %v6118_v27 = vld [vmem:[#allocation11 + $0x1a4] sm:$0xf] }
 0x1a3   :  { %2319 = vmatpush.bf16.msra.mxu3 %v5009_v44  ;;  %2283 = vmatpush.bf16.msra.mxu0 %v4917_v15  ;;  %v467_v63 = vadd.f32 %v449_v34, %v373_v33  ;;  %v4892_v15 = vld [vmem:[#allocation11 + $0x110] sm:$0xf]  ;;  %v4965_v33 = vor.u32 %v6119_v25, %v4964_v24  ;;  %v4966_v34 = vld [vmem:[#allocation11 + $0x1a8] sm:$0xf0]  ;;  %v4958_v56 = vld [vmem:[#allocation11 + $0x198] sm:$0xf0] }
 0x1a4   :  { %v4893_v21 = vor.u32 %v6101_v16, %v4892_v15  ;;  %v4969_v35 = vor.u32 %v6118_v27, %v4966_v34  ;;  %v4950_v4 = vld [vmem:[#allocation11 + $0x188] sm:$0xf0]  ;;  %v6145_v17 = vld [vmem:[#allocation10 + $0x274] sm:$0xf0]  ;;  %v6144_v18 = vld [vmem:[#allocation10 + $0x274] sm:$0xf] }
 0x1a5   :  { %2309 = vmatpush.bf16.msra.mxu2 %v4921_v8  ;;  %v561_v48 = vadd.f32 %v543_v40, %v467_v63  ;;  %v302_v8 = vperm.slane %v6804_v41, 1  ;;  %v170_v40 = vperm.slane %v6804_v41, 4  ;;  %v5062_v15 = vld [vmem:[#allocation10 + $0x268] sm:$0xf0]  ;;  %v5132_v16 = vld [vmem:[#allocation10 + $0x2f0] sm:$0xf] }
 0x1a6   :  { %2294 = vmatpush.bf16.msra.mxu1 %v4997_v0  ;;  %v6105_v0 = vld [vmem:[#allocation11 + $0x134] sm:$0xf0]  ;;  %v6160_v22 = vld [vmem:[#allocation10 + $0x2f4] sm:$0xf]  ;;  %v6159_v34 = vld [vmem:[#allocation10 + $0x2e4] sm:$0xf0] }
 0x1a7   :  { %2320 = vmatpush.bf16.msra.mxu3 %v5001_v55  ;;  %v4909_v59 = vor.u32 %v6105_v0, %v4908_v53  ;;  %v6123_v55 = vld [vmem:[#allocation11 + $0x1c4] sm:$0xf0]  ;;  %v338_v63 = vperm.slane %v302_v8, 1  ;;  %v245_v53 = vperm.slane %v6782_v57, 7  ;;  %v206_v2 = vperm.slane %v170_v40, 0 }
 0x1a8   :  { %v433_v40 = vperm.slane %v397_v3, 2 }
 0x1a9   :  { %2284 = vmatpush.bf16.msra.mxu0 %v4909_v59  ;;  %2310 = vmatpush.bf16.msra.mxu2 %v4913_v61  ;;  %v4948_v61 = vld [vmem:[#allocation11 + $0x180] sm:$0xf]  ;;  %v224_v19 = vmul.f32 %v206_v2, %v6711_v26 }
 0x1aa   :  { %2295 = vmatpush.bf16.msra.mxu1 %v4989_v60  ;;  %v4973_v60 = vor.u32 %v6121_v10, %v4972_v9  ;;  %v5070_v9 = vld [vmem:[#allocation10 + $0x278] sm:$0xf0]  ;;  %v5060_v10 = vld [vmem:[#allocation10 + $0x260] sm:$0xf] }
 0x1ab   :  { %2321 = vmatpush.bf16.msra.mxu3 %v4993_v13  ;;  %v4974_v13 = vld [vmem:[#allocation11 + $0x1b8] sm:$0xf0] }
 0x1ad   :  { %2285 = vmatpush.bf16.msra.mxu0 %v4901_v7  ;;  %2311 = vmatpush.bf16.msra.mxu2 %v4905_v37  ;;  %v5068_v7 = vld [vmem:[#allocation10 + $0x270] sm:$0xf] }
 0x1ae   :  { %v5069_v37 = vor.u32 %v6145_v17, %v5068_v7 }
 0x1af   :  { %2322 = vmatpush.bf16.msra.mxu3 %v4985_v5 }
 0x1b1   :  { %2286 = vmatpush.bf16.msra.mxu0 %v4893_v21  ;;  %2312 = vmatpush.bf16.msra.mxu2 %v4897_v23  ;;  %v6161_v21 = vld [vmem:[#allocation10 + $0x2f4] sm:$0xf0]  ;;  %v5134_v23 = vld [vmem:[#allocation10 + $0x2f8] sm:$0xf0] }
 0x1b2   :  { %v5133_v25 = vor.u32 %v6161_v21, %v5132_v16  ;;  %v5137_v27 = vor.u32 %v6160_v22, %v5134_v23 }
 0x213   :  { %v1787_v14 = vpop.f32.mrf.mxu0 }
 0x219   :  { %v1800_v29 = vpop.f32.mrf.mxu1  ;;  %v1813_v31 = vpop.f32.mrf.mxu2 }
 0x21a   :  { %v1801_v32 = vadd.f32 %v1800_v29, %v1787_v14  ;;  %v4977_v14 = vor.u32 %v6120_v11, %v4974_v13  ;;  %v205_v29 = vperm.slane %v169_v12, 0  ;;  %v6143_v11 = vld [vmem:[#allocation10 + $0x264] sm:$0xf0]  ;;  %v5073_v13 = vor.u32 %v6144_v18, %v5070_v9 }
 0x21b   :  { %v1789_v36 = vpop.f32.mrf.mxu0  ;;  %v5061_v8 = vor.u32 %v6143_v11, %v5060_v10 }
 0x21c   :  { %v1830_v38 = vadd.f32 %v1801_v32, %v6734_v6  ;;  %2323 = vmatpush.bf16.msra.mxu3 %v4977_v14  ;;  %v490_v32 = vperm.slane %v6804_v41, 3  ;;  %v4884_v36 = vld [vmem:[#allocation11 + $0x100] sm:$0xf]  ;;  %v223_v59 = vmul.f32 %v205_v29, %v6711_v26  ;;  %v6142_v14 = vld [vmem:[#allocation10 + $0x264] sm:$0xf] }
 0x21d   :  { %v5065_v24 = vor.u32 %v6142_v14, %v5062_v15  ;;  %v6141_v29 = vld [vmem:[#allocation10 + $0x254] sm:$0xf0] }
 0x21e   :  { %v6794_v39 = vadd.f32 %v1830_v38, %v560_v28  ;;  %v6099_v28 = vld [vmem:[#allocation11 + $0x104] sm:$0xf0]  ;;  %v6098_v38 = vld [vmem:[#allocation11 + $0x104] sm:$0xf]  ;;  %v280_v12 = vadd.f32 %v244_v20, %v223_v59  ;;  %v5052_v20 = vld [vmem:[#allocation10 + $0x250] sm:$0xf] }
 0x21f   :  { %v1826_v43 = vpop.f32.mrf.mxu3  ;;  %v6156_v59 = vld [vmem:[#allocation10 + $0x2d4] sm:$0xf] }
 0x220   :  { %v1834_v44 = vpack.c.bf16 %v6794_v39, %v6794_v39  ;;  %v1827_v45 = vadd.f32 %v1826_v43, %v1813_v31  ;;  %v396_v31 = vperm.slane %v6804_v41, 2  ;;  %v303_v43 = vperm.slane %v6804_v41, 5  ;;  %2324 = vmatpush.bf16.msra.mxu3 %v4969_v35 }
 0x221   :  { %v1802_v46 = vpop.f32.mrf.mxu1  ;;  %v1815_v47 = vpop.f32.mrf.mxu2 }
 0x222   :  { %v1831_v49 = vadd.f32 %v1827_v45, %v6742_v52  ;;  %2037 = vmatmul.bf16.vlgmr.msrb.gmra.mxu0 %v1834_v44  ;;  %2063 = vmatmul.bf16.vlgmr.msrb.gmra.mxu2 %v1834_v44  ;;  %v4981_v52 = vor.u32 %v6123_v55, %v4980_v62  ;;  %v4885_v44 = vor.u32 %v6099_v28, %v4884_v36  ;;  %v4886_v45 = vld [vmem:[#allocation11 + $0x108] sm:$0xf0]  ;;  %v4956_v47 = vld [vmem:[#allocation11 + $0x190] sm:$0xf]  ;;  %v6115_v62 = vld [vmem:[#allocation11 + $0x184] sm:$0xf0] }
 0x223   :  { %v4889_v46 = vor.u32 %v6098_v38, %v4886_v45  ;;  %v6114_v55 = vld [vmem:[#allocation11 + $0x184] sm:$0xf]  ;;  %v4949_v1 = vor.u32 %v6115_v62, %v4948_v61  ;;  %v5118_v62 = vld [vmem:[#allocation10 + $0x2d8] sm:$0xf0] }
 0x224   :  { %v6800_v50 = vadd.f32 %v1831_v49, %v561_v48  ;;  %2296 = vmatpush.bf16.msra.mxu1 %v4981_v52  ;;  %v6117_v48 = vld [vmem:[#allocation11 + $0x194] sm:$0xf0]  ;;  %v6116_v49 = vld [vmem:[#allocation11 + $0x194] sm:$0xf]  ;;  %2287 = vmatpush.bf16.msra.mxu0 %v4885_v44  ;;  %v339_v52 = vperm.slane %v303_v43, 1  ;;  %v4953_v5 = vor.u32 %v6114_v55, %v4950_v4  ;;  %v491_v43 = vperm.slane %v6804_v41, 7 }
 0x225   :  { %v4957_v0 = vor.u32 %v6117_v48, %v4956_v47  ;;  %2313 = vmatpush.bf16.msra.mxu2 %v4889_v46  ;;  %v4961_v54 = vor.u32 %v6116_v49, %v4958_v56  ;;  %v6158_v38 = vld [vmem:[#allocation10 + $0x2e4] sm:$0xf]  ;;  %v5053_v44 = vor.u32 %v6141_v29, %v5052_v20  ;;  %v5044_v46 = vld [vmem:[#allocation10 + $0x240] sm:$0xf]  ;;  %v6139_v47 = vld [vmem:[#allocation10 + $0x244] sm:$0xf0]  ;;  %v281_v48 = vadd.f32 %v245_v53, %v224_v19 }
 0x226   :  { %v1835_v6 = vpack.c.bf16 %v6800_v50, %v6800_v50  ;;  %v357_v49 = vmul.f32 %v339_v52, %v6721_v42  ;;  %v6157_v56 = vld [vmem:[#allocation10 + $0x2d4] sm:$0xf0]  ;;  %v6138_v61 = vld [vmem:[#allocation10 + $0x244] sm:$0xf]  ;;  %v5046_v41 = vld [vmem:[#allocation10 + $0x248] sm:$0xf0]  ;;  %v5121_v3 = vor.u32 %v6156_v59, %v5118_v62  ;;  %v5045_v53 = vor.u32 %v6139_v47, %v5044_v46 }
 0x227   :  { %v1828_v51 = vpop.f32.mrf.mxu3  ;;  %2325 = vmatpush.bf16.msra.mxu3 %v4961_v54  ;;  %v527_v4 = vperm.slane %v491_v43, 3  ;;  %v6137_v20 = vld [vmem:[#allocation10 + $0x234] sm:$0xf0]  ;;  %v6136_v29 = vld [vmem:[#allocation10 + $0x234] sm:$0xf] }
 0x228   :  { %2050 = vmatmul.bf16.vlgmr.msrb.gmra.mxu1 %v1835_v6  ;;  %2076 = vmatmul.bf16.vlgmr.msrb.gmra.mxu3 %v1835_v6  ;;  %v432_v6 = vperm.slane %v396_v31, 2  ;;  %v6813_v51 = vperm.slane %v490_v32, 3  ;;  %v6140_v31 = vld [vmem:[#allocation10 + $0x254] sm:$0xf]  ;;  %v5054_v32 = vld [vmem:[#allocation10 + $0x258] sm:$0xf0]  ;;  %v375_v52 = vadd.f32 %v357_v49, %v281_v48 }
 0x229   :  { %2297 = vmatpush.bf16.msra.mxu1 %v4973_v60  ;;  %v356_v60 = vmul.f32 %v338_v63, %v6721_v42  ;;  %2531 = vmatpush.bf16.msrb.mxu0 %v5069_v37  ;;  %v5126_v63 = vld [vmem:[#allocation10 + $0x2e8] sm:$0xf0]  ;;  %v545_v18 = vmul.f32 %v527_v4, %v6726_v58  ;;  %v6135_v43 = vld [vmem:[#allocation10 + $0x224] sm:$0xf0]  ;;  %v6835_v59 = vld [vmem:[#allocation7 + $0x8] sm:$0xff] }
 0x22a   :  { %2557 = vmatpush.bf16.msrb.mxu2 %v5073_v13  ;;  %v450_v36 = vmul.f32 %v432_v6, %v6716_v30  ;;  %v5129_v45 = vor.u32 %v6158_v38, %v5126_v63  ;;  %v5057_v6 = vor.u32 %v6140_v31, %v5054_v32  ;;  %v544_v54 = vmul.f32 %v6813_v51, %v6726_v58  ;;  %v5038_v32 = vld [vmem:[#allocation10 + $0x238] sm:$0xf0]  ;;  %v5110_v38 = vld [vmem:[#allocation10 + $0x2c8] sm:$0xf0]  ;;  %v5028_v63 = vld [vmem:[#allocation10 + $0x220] sm:$0xf] }
 0x22b   :  { %2326 = vmatpush.bf16.msra.mxu3 %v4953_v5  ;;  %v374_v35 = vadd.f32 %v356_v60, %v280_v12  ;;  %v5049_v5 = vor.u32 %v6138_v61, %v5046_v41  ;;  %v5029_v46 = vor.u32 %v6135_v43, %v5028_v63  ;;  %v6829_v48 = vld [vmem:[#allocation5 + $0x20] sm:$0xff]  ;;  %v6153_v61 = vld [vmem:[#allocation10 + $0x2b4] sm:$0xf0]  ;;  %v6152_v41 = vld [vmem:[#allocation10 + $0x2b4] sm:$0xf] }
 0x22c   :  { %v171_v49 = vperm.slane %v6829_v48, 0  ;;  %v5092_v4 = vld [vmem:[#allocation10 + $0x2a0] sm:$0xf]  ;;  %v5198_v43 = vld [vmem:[#allocation11 + $0x278] sm:$0xf0] }
 0x22d   :  { %2298 = vmatpush.bf16.msra.mxu1 %v4965_v33  ;;  %v5124_v33 = vld [vmem:[#allocation10 + $0x2e0] sm:$0xf]  ;;  %2532 = vmatpush.bf16.msrb.mxu0 %v5061_v8  ;;  %v468_v55 = vadd.f32 %v450_v36, %v374_v35  ;;  %v5041_v35 = vor.u32 %v6136_v29, %v5038_v32  ;;  %v6147_v32 = vld [vmem:[#allocation10 + $0x284] sm:$0xf0] }
 0x22e   :  { %v5125_v28 = vor.u32 %v6159_v34, %v5124_v33  ;;  %2558 = vmatpush.bf16.msrb.mxu2 %v5065_v24  ;;  %v5108_v33 = vld [vmem:[#allocation10 + $0x2c0] sm:$0xf]  ;;  %v6155_v34 = vld [vmem:[#allocation10 + $0x2c4] sm:$0xf0] }
 0x22f   :  { %2570 = vmatpush.bf16.msrb.mxu3 %v5137_v27  ;;  %v562_v7 = vadd.f32 %v544_v54, %v468_v55  ;;  %v5036_v27 = vld [vmem:[#allocation10 + $0x230] sm:$0xf]  ;;  %v5109_v36 = vor.u32 %v6155_v34, %v5108_v33  ;;  %v5102_v55 = vld [vmem:[#allocation10 + $0x2b8] sm:$0xf0]  ;;  %v5076_v29 = vld [vmem:[#allocation10 + $0x280] sm:$0xf] }
 0x230   :  { %v5037_v31 = vor.u32 %v6137_v20, %v5036_v27  ;;  %v5100_v54 = vld [vmem:[#allocation10 + $0x2b0] sm:$0xf]  ;;  %v6148_v27 = vld [vmem:[#allocation10 + $0x294] sm:$0xf]  ;;  %v5086_v20 = vld [vmem:[#allocation10 + $0x298] sm:$0xf0] }
 0x231   :  { %2299 = vmatpush.bf16.msra.mxu1 %v4957_v0  ;;  %v5116_v0 = vld [vmem:[#allocation10 + $0x2d0] sm:$0xf]  ;;  %2533 = vmatpush.bf16.msrb.mxu0 %v5053_v44  ;;  %v6134_v44 = vld [vmem:[#allocation10 + $0x224] sm:$0xf]  ;;  %v5101_v62 = vor.u32 %v6153_v61, %v5100_v54  ;;  %v5078_v34 = vld [vmem:[#allocation10 + $0x288] sm:$0xf0] }
 0x232   :  { %v5117_v2 = vor.u32 %v6157_v56, %v5116_v0  ;;  %2559 = vmatpush.bf16.msrb.mxu2 %v5057_v6  ;;  %v304_v6 = vperm.slane %v6829_v48, 1  ;;  %v398_v0 = vperm.slane %v6829_v48, 2  ;;  %v172_v56 = vperm.slane %v6829_v48, 4  ;;  %v6146_v33 = vld [vmem:[#allocation10 + $0x284] sm:$0xf] }
 0x233   :  { %2571 = vmatpush.bf16.msrb.mxu3 %v5129_v45  ;;  %v5030_v45 = vld [vmem:[#allocation10 + $0x228] sm:$0xf0]  ;;  %v5081_v63 = vor.u32 %v6146_v33, %v5078_v34  ;;  %v6193_v54 = vld [vmem:[#allocation11 + $0x2f4] sm:$0xf0]  ;;  %v6192_v61 = vld [vmem:[#allocation11 + $0x2f4] sm:$0xf] }
 0x234   :  { %v5033_v47 = vor.u32 %v6134_v44, %v5030_v45  ;;  %v5188_v44 = vld [vmem:[#allocation11 + $0x260] sm:$0xf]  ;;  %v6175_v45 = vld [vmem:[#allocation11 + $0x264] sm:$0xf0]  ;;  %v493_v34 = vperm.slane %v6829_v48, 7 }
 0x235   :  { %2300 = vmatpush.bf16.msra.mxu1 %v4949_v1  ;;  %v451_v1 = vmul.f32 %v433_v40, %v6716_v30  ;;  %2534 = vmatpush.bf16.msrb.mxu0 %v5045_v53 }
 0x236   :  { %2560 = vmatpush.bf16.msrb.mxu2 %v5049_v5 }
 0x237   :  { %2572 = vmatpush.bf16.msrb.mxu3 %v5121_v3  ;;  %v469_v17 = vadd.f32 %v451_v1, %v375_v52  ;;  %v6133_v3 = vld [vmem:[#allocation10 + $0x214] sm:$0xf0]  ;;  %v6132_v52 = vld [vmem:[#allocation10 + $0x214] sm:$0xf]  ;;  %v5022_v1 = vld [vmem:[#allocation10 + $0x218] sm:$0xf0] }
 0x238   :  { %v5025_v5 = vor.u32 %v6132_v52, %v5022_v1  ;;  %v5182_v52 = vld [vmem:[#allocation11 + $0x258] sm:$0xf0]  ;;  %v5252_v1 = vld [vmem:[#allocation11 + $0x2e0] sm:$0xf] }
 0x239   :  { %2544 = vmatpush.bf16.msrb.mxu1 %v5133_v25  ;;  %v563_v60 = vadd.f32 %v545_v18, %v469_v17  ;;  %2535 = vmatpush.bf16.msrb.mxu0 %v5037_v31  ;;  %v5094_v17 = vld [vmem:[#allocation10 + $0x2a8] sm:$0xf0]  ;;  %v5089_v31 = vor.u32 %v6148_v27, %v5086_v20 }
 0x23a   :  { %2561 = vmatpush.bf16.msrb.mxu2 %v5041_v35  ;;  %v5077_v35 = vor.u32 %v6147_v32, %v5076_v29  ;;  %v5174_v20 = vld [vmem:[#allocation11 + $0x248] sm:$0xf0]  ;;  %v5246_v29 = vld [vmem:[#allocation11 + $0x2d8] sm:$0xf0] }
 0x23d   :  { %2545 = vmatpush.bf16.msrb.mxu1 %v5125_v28  ;;  %v6154_v28 = vld [vmem:[#allocation10 + $0x2c4] sm:$0xf]  ;;  %2536 = vmatpush.bf16.msrb.mxu0 %v5029_v46 }
 0x23e   :  { %v5113_v40 = vor.u32 %v6154_v28, %v5110_v38  ;;  %2562 = vmatpush.bf16.msrb.mxu2 %v5033_v47  ;;  %v6177_v28 = vld [vmem:[#allocation11 + $0x274] sm:$0xf0]  ;;  %v6176_v38 = vld [vmem:[#allocation11 + $0x274] sm:$0xf] }
 0x23f   :  { %v5201_v47 = vor.u32 %v6176_v38, %v5198_v43 }
 0x240   :  { %2573 = vmatpush.bf16.msrb.mxu3 %v5113_v40 }
 0x241   :  { %2546 = vmatpush.bf16.msrb.mxu1 %v5117_v2  ;;  %v5020_v2 = vld [vmem:[#allocation10 + $0x210] sm:$0xf] }
 0x242   :  { %v5021_v53 = vor.u32 %v6133_v3, %v5020_v2  ;;  %2563 = vmatpush.bf16.msrb.mxu2 %v5025_v5  ;;  %v5180_v3 = vld [vmem:[#allocation11 + $0x250] sm:$0xf] }
 0x244   :  { %2537 = vmatpush.bf16.msrb.mxu0 %v5021_v53  ;;  %v6172_v53 = vld [vmem:[#allocation11 + $0x254] sm:$0xf] }
 0x245   :  { %2547 = vmatpush.bf16.msrb.mxu1 %v5109_v36  ;;  %v5196_v36 = vld [vmem:[#allocation11 + $0x270] sm:$0xf] }
 0x246   :  { %v5197_v40 = vor.u32 %v6177_v28, %v5196_v36 }
 0x249   :  { %2548 = vmatpush.bf16.msrb.mxu1 %v5101_v62 }
 0x29f   :  { %v2038_v57 = vpop.f32.mrf.mxu0 }
 0x2a0   :  { %v2039_v51 = vadd.f32 %v2038_v57, %v562_v7  ;;  %v5105_v57 = vor.u32 %v6152_v41, %v5102_v55  ;;  %v6151_v7 = vld [vmem:[#allocation10 + $0x2a4] sm:$0xf0]  ;;  %v5262_v41 = vld [vmem:[#allocation11 + $0x2f8] sm:$0xf0] }
 0x2a1   :  { %v5093_v18 = vor.u32 %v6151_v7, %v5092_v4  ;;  %v5265_v2 = vor.u32 %v6192_v61, %v5262_v41  ;;  %v6191_v4 = vld [vmem:[#allocation11 + $0x2e4] sm:$0xf0] }
 0x2a2   :  { %2574 = vmatpush.bf16.msrb.mxu3 %v5105_v57  ;;  %v6173_v57 = vld [vmem:[#allocation11 + $0x254] sm:$0xf0] }
 0x2a3   :  { %2549 = vmatpush.bf16.msrb.mxu1 %v5093_v18  ;;  %v6190_v18 = vld [vmem:[#allocation11 + $0x2e4] sm:$0xf] }
 0x2a5   :  { %v2051_v37 = vpop.f32.mrf.mxu1  ;;  %v2064_v9 = vpop.f32.mrf.mxu2 }
 0x2a6   :  { %v2052_v10 = vadd.f32 %v2051_v37, %v2039_v51  ;;  %v2065_v14 = vadd.f32 %v2064_v9, %v563_v60  ;;  %v6150_v51 = vld [vmem:[#allocation10 + $0x2a4] sm:$0xf]  ;;  %v207_v9 = vperm.slane %v171_v49, 0  ;;  %v492_v60 = vperm.slane %v6829_v48, 3 }
 0x2a7   :  { %v2040_v11 = vpop.f32.mrf.mxu0  ;;  %v5097_v37 = vor.u32 %v6150_v51, %v5094_v17  ;;  %v6174_v49 = vld [vmem:[#allocation11 + $0x264] sm:$0xf]  ;;  %v247_v51 = vperm.slane %v6835_v59, 1  ;;  %v5253_v17 = vor.u32 %v6191_v4, %v5252_v1  ;;  %v5164_v1 = vld [vmem:[#allocation11 + $0x230] sm:$0xf] }
 0x2a8   :  { %v2081_v12 = vmul.f32 0.2, %v2052_v10  ;;  %v340_v11 = vperm.slane %v304_v6, 1  ;;  %v225_v46 = vmul.f32 %v207_v9, %v6711_v26  ;;  %v5190_v6 = vld [vmem:[#allocation11 + $0x268] sm:$0xf0]  ;;  %v528_v32 = vperm.slane %v492_v60, 3 }
 0x2a9   :  { %2575 = vmatpush.bf16.msrb.mxu3 %v5097_v37  ;;  %v5193_v62 = vor.u32 %v6174_v49, %v5190_v6  ;;  %v5254_v37 = vld [vmem:[#allocation11 + $0x2e8] sm:$0xf0]  ;;  %v6169_v4 = vld [vmem:[#allocation11 + $0x234] sm:$0xf0] }
 0x2aa   :  { %v2083_v13 = vmax.f32 %v2052_v10, %v2081_v12  ;;  %v246_v10 = vperm.slane %v6835_v59, 0  ;;  %v6838_v12 = vperm.slane %v398_v0, 2  ;;  %v5260_v0 = vld [vmem:[#allocation11 + $0x2f0] sm:$0xf]  ;;  %v358_v7 = vmul.f32 %v340_v11, %v6721_v42 }
 0x2ab   :  { %v2077_v15 = vpop.f32.mrf.mxu3  ;;  %v5261_v55 = vor.u32 %v6193_v54, %v5260_v0  ;;  %v5185_v11 = vor.u32 %v6172_v53, %v5182_v52 }
 0x2ac   :  { %v2085_v16 = vpack.c.bf16 %v2083_v13, %v2083_v13  ;;  %v2078_v19 = vadd.f32 %v2077_v15, %v2065_v14  ;;  %v6841_v13 = vperm.slane %v172_v56, 0  ;;  %v305_v14 = vperm.slane %v6829_v48, 5  ;;  %v5012_v15 = vld [vmem:[#allocation10 + $0x200] sm:$0xf] }
 0x2ad   :  { %v2053_v8 = vpop.f32.mrf.mxu1  ;;  %v2066_v21 = vpop.f32.mrf.mxu2  ;;  %2576 = vmatpush.bf16.msrb.mxu3 %v5089_v31  ;;  %v5189_v56 = vor.u32 %v6175_v45, %v5188_v44  ;;  %v282_v5 = vadd.f32 %v246_v10, %v225_v46  ;;  %v452_v27 = vmul.f32 %v6838_v12, %v6716_v30  ;;  %v529_v46 = vperm.slane %v493_v34, 3  ;;  %v6185_v34 = vld [vmem:[#allocation11 + $0x2b4] sm:$0xf0] }
 0x2ae   :  { %v2082_v22 = vmul.f32 0.2, %v2078_v19  ;;  %2288 = vmatmul.bf16.vlgmr.msra.gmra.mxu0 %v2085_v16  ;;  %2314 = vmatmul.bf16.vlgmr.msra.gmra.mxu2 %v2085_v16  ;;  %v6131_v16 = vld [vmem:[#allocation10 + $0x204] sm:$0xf0]  ;;  %v5014_v21 = vld [vmem:[#allocation10 + $0x208] sm:$0xf0]  ;;  %v226_v10 = vmul.f32 %v6841_v13, %v6711_v26 }
 0x2af   :  { %v5013_v8 = vor.u32 %v6131_v16, %v5012_v15  ;;  %v341_v9 = vperm.slane %v305_v14, 1  ;;  %v399_v15 = vperm.slane %v6829_v48, 6  ;;  %v5181_v16 = vor.u32 %v6173_v57, %v5180_v3  ;;  %v6170_v14 = vld [vmem:[#allocation11 + $0x244] sm:$0xf] }
 0x2b0   :  { %v2084_v23 = vmax.f32 %v2078_v19, %v2082_v22  ;;  %v6130_v19 = vld [vmem:[#allocation10 + $0x204] sm:$0xf]  ;;  %v5084_v22 = vld [vmem:[#allocation10 + $0x290] sm:$0xf]  ;;  %v376_v31 = vadd.f32 %v358_v7, %v282_v5  ;;  %v283_v36 = vadd.f32 %v247_v51, %v226_v10  ;;  %v5177_v12 = vor.u32 %v6170_v14, %v5174_v20  ;;  %v6168_v5 = vld [vmem:[#allocation11 + $0x234] sm:$0xf] }
 0x2b1   :  { %2538 = vmatpush.bf16.msrb.mxu0 %v5013_v8  ;;  %2577 = vmatpush.bf16.msrb.mxu3 %v5081_v63  ;;  %v5172_v8 = vld [vmem:[#allocation11 + $0x240] sm:$0xf]  ;;  %v359_v28 = vmul.f32 %v341_v9, %v6721_v42  ;;  %v435_v38 = vperm.slane %v399_v15, 2  ;;  %v547_v54 = vmul.f32 %v529_v46, %v6726_v58  ;;  %v6869_v7 = vld [vmem:[#allocation5 + $0x28] sm:$0xff]  ;;  %v5165_v51 = vor.u32 %v6169_v4, %v5164_v1  ;;  %v6186_v15 = vld [vmem:[#allocation11 + $0x2c4] sm:$0xf] }
 0x2b2   :  { %v2086_v24 = vpack.c.bf16 %v2084_v23, %v2084_v23  ;;  %v6149_v23 = vld [vmem:[#allocation10 + $0x294] sm:$0xf0]  ;;  %v470_v63 = vadd.f32 %v452_v27, %v376_v31  ;;  %v6166_v10 = vld [vmem:[#allocation11 + $0x224] sm:$0xf]  ;;  %v248_v14 = vperm.slane %v6835_v59, 2  ;;  %v400_v20 = vperm.slane %v6869_v7, 2 }
 0x2b3   :  { %v2079_v25 = vpop.f32.mrf.mxu3  ;;  %v377_v45 = vadd.f32 %v359_v28, %v283_v36  ;;  %v453_v48 = vmul.f32 %v435_v38, %v6716_v30  ;;  %v494_v31 = vperm.slane %v6869_v7, 3  ;;  %v5230_v28 = vld [vmem:[#allocation11 + $0x2b8] sm:$0xf0]  ;;  %v5148_v38 = vld [vmem:[#allocation11 + $0x210] sm:$0xf] }
 0x2b4   :  { %2301 = vmatmul.bf16.vlgmr.msra.gmra.mxu1 %v2086_v24  ;;  %2327 = vmatmul.bf16.vlgmr.msra.gmra.mxu3 %v2086_v24  ;;  %v5017_v24 = vor.u32 %v6130_v19, %v5014_v21  ;;  %v5085_v25 = vor.u32 %v6149_v23, %v5084_v22  ;;  %v5257_v19 = vor.u32 %v6190_v18, %v5254_v37  ;;  %v6171_v21 = vld [vmem:[#allocation11 + $0x244] sm:$0xf0]  ;;  %v5244_v22 = vld [vmem:[#allocation11 + $0x2d0] sm:$0xf]  ;;  %v6189_v23 = vld [vmem:[#allocation11 + $0x2d4] sm:$0xf0] }
 0x2b5   :  { %2782 = vmatpush.bf16.msra.mxu0 %v5197_v40  ;;  %2821 = vmatpush.bf16.msra.mxu3 %v5265_v2  ;;  %v5245_v33 = vor.u32 %v6189_v23, %v5244_v22  ;;  %v546_v40 = vmul.f32 %v528_v32, %v6726_v58  ;;  %v5236_v18 = vld [vmem:[#allocation11 + $0x2c0] sm:$0xf]  ;;  %v6187_v37 = vld [vmem:[#allocation11 + $0x2c4] sm:$0xf0]  ;;  %v174_v32 = vperm.slane %v6869_v7, 4 }
 0x2b6   :  { %2564 = vmatpush.bf16.msrb.mxu2 %v5017_v24  ;;  %2550 = vmatpush.bf16.msrb.mxu1 %v5085_v25  ;;  %v6188_v24 = vld [vmem:[#allocation11 + $0x2d4] sm:$0xf]  ;;  %v5237_v9 = vor.u32 %v6187_v37, %v5236_v18  ;;  %v6182_v46 = vld [vmem:[#allocation11 + $0x2a4] sm:$0xf]  ;;  %v5142_v1 = vld [vmem:[#allocation11 + $0x208] sm:$0xf0] }
 0x2b7   :  { %v5249_v13 = vor.u32 %v6188_v24, %v5246_v29  ;;  %v564_v49 = vadd.f32 %v546_v40, %v470_v63  ;;  %v173_v24 = vperm.slane %v6869_v7, 0  ;;  %v5212_v4 = vld [vmem:[#allocation11 + $0x290] sm:$0xf]  ;;  %v6180_v18 = vld [vmem:[#allocation11 + $0x294] sm:$0xf] }
 0x2b8   :  { %v5214_v37 = vld [vmem:[#allocation11 + $0x298] sm:$0xf0] }
 0x2b9   :  { %2783 = vmatpush.bf16.msra.mxu0 %v5189_v56  ;;  %2822 = vmatpush.bf16.msra.mxu3 %v5257_v19  ;;  %v471_v56 = vadd.f32 %v453_v48, %v377_v45  ;;  %v5156_v19 = vld [vmem:[#allocation11 + $0x220] sm:$0xf]  ;;  %v209_v27 = vperm.slane %v173_v24, 0  ;;  %v6183_v48 = vld [vmem:[#allocation11 + $0x2a4] sm:$0xf0] }
 0x2ba   :  { %2551 = vmatpush.bf16.msrb.mxu1 %v5077_v35  ;;  %2808 = vmatpush.bf16.msra.mxu2 %v5201_v47  ;;  %v5173_v35 = vor.u32 %v6171_v21, %v5172_v8  ;;  %v6167_v21 = vld [vmem:[#allocation11 + $0x224] sm:$0xf0] }
 0x2bb   :  { %v565_v3 = vadd.f32 %v547_v54, %v471_v56  ;;  %v5157_v22 = vor.u32 %v6167_v21, %v5156_v19  ;;  %v5206_v19 = vld [vmem:[#allocation11 + $0x288] sm:$0xf0] }
 0x2bd   :  { %2784 = vmatpush.bf16.msra.mxu0 %v5181_v16  ;;  %2823 = vmatpush.bf16.msra.mxu3 %v5249_v13  ;;  %v5238_v16 = vld [vmem:[#allocation11 + $0x2c8] sm:$0xf0]  ;;  %v5228_v13 = vld [vmem:[#allocation11 + $0x2b0] sm:$0xf] }
 0x2be   :  { %2795 = vmatpush.bf16.msra.mxu1 %v5261_v55  ;;  %2809 = vmatpush.bf16.msra.mxu2 %v5193_v62  ;;  %v5241_v8 = vor.u32 %v6186_v15, %v5238_v16  ;;  %v5229_v36 = vor.u32 %v6185_v34, %v5228_v13  ;;  %v6179_v15 = vld [vmem:[#allocation11 + $0x284] sm:$0xf0]  ;;  %v6178_v16 = vld [vmem:[#allocation11 + $0x284] sm:$0xf]  ;;  %v5318_v34 = vld [vmem:[#allocation10 + $0x368] sm:$0xf0] }
 0x2bf   :  { %v6206_v13 = vld [vmem:[#allocation10 + $0x364] sm:$0xf] }
 0x2c1   :  { %2785 = vmatpush.bf16.msra.mxu0 %v5173_v35  ;;  %2824 = vmatpush.bf16.msra.mxu3 %v5241_v8  ;;  %v6184_v35 = vld [vmem:[#allocation11 + $0x2b4] sm:$0xf] }
 0x2c2   :  { %2796 = vmatpush.bf16.msra.mxu1 %v5253_v17  ;;  %2810 = vmatpush.bf16.msra.mxu2 %v5185_v11  ;;  %v5166_v17 = vld [vmem:[#allocation11 + $0x238] sm:$0xf0]  ;;  %v5158_v11 = vld [vmem:[#allocation11 + $0x228] sm:$0xf0]  ;;  %v5233_v63 = vor.u32 %v6184_v35, %v5230_v28  ;;  %v6224_v28 = vld [vmem:[#allocation10 + $0x3f4] sm:$0xf] }
 0x2c3   :  { %v5161_v23 = vor.u32 %v6166_v10, %v5158_v11  ;;  %v5324_v10 = vld [vmem:[#allocation10 + $0x370] sm:$0xf]  ;;  %v6209_v11 = vld [vmem:[#allocation10 + $0x374] sm:$0xf0] }
 0x2c4   :  { %v5325_v24 = vor.u32 %v6209_v11, %v5324_v10 }
 0x2c5   :  { %2786 = vmatpush.bf16.msra.mxu0 %v5165_v51  ;;  %2825 = vmatpush.bf16.msra.mxu3 %v5233_v63  ;;  %v5321_v63 = vor.u32 %v6206_v13, %v5318_v34 }
 0x2c6   :  { %2797 = vmatpush.bf16.msra.mxu1 %v5245_v33  ;;  %2811 = vmatpush.bf16.msra.mxu2 %v5177_v12  ;;  %v307_v33 = vperm.slane %v6869_v7, 5  ;;  %v6165_v12 = vld [vmem:[#allocation11 + $0x214] sm:$0xf0] }
 0x2c7   :  { %v5149_v40 = vor.u32 %v6165_v12, %v5148_v38  ;;  %v5390_v38 = vld [vmem:[#allocation10 + $0x3f8] sm:$0xf0] }
 0x2c9   :  { %2787 = vmatpush.bf16.msra.mxu0 %v5157_v22  ;;  %v6208_v22 = vld [vmem:[#allocation10 + $0x374] sm:$0xf] }
 0x2ca   :  { %2798 = vmatpush.bf16.msra.mxu1 %v5237_v9  ;;  %v5217_v9 = vor.u32 %v6180_v18, %v5214_v37  ;;  %v6202_v18 = vld [vmem:[#allocation10 + $0x344] sm:$0xf]  ;;  %v5302_v37 = vld [vmem:[#allocation10 + $0x348] sm:$0xf0] }
 0x2cb   :  { %v5305_v10 = vor.u32 %v6202_v18, %v5302_v37  ;;  %v6216_v18 = vld [vmem:[#allocation10 + $0x3b4] sm:$0xf] }
 0x2cd   :  { %2788 = vmatpush.bf16.msra.mxu0 %v5149_v40 }
 0x2ce   :  { %2799 = vmatpush.bf16.msra.mxu1 %v5229_v36  ;;  %v6225_v36 = vld [vmem:[#allocation10 + $0x3f4] sm:$0xf0] }
 0x32b   :  { %v2289_v25 = vpop.f32.mrf.mxu0 }
 0x331   :  { %v2302_v60 = vpop.f32.mrf.mxu1  ;;  %v2315_v43 = vpop.f32.mrf.mxu2 }
 0x332   :  { %v2303_v44 = vadd.f32 %v2302_v60, %v2289_v25  ;;  %v306_v25 = vperm.slane %v6869_v7, 1  ;;  %v6164_v60 = vld [vmem:[#allocation11 + $0x214] sm:$0xf] }
 0x333   :  { %v2291_v47 = vpop.f32.mrf.mxu0 }
 0x334   :  { %v2332_v6 = vadd.f32 %v2303_v44, %v6794_v39  ;;  %v342_v29 = vperm.slane %v306_v25, 1  ;;  %v5220_v44 = vld [vmem:[#allocation11 + $0x2a0] sm:$0xf]  ;;  %v5222_v47 = vld [vmem:[#allocation11 + $0x2a8] sm:$0xf0] }
 0x335   :  { %v5221_v56 = vor.u32 %v6183_v48, %v5220_v44  ;;  %v5225_v54 = vor.u32 %v6182_v46, %v5222_v47  ;;  %v5326_v25 = vld [vmem:[#allocation10 + $0x378] sm:$0xf0]  ;;  %v6205_v44 = vld [vmem:[#allocation10 + $0x354] sm:$0xf0]  ;;  %v5380_v47 = vld [vmem:[#allocation10 + $0x3e0] sm:$0xf] }
 0x336   :  { %v6859_v0 = vadd.f32 %v2332_v6, %v564_v49  ;;  %v436_v49 = vperm.slane %v400_v20, 2  ;;  %v249_v6 = vperm.slane %v6835_v59, 3  ;;  %v360_v21 = vmul.f32 %v342_v29, %v6721_v42  ;;  %v6207_v20 = vld [vmem:[#allocation10 + $0x364] sm:$0xf0]  ;;  %v5310_v46 = vld [vmem:[#allocation10 + $0x358] sm:$0xf0] }
 0x337   :  { %v2328_v61 = vpop.f32.mrf.mxu3  ;;  %2800 = vmatpush.bf16.msra.mxu1 %v5221_v56  ;;  %2826 = vmatpush.bf16.msra.mxu3 %v5225_v54  ;;  %v6223_v56 = vld [vmem:[#allocation10 + $0x3e4] sm:$0xf0] }
 0x338   :  { %v2336_v41 = vpack.c.bf16 %v6859_v0, %v6859_v0  ;;  %v2329_v62 = vadd.f32 %v2328_v61, %v2315_v43  ;;  %v5150_v43 = vld [vmem:[#allocation11 + $0x218] sm:$0xf0]  ;;  %v6879_v61 = vperm.slane %v494_v31, 3  ;;  %v454_v29 = vmul.f32 %v436_v49, %v6716_v30 }
 0x339   :  { %v2304_v55 = vpop.f32.mrf.mxu1  ;;  %v2317_v2 = vpop.f32.mrf.mxu2  ;;  %v5153_v45 = vor.u32 %v6164_v60, %v5150_v43  ;;  %v5393_v60 = vor.u32 %v6224_v28, %v5390_v38  ;;  %v5308_v43 = vld [vmem:[#allocation10 + $0x350] sm:$0xf] }
 0x33a   :  { %v2333_v57 = vadd.f32 %v2329_v62, %v6800_v50  ;;  %2539 = vmatmul.bf16.vlgmr.msrb.gmra.mxu0 %v2336_v41  ;;  %2565 = vmatmul.bf16.vlgmr.msrb.gmra.mxu2 %v2336_v41  ;;  %v5169_v50 = vor.u32 %v6168_v5, %v5166_v17  ;;  %v210_v41 = vperm.slane %v174_v32, 0  ;;  %v343_v62 = vperm.slane %v307_v33, 1  ;;  %v6181_v5 = vld [vmem:[#allocation11 + $0x294] sm:$0xf0] }
 0x33b   :  { %v401_v55 = vperm.slane %v6869_v7, 6  ;;  %v227_v2 = vmul.f32 %v209_v27, %v6711_v26  ;;  %v5213_v17 = vor.u32 %v6181_v5, %v5212_v4  ;;  %v5316_v27 = vld [vmem:[#allocation10 + $0x360] sm:$0xf]  ;;  %2827 = vmatpush.bf16.msra.mxu3 %v5217_v9  ;;  %v5209_v32 = vor.u32 %v6178_v16, %v5206_v19 }
 0x33c   :  { %v6865_v53 = vadd.f32 %v2333_v57, %v565_v3  ;;  %2812 = vmatpush.bf16.msra.mxu2 %v5169_v50  ;;  %v5140_v3 = vld [vmem:[#allocation11 + $0x200] sm:$0xf]  ;;  %v6163_v57 = vld [vmem:[#allocation11 + $0x204] sm:$0xf0]  ;;  %v228_v31 = vmul.f32 %v210_v41, %v6711_v26  ;;  %v5329_v33 = vor.u32 %v6208_v22, %v5326_v25  ;;  %v5317_v35 = vor.u32 %v6207_v20, %v5316_v27 }
 0x33d   :  { %v5204_v50 = vld [vmem:[#allocation11 + $0x280] sm:$0xf]  ;;  %v284_v8 = vadd.f32 %v248_v14, %v227_v2  ;;  %2801 = vmatpush.bf16.msra.mxu1 %v5213_v17  ;;  %v5388_v14 = vld [vmem:[#allocation10 + $0x3f0] sm:$0xf]  ;;  %v361_v48 = vmul.f32 %v343_v62, %v6721_v42  ;;  %v437_v54 = vperm.slane %v401_v55, 2  ;;  %v495_v41 = vperm.slane %v6869_v7, 7 }
 0x33e   :  { %v2337_v39 = vpack.c.bf16 %v6865_v53, %v6865_v53  ;;  %v5389_v40 = vor.u32 %v6225_v36, %v5388_v14  ;;  %v285_v49 = vadd.f32 %v249_v6, %v228_v31  ;;  %v5381_v2 = vor.u32 %v6223_v56, %v5380_v47  ;;  %v5300_v62 = vld [vmem:[#allocation10 + $0x340] sm:$0xf]  ;;  %v5372_v55 = vld [vmem:[#allocation10 + $0x3d0] sm:$0xf]  ;;  %v6220_v7 = vld [vmem:[#allocation10 + $0x3d4] sm:$0xf] }
 0x33f   :  { %v2330_v52 = vpop.f32.mrf.mxu3  ;;  %v378_v12 = vadd.f32 %v360_v21, %v284_v8  ;;  %2828 = vmatpush.bf16.msra.mxu3 %v5209_v32  ;;  %v548_v5 = vmul.f32 %v6879_v61, %v6726_v58  ;;  %v531_v16 = vperm.slane %v495_v41, 3  ;;  %v5284_v41 = vld [vmem:[#allocation10 + $0x320] sm:$0xf] }
 0x340   :  { %2552 = vmatmul.bf16.vlgmr.msrb.gmra.mxu1 %v2337_v39  ;;  %2578 = vmatmul.bf16.vlgmr.msrb.gmra.mxu3 %v2337_v39  ;;  %v6162_v39 = vld [vmem:[#allocation11 + $0x204] sm:$0xf]  ;;  %v5141_v52 = vor.u32 %v6163_v57, %v5140_v3  ;;  %v5382_v57 = vld [vmem:[#allocation10 + $0x3e8] sm:$0xf0]  ;;  %v379_v9 = vadd.f32 %v361_v48, %v285_v49  ;;  %v5364_v48 = vld [vmem:[#allocation10 + $0x3c0] sm:$0xf] }
 0x341   :  { %2813 = vmatpush.bf16.msra.mxu2 %v5161_v23  ;;  %v5145_v51 = vor.u32 %v6162_v39, %v5142_v1  ;;  %v5205_v23 = vor.u32 %v6179_v15, %v5204_v50  ;;  %v6222_v3 = vld [vmem:[#allocation10 + $0x3e4] sm:$0xf]  ;;  %v5309_v39 = vor.u32 %v6205_v44, %v5308_v43  ;;  %v6203_v1 = vld [vmem:[#allocation10 + $0x344] sm:$0xf0]  ;;  %v472_v4 = vadd.f32 %v454_v29, %v378_v12  ;;  %v5374_v50 = vld [vmem:[#allocation10 + $0x3d8] sm:$0xf0] }
 0x342   :  { %2789 = vmatpush.bf16.msra.mxu0 %v5141_v52  ;;  %v5385_v52 = vor.u32 %v6222_v3, %v5382_v57  ;;  %v455_v15 = vmul.f32 %v437_v54, %v6716_v30  ;;  %v5301_v8 = vor.u32 %v6203_v1, %v5300_v62  ;;  %v5377_v21 = vor.u32 %v6220_v7, %v5374_v50  ;;  %v6200_v43 = vld [vmem:[#allocation10 + $0x334] sm:$0xf]  ;;  %v6218_v49 = vld [vmem:[#allocation10 + $0x3c4] sm:$0xf]  ;;  %v5366_v54 = vld [vmem:[#allocation10 + $0x3c8] sm:$0xf0] }
 0x343   :  { %2802 = vmatpush.bf16.msra.mxu1 %v5205_v23  ;;  %3072 = vmatpush.bf16.msrb.mxu3 %v5393_v60  ;;  %v566_v61 = vadd.f32 %v548_v5, %v472_v4  ;;  %v549_v23 = vmul.f32 %v531_v16, %v6726_v58  ;;  %v6201_v60 = vld [vmem:[#allocation10 + $0x334] sm:$0xf0]  ;;  %v6199_v3 = vld [vmem:[#allocation10 + $0x324] sm:$0xf0]  ;;  %v6198_v57 = vld [vmem:[#allocation10 + $0x324] sm:$0xf] }
 0x344   :  { %v473_v22 = vadd.f32 %v455_v15, %v379_v9  ;;  %v6894_v1 = vld [vmem:[#allocation5 + $0x30] sm:$0xff]  ;;  %v250_v5 = vperm.slane %v6835_v59, 4  ;;  %v5356_v7 = vld [vmem:[#allocation10 + $0x3b0] sm:$0xf] }
 0x345   :  { %2814 = vmatpush.bf16.msra.mxu2 %v5153_v45  ;;  %v6204_v45 = vld [vmem:[#allocation10 + $0x354] sm:$0xf]  ;;  %v175_v4 = vperm.slane %v6894_v1, 0  ;;  %v5358_v50 = vld [vmem:[#allocation10 + $0x3b8] sm:$0xf0] }
 0x346   :  { %3033 = vmatpush.bf16.msrb.mxu0 %v5325_v24  ;;  %v5313_v6 = vor.u32 %v6204_v45, %v5310_v46  ;;  %v567_v32 = vadd.f32 %v549_v23, %v473_v22  ;;  %v5294_v45 = vld [vmem:[#allocation10 + $0x338] sm:$0xf0]  ;;  %v6219_v46 = vld [vmem:[#allocation10 + $0x3c4] sm:$0xf0]  ;;  %v5276_v9 = vld [vmem:[#allocation10 + $0x310] sm:$0xf]  ;;  %v5361_v16 = vor.u32 %v6216_v18, %v5358_v50 }
 0x347   :  { %3046 = vmatpush.bf16.msrb.mxu1 %v5389_v40  ;;  %3073 = vmatpush.bf16.msrb.mxu3 %v5385_v52  ;;  %v5292_v40 = vld [vmem:[#allocation10 + $0x330] sm:$0xf]  ;;  %v5297_v47 = vor.u32 %v6200_v43, %v5294_v45  ;;  %v5365_v56 = vor.u32 %v6219_v46, %v5364_v48  ;;  %v5285_v52 = vor.u32 %v6199_v3, %v5284_v41  ;;  %v6197_v15 = vld [vmem:[#allocation10 + $0x314] sm:$0xf0]  ;;  %v6214_v22 = vld [vmem:[#allocation10 + $0x3a4] sm:$0xf] }
 0x348   :  { %v5293_v44 = vor.u32 %v6201_v60, %v5292_v40  ;;  %v5350_v23 = vld [vmem:[#allocation10 + $0x3a8] sm:$0xf0]  ;;  %v6212_v40 = vld [vmem:[#allocation10 + $0x394] sm:$0xf]  ;;  %v5342_v60 = vld [vmem:[#allocation10 + $0x398] sm:$0xf0] }
 0x349   :  { %2815 = vmatpush.bf16.msra.mxu2 %v5145_v51  ;;  %v6221_v51 = vld [vmem:[#allocation10 + $0x3d4] sm:$0xf0]  ;;  %v5332_v43 = vld [vmem:[#allocation10 + $0x380] sm:$0xf]  ;;  %v6211_v45 = vld [vmem:[#allocation10 + $0x384] sm:$0xf0] }
 0x34a   :  { %3034 = vmatpush.bf16.msrb.mxu0 %v5317_v35  ;;  %v5373_v19 = vor.u32 %v6221_v51, %v5372_v55  ;;  %v402_v55 = vperm.slane %v6894_v1, 2  ;;  %v176_v51 = vperm.slane %v6894_v1, 4  ;;  %v6210_v48 = vld [vmem:[#allocation10 + $0x384] sm:$0xf]  ;;  %v5334_v46 = vld [vmem:[#allocation10 + $0x388] sm:$0xf0] }
 0x34b   :  { %3047 = vmatpush.bf16.msrb.mxu1 %v5381_v2  ;;  %3074 = vmatpush.bf16.msrb.mxu3 %v5377_v21  ;;  %v5369_v2 = vor.u32 %v6218_v49, %v5366_v54  ;;  %v5278_v21 = vld [vmem:[#allocation10 + $0x318] sm:$0xf0]  ;;  %v6240_v49 = vld [vmem:[#allocation11 + $0x374] sm:$0xf]  ;;  %v5333_v54 = vor.u32 %v6211_v45, %v5332_v43  ;;  %v5444_v3 = vld [vmem:[#allocation11 + $0x360] sm:$0xf] }
 0x34c   :  { %v5518_v18 = vld [vmem:[#allocation11 + $0x3f8] sm:$0xf0] }
 0x34d   :  { %3059 = vmatpush.bf16.msrb.mxu2 %v5329_v33 }
 0x34e   :  { %3035 = vmatpush.bf16.msrb.mxu0 %v5309_v39  ;;  %v5286_v39 = vld [vmem:[#allocation10 + $0x328] sm:$0xf0] }
 0x34f   :  { %3048 = vmatpush.bf16.msrb.mxu1 %v5373_v19  ;;  %v5289_v62 = vor.u32 %v6198_v57, %v5286_v39  ;;  %3075 = vmatpush.bf16.msrb.mxu3 %v5369_v2  ;;  %v5277_v19 = vor.u32 %v6197_v15, %v5276_v9  ;;  %v5454_v2 = vld [vmem:[#allocation11 + $0x378] sm:$0xf0]  ;;  %v6239_v57 = vld [vmem:[#allocation11 + $0x364] sm:$0xf0]  ;;  %v5436_v15 = vld [vmem:[#allocation11 + $0x350] sm:$0xf] }
 0x351   :  { %3060 = vmatpush.bf16.msrb.mxu2 %v5321_v63 }
 0x352   :  { %3036 = vmatpush.bf16.msrb.mxu0 %v5301_v8  ;;  %v6196_v8 = vld [vmem:[#allocation10 + $0x314] sm:$0xf] }
 0x353   :  { %3049 = vmatpush.bf16.msrb.mxu1 %v5365_v56  ;;  %3076 = vmatpush.bf16.msrb.mxu3 %v5361_v16  ;;  %v6241_v56 = vld [vmem:[#allocation11 + $0x374] sm:$0xf0] }
 0x354   :  { %v6237_v16 = vld [vmem:[#allocation11 + $0x354] sm:$0xf0] }
 0x355   :  { %3061 = vmatpush.bf16.msrb.mxu2 %v5313_v6  ;;  %v308_v6 = vperm.slane %v6894_v1, 1 }
 0x356   :  { %3037 = vmatpush.bf16.msrb.mxu0 %v5293_v44  ;;  %v5345_v44 = vor.u32 %v6212_v40, %v5342_v60  ;;  %v5430_v40 = vld [vmem:[#allocation11 + $0x348] sm:$0xf0] }
 0x359   :  { %3062 = vmatpush.bf16.msrb.mxu2 %v5305_v10  ;;  %v5281_v10 = vor.u32 %v6196_v8, %v5278_v21  ;;  %v5438_v8 = vld [vmem:[#allocation11 + $0x358] sm:$0xf0]  ;;  %v5508_v21 = vld [vmem:[#allocation11 + $0x3e0] sm:$0xf] }
 0x35a   :  { %3038 = vmatpush.bf16.msrb.mxu0 %v5285_v52  ;;  %v5337_v52 = vor.u32 %v6210_v48, %v5334_v46 }
 0x35d   :  { %3063 = vmatpush.bf16.msrb.mxu2 %v5297_v47  ;;  %v5452_v47 = vld [vmem:[#allocation11 + $0x370] sm:$0xf] }
 0x35e   :  { %3039 = vmatpush.bf16.msrb.mxu0 %v5277_v19  ;;  %v5453_v41 = vor.u32 %v6241_v56, %v5452_v47  ;;  %v6236_v19 = vld [vmem:[#allocation11 + $0x354] sm:$0xf] }
 0x361   :  { %3064 = vmatpush.bf16.msrb.mxu2 %v5289_v62  ;;  %v5457_v62 = vor.u32 %v6240_v49, %v5454_v2 }
 0x365   :  { %3065 = vmatpush.bf16.msrb.mxu2 %v5281_v10 }
 0x3b7   :  { %v2540_v17 = vpop.f32.mrf.mxu0 }
 0x3b8   :  { %v2541_v11 = vadd.f32 %v2540_v17, %v566_v61  ;;  %v6217_v17 = vld [vmem:[#allocation10 + $0x3b4] sm:$0xf0]  ;;  %v5348_v61 = vld [vmem:[#allocation10 + $0x3a0] sm:$0xf] }
 0x3b9   :  { %v5357_v37 = vor.u32 %v6217_v17, %v5356_v7  ;;  %v6257_v7 = vld [vmem:[#allocation11 + $0x3f4] sm:$0xf0]  ;;  %v6256_v17 = vld [vmem:[#allocation11 + $0x3f4] sm:$0xf] }
 0x3ba   :  { %v5521_v9 = vor.u32 %v6256_v17, %v5518_v18 }
 0x3bb   :  { %3050 = vmatpush.bf16.msrb.mxu1 %v5357_v37 }
 0x3bd   :  { %v2553_v24 = vpop.f32.mrf.mxu1  ;;  %v2566_v25 = vpop.f32.mrf.mxu2 }
 0x3be   :  { %v2554_v27 = vadd.f32 %v2553_v24, %v2541_v11  ;;  %v2567_v13 = vadd.f32 %v2566_v25, %v567_v32  ;;  %v6215_v11 = vld [vmem:[#allocation10 + $0x3a4] sm:$0xf0]  ;;  %v211_v24 = vperm.slane %v175_v4, 0  ;;  %v496_v25 = vperm.slane %v6894_v1, 3  ;;  %v6238_v4 = vld [vmem:[#allocation11 + $0x364] sm:$0xf] }
 0x3bf   :  { %v2542_v20 = vpop.f32.mrf.mxu0  ;;  %v6902_v32 = vperm.slane %v402_v55, 2  ;;  %v5516_v55 = vld [vmem:[#allocation11 + $0x3f0] sm:$0xf] }
 0x3c0   :  { %v2583_v31 = vmul.f32 0.2, %v2554_v27  ;;  %v5353_v20 = vor.u32 %v6214_v22, %v5350_v23  ;;  %v229_v39 = vmul.f32 %v211_v24, %v6711_v26  ;;  %v5517_v50 = vor.u32 %v6257_v7, %v5516_v55  ;;  %v6254_v24 = vld [vmem:[#allocation11 + $0x3e4] sm:$0xf] }
 0x3c1   :  { %v251_v22 = vperm.slane %v6835_v59, 5  ;;  %v5500_v59 = vld [vmem:[#allocation11 + $0x3d0] sm:$0xf]  ;;  %v456_v43 = vmul.f32 %v6902_v32, %v6716_v30 }
 0x3c2   :  { %v2585_v33 = vmax.f32 %v2554_v27, %v2583_v31  ;;  %v5349_v27 = vor.u32 %v6215_v11, %v5348_v61  ;;  %v344_v31 = vperm.slane %v308_v6, 1  ;;  %3077 = vmatpush.bf16.msrb.mxu3 %v5353_v20  ;;  %v5446_v6 = vld [vmem:[#allocation11 + $0x368] sm:$0xf0]  ;;  %v6255_v61 = vld [vmem:[#allocation11 + $0x3e4] sm:$0xf0]  ;;  %v286_v10 = vadd.f32 %v250_v5, %v229_v39 }
 0x3c3   :  { %v2579_v34 = vpop.f32.mrf.mxu3  ;;  %v5449_v37 = vor.u32 %v6238_v4, %v5446_v6  ;;  %v5509_v23 = vor.u32 %v6255_v61, %v5508_v21  ;;  %v6233_v21 = vld [vmem:[#allocation11 + $0x334] sm:$0xf0]  ;;  %v6232_v61 = vld [vmem:[#allocation11 + $0x334] sm:$0xf] }
 0x3c4   :  { %v2587_v14 = vpack.c.bf16 %v2585_v33, %v2585_v33  ;;  %v2580_v29 = vadd.f32 %v2579_v34, %v2567_v13  ;;  %v6904_v33 = vperm.slane %v176_v51, 0  ;;  %v309_v13 = vperm.slane %v6894_v1, 5  ;;  %v5268_v34 = vld [vmem:[#allocation10 + $0x300] sm:$0xf]  ;;  %3051 = vmatpush.bf16.msrb.mxu1 %v5349_v27  ;;  %v5510_v27 = vld [vmem:[#allocation11 + $0x3e8] sm:$0xf0] }
 0x3c5   :  { %v2555_v35 = vpop.f32.mrf.mxu1  ;;  %v2568_v36 = vpop.f32.mrf.mxu2  ;;  %v5445_v51 = vor.u32 %v6239_v57, %v5444_v3  ;;  %v362_v11 = vmul.f32 %v344_v31, %v6721_v42  ;;  %v5441_v31 = vor.u32 %v6236_v19, %v5438_v8  ;;  %v5420_v8 = vld [vmem:[#allocation11 + $0x330] sm:$0xf] }
 0x3c6   :  { %v2584_v28 = vmul.f32 0.2, %v2580_v29  ;;  %2790 = vmatmul.bf16.vlgmr.msra.gmra.mxu0 %v2587_v14  ;;  %2816 = vmatmul.bf16.vlgmr.msra.gmra.mxu2 %v2587_v14  ;;  %v6195_v14 = vld [vmem:[#allocation10 + $0x304] sm:$0xf0]  ;;  %v5270_v36 = vld [vmem:[#allocation10 + $0x308] sm:$0xf0]  ;;  %v230_v5 = vmul.f32 %v6904_v33, %v6711_v26 }
 0x3c7   :  { %v5269_v35 = vor.u32 %v6195_v14, %v5268_v34  ;;  %3078 = vmatpush.bf16.msrb.mxu3 %v5345_v44  ;;  %v345_v20 = vperm.slane %v309_v13, 1  ;;  %v403_v34 = vperm.slane %v6894_v1, 6  ;;  %v5437_v14 = vor.u32 %v6237_v16, %v5436_v15  ;;  %v5502_v13 = vld [vmem:[#allocation11 + $0x3d8] sm:$0xf0] }
 0x3c8   :  { %v2586_v38 = vmax.f32 %v2580_v29, %v2584_v28  ;;  %v6194_v29 = vld [vmem:[#allocation10 + $0x304] sm:$0xf]  ;;  %v5340_v28 = vld [vmem:[#allocation10 + $0x390] sm:$0xf]  ;;  %v380_v60 = vadd.f32 %v362_v11, %v286_v10  ;;  %v532_v44 = vperm.slane %v496_v25, 3  ;;  %v497_v33 = vperm.slane %v6894_v1, 7 }
 0x3c9   :  { %3040 = vmatpush.bf16.msrb.mxu0 %v5269_v35  ;;  %v5428_v35 = vld [vmem:[#allocation11 + $0x340] sm:$0xf]  ;;  %v287_v47 = vadd.f32 %v251_v22, %v230_v5  ;;  %v363_v56 = vmul.f32 %v345_v20, %v6721_v42  ;;  %v439_v49 = vperm.slane %v403_v34, 2  ;;  %v5421_v11 = vor.u32 %v6233_v21, %v5420_v8  ;;  %v5422_v22 = vld [vmem:[#allocation11 + $0x338] sm:$0xf0] }
 0x3ca   :  { %v2588_v12 = vpack.c.bf16 %v2586_v38, %v2586_v38  ;;  %v6213_v38 = vld [vmem:[#allocation10 + $0x394] sm:$0xf0]  ;;  %v550_v32 = vmul.f32 %v532_v44, %v6726_v58  ;;  %v533_v39 = vperm.slane %v497_v33, 3  ;;  %v6934_v10 = vld [vmem:[#allocation5 + $0x38] sm:$0xff]  ;;  %v5494_v34 = vld [vmem:[#allocation11 + $0x3c8] sm:$0xf0] }
 0x3cb   :  { %v2581_v63 = vpop.f32.mrf.mxu3  ;;  %3079 = vmatpush.bf16.msrb.mxu3 %v5337_v52  ;;  %v381_v1 = vadd.f32 %v363_v56, %v287_v47  ;;  %v457_v57 = vmul.f32 %v439_v49, %v6716_v30  ;;  %v6250_v20 = vld [vmem:[#allocation11 + $0x3c4] sm:$0xf]  ;;  %v5414_v5 = vld [vmem:[#allocation11 + $0x328] sm:$0xf0]  ;;  %v178_v44 = vperm.slane %v6934_v10, 4  ;;  %v311_v33 = vperm.slane %v6934_v10, 5 }
 0x3cc   :  { %2803 = vmatmul.bf16.vlgmr.msra.gmra.mxu1 %v2588_v12  ;;  %2829 = vmatmul.bf16.vlgmr.msra.gmra.mxu3 %v2588_v12  ;;  %v5273_v12 = vor.u32 %v6194_v29, %v5270_v36  ;;  %v5341_v63 = vor.u32 %v6213_v38, %v5340_v28  ;;  %v5513_v29 = vor.u32 %v6254_v24, %v5510_v27  ;;  %v6235_v36 = vld [vmem:[#allocation11 + $0x344] sm:$0xf0]  ;;  %v6253_v28 = vld [vmem:[#allocation11 + $0x3d4] sm:$0xf0]  ;;  %v6252_v38 = vld [vmem:[#allocation11 + $0x3d4] sm:$0xf] }
 0x3cd   :  { %3284 = vmatpush.bf16.msra.mxu0 %v5453_v41  ;;  %v5501_v45 = vor.u32 %v6253_v28, %v5500_v59  ;;  %v5429_v48 = vor.u32 %v6235_v36, %v5428_v35  ;;  %v5505_v46 = vor.u32 %v6252_v38, %v5502_v13  ;;  %v474_v41 = vadd.f32 %v456_v43, %v380_v60  ;;  %v6251_v24 = vld [vmem:[#allocation11 + $0x3c4] sm:$0xf0]  ;;  %v6230_v36 = vld [vmem:[#allocation11 + $0x324] sm:$0xf]  ;;  %v6248_v47 = vld [vmem:[#allocation11 + $0x3b4] sm:$0xf] }
 0x3ce   :  { %3066 = vmatpush.bf16.msrb.mxu2 %v5273_v12  ;;  %3052 = vmatpush.bf16.msrb.mxu1 %v5341_v63  ;;  %v6234_v63 = vld [vmem:[#allocation11 + $0x344] sm:$0xf]  ;;  %v475_v55 = vadd.f32 %v457_v57, %v381_v1  ;;  %v6231_v35 = vld [vmem:[#allocation11 + $0x324] sm:$0xf0]  ;;  %v5417_v59 = vor.u32 %v6230_v36, %v5414_v5  ;;  %v177_v28 = vperm.slane %v6934_v10, 0  ;;  %v310_v38 = vperm.slane %v6934_v10, 1 }
 0x3cf   :  { %3323 = vmatpush.bf16.msra.mxu3 %v5521_v9  ;;  %v404_v60 = vperm.slane %v6934_v10, 2  ;;  %v498_v43 = vperm.slane %v6934_v10, 3  ;;  %v5486_v49 = vld [vmem:[#allocation11 + $0x3b8] sm:$0xf0]  ;;  %v5476_v1 = vld [vmem:[#allocation11 + $0x3a0] sm:$0xf] }
 0x3d0   :  { %v346_v13 = vperm.slane %v310_v38, 1  ;;  %v5398_v21 = vld [vmem:[#allocation11 + $0x308] sm:$0xf0]  ;;  %v5692_v5 = vld [vmem:[#allocation13 + $0x150] sm:$0xf] }
 0x3d1   :  { %3285 = vmatpush.bf16.msra.mxu0 %v5445_v51  ;;  %v551_v51 = vmul.f32 %v533_v39, %v6726_v58  ;;  %v5462_v36 = vld [vmem:[#allocation11 + $0x388] sm:$0xf0] }
 0x3d2   :  { %3310 = vmatpush.bf16.msra.mxu2 %v5457_v62  ;;  %3053 = vmatpush.bf16.msrb.mxu1 %v5333_v54  ;;  %v5433_v54 = vor.u32 %v6234_v63, %v5430_v40  ;;  %v568_v62 = vadd.f32 %v550_v32, %v474_v41  ;;  %v6938_v63 = vld [vmem:[#allocation7 + $0x8] sm:$0xff]  ;;  %v5489_v32 = vor.u32 %v6248_v47, %v5486_v49  ;;  %v6351_v49 = vld [vmem:[#allocation13 + $0x2e4] sm:$0xf0] }
 0x3d3   :  { %3324 = vmatpush.bf16.msra.mxu3 %v5513_v29  ;;  %v569_v9 = vadd.f32 %v551_v51, %v475_v55  ;;  %v5497_v29 = vor.u32 %v6250_v20, %v5494_v34  ;;  %v252_v40 = vperm.slane %v6938_v63, 6  ;;  %v6229_v41 = vld [vmem:[#allocation11 + $0x314] sm:$0xf0]  ;;  %v440_v55 = vperm.slane %v404_v60, 2  ;;  %v5668_v60 = vld [vmem:[#allocation13 + $0x120] sm:$0xf] }
 0x3d4   :  { %v6947_v51 = vperm.slane %v498_v43, 3  ;;  %v364_v34 = vmul.f32 %v346_v13, %v6721_v42  ;;  %v6297_v43 = vld [vmem:[#allocation13 + $0x134] sm:$0xf0] }
 0x3d5   :  { %3286 = vmatpush.bf16.msra.mxu0 %v5437_v14  ;;  %v5412_v14 = vld [vmem:[#allocation11 + $0x320] sm:$0xf] }
 0x3d6   :  { %3297 = vmatpush.bf16.msra.mxu1 %v5517_v50  ;;  %3311 = vmatpush.bf16.msra.mxu2 %v5449_v37 }
 0x3d7   :  { %3325 = vmatpush.bf16.msra.mxu3 %v5505_v46  ;;  %v6249_v46 = vld [vmem:[#allocation11 + $0x3b4] sm:$0xf0] }
 0x3d9   :  { %3287 = vmatpush.bf16.msra.mxu0 %v5429_v48  ;;  %v5484_v48 = vld [vmem:[#allocation11 + $0x3b0] sm:$0xf] }
 0x3da   :  { %3298 = vmatpush.bf16.msra.mxu1 %v5509_v23  ;;  %3312 = vmatpush.bf16.msra.mxu2 %v5441_v31  ;;  %v5492_v23 = vld [vmem:[#allocation11 + $0x3c0] sm:$0xf]  ;;  %v5413_v31 = vor.u32 %v6231_v35, %v5412_v14  ;;  %v5485_v56 = vor.u32 %v6249_v46, %v5484_v48  ;;  %v6242_v35 = vld [vmem:[#allocation11 + $0x384] sm:$0xf]  ;;  %v5670_v48 = vld [vmem:[#allocation13 + $0x138] sm:$0xf0] }
 0x3db   :  { %v5493_v27 = vor.u32 %v6251_v24, %v5492_v23  ;;  %3326 = vmatpush.bf16.msra.mxu3 %v5497_v29  ;;  %v6244_v24 = vld [vmem:[#allocation11 + $0x394] sm:$0xf]  ;;  %v6243_v29 = vld [vmem:[#allocation11 + $0x384] sm:$0xf0]  ;;  %v5884_v46 = vld [vmem:[#allocation13 + $0x2d0] sm:$0xf] }
 0x3dd   :  { %3288 = vmatpush.bf16.msra.mxu0 %v5421_v11  ;;  %v6245_v11 = vld [vmem:[#allocation11 + $0x394] sm:$0xf0] }
 0x3de   :  { %3299 = vmatpush.bf16.msra.mxu1 %v5501_v45  ;;  %3313 = vmatpush.bf16.msra.mxu2 %v5433_v54  ;;  %v253_v45 = vperm.slane %v6938_v63, 7  ;;  %v5404_v54 = vld [vmem:[#allocation11 + $0x310] sm:$0xf] }
 0x3df   :  { %3327 = vmatpush.bf16.msra.mxu3 %v5489_v32  ;;  %v458_v32 = vmul.f32 %v440_v55, %v6716_v30 }
 0x3e1   :  { %3289 = vmatpush.bf16.msra.mxu0 %v5413_v31  ;;  %v6303_v31 = vld [vmem:[#allocation13 + $0x164] sm:$0xf0] }
 0x3e2   :  { %3300 = vmatpush.bf16.msra.mxu1 %v5493_v27  ;;  %v5460_v27 = vld [vmem:[#allocation11 + $0x380] sm:$0xf]  ;;  %v5693_v38 = vor.u32 %v6303_v31, %v5692_v5  ;;  %v6333_v31 = vld [vmem:[#allocation13 + $0x254] sm:$0xf0] }
 0x3e3   :  { %v5812_v5 = vld [vmem:[#allocation13 + $0x240] sm:$0xf] }
 0x3e6   :  { %3301 = vmatpush.bf16.msra.mxu1 %v5485_v56  ;;  %v5669_v56 = vor.u32 %v6297_v43, %v5668_v60  ;;  %v5814_v60 = vld [vmem:[#allocation13 + $0x258] sm:$0xf0]  ;;  %v6276_v43 = vld [vmem:[#allocation13 + $0x94] sm:$0xf] }
 0x443   :  { %v2791_v12 = vpop.f32.mrf.mxu0 }
 0x449   :  { %v2804_v2 = vpop.f32.mrf.mxu1  ;;  %v2817_v25 = vpop.f32.mrf.mxu2 }
 0x44a   :  { %v2805_v3 = vadd.f32 %v2804_v2, %v2791_v12  ;;  %v213_v12 = vperm.slane %v177_v28, 0  ;;  %v5405_v2 = vor.u32 %v6229_v41, %v5404_v54  ;;  %v5461_v28 = vor.u32 %v6243_v29, %v5460_v27  ;;  %v6348_v54 = vld [vmem:[#allocation13 + $0x2d4] sm:$0xf]  ;;  %v5886_v41 = vld [vmem:[#allocation13 + $0x2e8] sm:$0xf0] }
 0x44b   :  { %v2793_v52 = vpop.f32.mrf.mxu0  ;;  %v5838_v27 = vld [vmem:[#allocation13 + $0x288] sm:$0xf0] }
 0x44c   :  { %v2834_v4 = vadd.f32 %v2805_v3, %v6859_v0  ;;  %v5406_v3 = vld [vmem:[#allocation11 + $0x318] sm:$0xf0]  ;;  %v231_v57 = vmul.f32 %v213_v12, %v6711_v26  ;;  %v6247_v52 = vld [vmem:[#allocation11 + $0x3a4] sm:$0xf0]  ;;  %3290 = vmatpush.bf16.msra.mxu0 %v5405_v2  ;;  %v5694_v12 = vld [vmem:[#allocation13 + $0x168] sm:$0xf0] }
 0x44e   :  { %v6924_v6 = vadd.f32 %v2834_v4, %v568_v62  ;;  %v6246_v62 = vld [vmem:[#allocation11 + $0x3a4] sm:$0xf]  ;;  %v5478_v4 = vld [vmem:[#allocation11 + $0x3a8] sm:$0xf0]  ;;  %v288_v20 = vadd.f32 %v252_v40, %v231_v57  ;;  %v5465_v40 = vor.u32 %v6242_v35, %v5462_v36  ;;  %v6291_v57 = vld [vmem:[#allocation13 + $0x104] sm:$0xf0] }
 0x44f   :  { %v2830_v7 = vpop.f32.mrf.mxu3  ;;  %v5596_v36 = vld [vmem:[#allocation13 + $0x90] sm:$0xf] }
 0x450   :  { %v2838_v17 = vpack.c.bf16 %v6924_v6, %v6924_v6  ;;  %v2831_v18 = vadd.f32 %v2830_v7, %v2817_v25  ;;  %v6228_v25 = vld [vmem:[#allocation11 + $0x314] sm:$0xf]  ;;  %v5477_v7 = vor.u32 %v6247_v52, %v5476_v1  ;;  %v382_v47 = vadd.f32 %v364_v34, %v288_v20  ;;  %v5644_v1 = vld [vmem:[#allocation13 + $0xf0] sm:$0xf]  ;;  %v5646_v52 = vld [vmem:[#allocation13 + $0x108] sm:$0xf0] }
 0x451   :  { %v2806_v37 = vpop.f32.mrf.mxu1  ;;  %v2819_v50 = vpop.f32.mrf.mxu2  ;;  %v5409_v39 = vor.u32 %v6228_v25, %v5406_v3  ;;  %v5885_v25 = vor.u32 %v6351_v49, %v5884_v46  ;;  %v5889_v3 = vor.u32 %v6348_v54, %v5886_v41  ;;  %v5788_v49 = vld [vmem:[#allocation13 + $0x210] sm:$0xf]  ;;  %v6327_v54 = vld [vmem:[#allocation13 + $0x224] sm:$0xf0] }
 0x452   :  { %v2835_v15 = vadd.f32 %v2831_v18, %v6865_v53  ;;  %3041 = vmatmul.bf16.vlgmr.msrb.gmra.mxu0 %v2838_v17  ;;  %3067 = vmatmul.bf16.vlgmr.msrb.gmra.mxu2 %v2838_v17  ;;  %v5425_v53 = vor.u32 %v6232_v61, %v5422_v22  ;;  %v5481_v17 = vor.u32 %v6246_v62, %v5478_v4  ;;  %v214_v18 = vperm.slane %v178_v44, 0  ;;  %v5468_v61 = vld [vmem:[#allocation11 + $0x390] sm:$0xf]  ;;  %v5860_v62 = vld [vmem:[#allocation13 + $0x2a0] sm:$0xf] }
 0x453   :  { %v347_v37 = vperm.slane %v311_v33, 1  ;;  %v405_v50 = vperm.slane %v6934_v10, 6  ;;  %3302 = vmatpush.bf16.msra.mxu1 %v5477_v7  ;;  %v5469_v23 = vor.u32 %v6245_v11, %v5468_v61  ;;  %v6294_v33 = vld [vmem:[#allocation13 + $0x124] sm:$0xf]  ;;  %v6345_v4 = vld [vmem:[#allocation13 + $0x2b4] sm:$0xf0]  ;;  %v476_v11 = vadd.f32 %v458_v32, %v382_v47 }
 0x454   :  { %v6930_v16 = vadd.f32 %v2835_v15, %v569_v9  ;;  %3314 = vmatpush.bf16.msra.mxu2 %v5425_v53  ;;  %v499_v9 = vperm.slane %v6934_v10, 7  ;;  %v5396_v15 = vld [vmem:[#allocation11 + $0x300] sm:$0xf]  ;;  %3328 = vmatpush.bf16.msra.mxu3 %v5481_v17  ;;  %v5470_v53 = vld [vmem:[#allocation11 + $0x398] sm:$0xf0]  ;;  %v232_v44 = vmul.f32 %v214_v18, %v6711_v26  ;;  %v5673_v2 = vor.u32 %v6294_v33, %v5670_v48 }
 0x455   :  { %v5473_v14 = vor.u32 %v6244_v24, %v5470_v53  ;;  %v365_v17 = vmul.f32 %v347_v37, %v6721_v42  ;;  %v441_v18 = vperm.slane %v405_v50, 2  ;;  %v5861_v55 = vor.u32 %v6345_v4, %v5860_v62  ;;  %v6285_v61 = vld [vmem:[#allocation13 + $0xd4] sm:$0xf0]  ;;  %v6339_v37 = vld [vmem:[#allocation13 + $0x284] sm:$0xf0] }
 0x456   :  { %v2839_v0 = vpack.c.bf16 %v6930_v16, %v6930_v16  ;;  %v289_v7 = vadd.f32 %v253_v45, %v232_v44  ;;  %v5836_v45 = vld [vmem:[#allocation13 + $0x270] sm:$0xf]  ;;  %v6336_v50 = vld [vmem:[#allocation13 + $0x274] sm:$0xf]  ;;  %v6282_v24 = vld [vmem:[#allocation13 + $0xc4] sm:$0xf]  ;;  %v5789_v4 = vor.u32 %v6327_v54, %v5788_v49 }
 0x457   :  { %v2832_v19 = vpop.f32.mrf.mxu3  ;;  %3303 = vmatpush.bf16.msra.mxu1 %v5469_v23  ;;  %v5622_v53 = vld [vmem:[#allocation13 + $0xd8] sm:$0xf0]  ;;  %v459_v34 = vmul.f32 %v441_v18, %v6716_v30  ;;  %v5837_v29 = vor.u32 %v6339_v37, %v5836_v45  ;;  %v5841_v35 = vor.u32 %v6336_v50, %v5838_v27  ;;  %v5598_v44 = vld [vmem:[#allocation13 + $0xa8] sm:$0xf0]  ;;  %v5548_v18 = vld [vmem:[#allocation13 + $0x30] sm:$0xf] }
 0x458   :  { %3054 = vmatmul.bf16.vlgmr.msrb.gmra.mxu1 %v2839_v0  ;;  %3080 = vmatmul.bf16.vlgmr.msrb.gmra.mxu3 %v2839_v0  ;;  %v6227_v0 = vld [vmem:[#allocation11 + $0x304] sm:$0xf0]  ;;  %v6226_v19 = vld [vmem:[#allocation11 + $0x304] sm:$0xf]  ;;  %v383_v20 = vadd.f32 %v365_v17, %v289_v7  ;;  %v5601_v32 = vor.u32 %v6276_v43, %v5598_v44  ;;  %v5574_v62 = vld [vmem:[#allocation13 + $0x78] sm:$0xf0] }
 0x459   :  { %3315 = vmatpush.bf16.msra.mxu2 %v5417_v59  ;;  %v5397_v8 = vor.u32 %v6227_v0, %v5396_v15  ;;  %v5401_v22 = vor.u32 %v6226_v19, %v5398_v21  ;;  %v6300_v59 = vld [vmem:[#allocation13 + $0x154] sm:$0xf]  ;;  %3329 = vmatpush.bf16.msra.mxu3 %v5473_v14  ;;  %v6342_v15 = vld [vmem:[#allocation13 + $0x2a4] sm:$0xf]  ;;  %v5862_v0 = vld [vmem:[#allocation13 + $0x2b8] sm:$0xf0]  ;;  %v5645_v19 = vor.u32 %v6291_v57, %v5644_v1 }
 0x45a   :  { %v5697_v13 = vor.u32 %v6300_v59, %v5694_v12  ;;  %v5620_v21 = vld [vmem:[#allocation13 + $0xc0] sm:$0xf]  ;;  %v535_v14 = vperm.slane %v499_v9, 3  ;;  %v6330_v12 = vld [vmem:[#allocation13 + $0x244] sm:$0xf]  ;;  %v477_v10 = vadd.f32 %v459_v34, %v383_v20 }
 0x45b   :  { %3291 = vmatpush.bf16.msra.mxu0 %v5397_v8  ;;  %3304 = vmatpush.bf16.msra.mxu1 %v5461_v28  ;;  %v5865_v8 = vor.u32 %v6342_v15, %v5862_v0  ;;  %v5625_v28 = vor.u32 %v6282_v24, %v5622_v53  ;;  %v5817_v47 = vor.u32 %v6330_v12, %v5814_v60  ;;  %v6321_v15 = vld [vmem:[#allocation13 + $0x1f4] sm:$0xf0]  ;;  %v6264_v37 = vld [vmem:[#allocation13 + $0x34] sm:$0xf]  ;;  %v5550_v50 = vld [vmem:[#allocation13 + $0x48] sm:$0xf0] }
 0x45c   :  { %v553_v9 = vmul.f32 %v535_v14, %v6726_v58  ;;  %v5524_v34 = vld [vmem:[#allocation13] sm:$0xf]  ;;  %v6261_v14 = vld [vmem:[#allocation13 + $0x14] sm:$0xf0]  ;;  %v6258_v12 = vld [vmem:[#allocation13 + $0x4] sm:$0xf] }
 0x45d   :  { %3316 = vmatpush.bf16.msra.mxu2 %v5409_v39  ;;  %v6288_v39 = vld [vmem:[#allocation13 + $0xf4] sm:$0xf]  ;;  %3330 = vmatpush.bf16.msra.mxu3 %v5465_v40  ;;  %v5526_v60 = vld [vmem:[#allocation13 + $0x18] sm:$0xf0]  ;;  %v5525_v43 = vor.u32 %v6261_v14, %v5524_v34  ;;  %v5844_v14 = vld [vmem:[#allocation13 + $0x278] sm:$0xf] }
 0x45e   :  { %v5649_v63 = vor.u32 %v6288_v39, %v5646_v52  ;;  %v571_v39 = vadd.f32 %v553_v9, %v477_v10  ;;  %v6270_v52 = vld [vmem:[#allocation13 + $0x64] sm:$0xf]  ;;  %v6301_v44 = vld [vmem:[#allocation13 + $0x15c] sm:$0xf]  ;;  %v5676_v9 = vld [vmem:[#allocation13 + $0x128] sm:$0xf]  ;;  %v5529_v54 = vor.u32 %v6258_v12, %v5526_v60 }
 0x45f   :  { %3932 = vmatpush.bf16.msrb.mxu0 %v5693_v38  ;;  %3945 = vmatpush.bf16.msrb.mxu1 %v5885_v25  ;;  %v6279_v38 = vld [vmem:[#allocation13 + $0xa4] sm:$0xf0]  ;;  %v6324_v25 = vld [vmem:[#allocation13 + $0x214] sm:$0xf] }
 0x460   :  { %v5597_v46 = vor.u32 %v6279_v38, %v5596_v36  ;;  %v6315_v36 = vld [vmem:[#allocation13 + $0x1c4] sm:$0xf0]  ;;  %v5606_v12 = vld [vmem:[#allocation13 + $0xb0] sm:$0xf0] }
 0x461   :  { %3317 = vmatpush.bf16.msra.mxu2 %v5401_v22  ;;  %3971 = vmatpush.bf16.msrb.mxu3 %v5889_v3  ;;  %v552_v22 = vmul.f32 %v6947_v51, %v6726_v58  ;;  %v5621_v51 = vor.u32 %v6285_v61, %v5620_v21  ;;  %v5790_v3 = vld [vmem:[#allocation13 + $0x228] sm:$0xf0]  ;;  %v6318_v21 = vld [vmem:[#allocation13 + $0x1e4] sm:$0xf]  ;;  %v5766_v61 = vld [vmem:[#allocation13 + $0x1f8] sm:$0xf0] }
 0x462   :  { %v5793_v17 = vor.u32 %v6324_v25, %v5790_v3  ;;  %v5769_v20 = vor.u32 %v6318_v21, %v5766_v61  ;;  %v6352_v3 = vld [vmem:[#allocation13 + $0x2ec] sm:$0xf0]  ;;  %v6343_v21 = vld [vmem:[#allocation13 + $0x2ac] sm:$0xf]  ;;  %v5870_v61 = vld [vmem:[#allocation13 + $0x2c0] sm:$0xf0] }
 0x463   :  { %3933 = vmatpush.bf16.msrb.mxu0 %v5669_v56  ;;  %3946 = vmatpush.bf16.msrb.mxu1 %v5861_v55  ;;  %v570_v59 = vadd.f32 %v552_v22, %v476_v11  ;;  %v5572_v56 = vld [vmem:[#allocation13 + $0x60] sm:$0xf]  ;;  %v5577_v22 = vor.u32 %v6270_v52, %v5574_v62  ;;  %v5678_v52 = vld [vmem:[#allocation13 + $0x140] sm:$0xf0]  ;;  %v5820_v60 = vld [vmem:[#allocation13 + $0x248] sm:$0xf] }
 0x464   :  { %v5764_v55 = vld [vmem:[#allocation13 + $0x1e0] sm:$0xf] }
 0x465   :  { %3958 = vmatpush.bf16.msrb.mxu2 %v5697_v13  ;;  %3972 = vmatpush.bf16.msrb.mxu3 %v5865_v8  ;;  %v5813_v13 = vor.u32 %v6333_v31, %v5812_v5  ;;  %v6267_v8 = vld [vmem:[#allocation13 + $0x44] sm:$0xf0]  ;;  %v5553_v5 = vor.u32 %v6264_v37, %v5550_v50  ;;  %v6304_v31 = vld [vmem:[#allocation13 + $0x16c] sm:$0xf0]  ;;  %v5873_v37 = vor.u32 %v6343_v21, %v5870_v61  ;;  %v6262_v61 = vld [vmem:[#allocation13 + $0x1c] sm:$0xf0] }
 0x466   :  { %v5549_v27 = vor.u32 %v6267_v8, %v5548_v18  ;;  %v6346_v8 = vld [vmem:[#allocation13 + $0x2bc] sm:$0xf0]  ;;  %v5628_v50 = vld [vmem:[#allocation13 + $0xc8] sm:$0xf] }
 0x467   :  { %3934 = vmatpush.bf16.msrb.mxu0 %v5645_v19  ;;  %3947 = vmatpush.bf16.msrb.mxu1 %v5837_v29  ;;  %v5700_v29 = vld [vmem:[#allocation13 + $0x158] sm:$0xf]  ;;  %v5532_v21 = vld [vmem:[#allocation13 + $0x8] sm:$0xf] }
 0x469   :  { %3959 = vmatpush.bf16.msrb.mxu2 %v5673_v2  ;;  %3973 = vmatpush.bf16.msrb.mxu3 %v5841_v35  ;;  %v6273_v2 = vld [vmem:[#allocation13 + $0x74] sm:$0xf0]  ;;  %v5740_v35 = vld [vmem:[#allocation13 + $0x1b0] sm:$0xf] }
 0x46a   :  { %v5573_v7 = vor.u32 %v6273_v2, %v5572_v56  ;;  %v5741_v10 = vor.u32 %v6315_v36, %v5740_v35  ;;  %v6309_v56 = vld [vmem:[#allocation13 + $0x194] sm:$0xf0]  ;;  %v5846_v36 = vld [vmem:[#allocation13 + $0x290] sm:$0xf0] }
 0x46b   :  { %3935 = vmatpush.bf16.msrb.mxu0 %v5621_v51  ;;  %3948 = vmatpush.bf16.msrb.mxu1 %v5813_v13  ;;  %v5892_v2 = vld [vmem:[#allocation13 + $0x2d8] sm:$0xf] }
 0x46d   :  { %3960 = vmatpush.bf16.msrb.mxu2 %v5649_v63  ;;  %3974 = vmatpush.bf16.msrb.mxu3 %v5817_v47  ;;  %v5716_v47 = vld [vmem:[#allocation13 + $0x180] sm:$0xf] }
 0x46e   :  { %v5717_v62 = vor.u32 %v6309_v56, %v5716_v47  ;;  %v6271_v47 = vld [vmem:[#allocation13 + $0x6c] sm:$0xf] }
 0x46f   :  { %3936 = vmatpush.bf16.msrb.mxu0 %v5597_v46  ;;  %3949 = vmatpush.bf16.msrb.mxu1 %v5789_v4  ;;  %v6298_v46 = vld [vmem:[#allocation13 + $0x13c] sm:$0xf0] }
 0x470   :  { %v5677_v4 = vor.u32 %v6298_v46, %v5676_v9  ;;  %v6274_v46 = vld [vmem:[#allocation13 + $0x7c] sm:$0xf0] }
 0x471   :  { %3961 = vmatpush.bf16.msrb.mxu2 %v5625_v28  ;;  %3975 = vmatpush.bf16.msrb.mxu3 %v5793_v17  ;;  %v5742_v28 = vld [vmem:[#allocation13 + $0x1c8] sm:$0xf0]  ;;  %v5893_v17 = vor.u32 %v6352_v3, %v5892_v2  ;;  %v5798_v3 = vld [vmem:[#allocation13 + $0x230] sm:$0xf0] }
 0x473   :  { %3937 = vmatpush.bf16.msrb.mxu0 %v5573_v7 }
 0x475   :  { %3962 = vmatpush.bf16.msrb.mxu2 %v5601_v32  ;;  %3976 = vmatpush.bf16.msrb.mxu3 %v5769_v20  ;;  %v5718_v32 = vld [vmem:[#allocation13 + $0x198] sm:$0xf0] }
 0x477   :  { %3938 = vmatpush.bf16.msrb.mxu0 %v5549_v27  ;;  %v5630_v27 = vld [vmem:[#allocation13 + $0xe0] sm:$0xf0] }
 0x479   :  { %3963 = vmatpush.bf16.msrb.mxu2 %v5577_v22  ;;  %v5654_v22 = vld [vmem:[#allocation13 + $0x110] sm:$0xf0] }
 0x47b   :  { %3939 = vmatpush.bf16.msrb.mxu0 %v5525_v43 }
 0x47d   :  { %3964 = vmatpush.bf16.msrb.mxu2 %v5553_v5  ;;  %v5604_v5 = vld [vmem:[#allocation13 + $0x98] sm:$0xf] }
 0x481   :  { %3965 = vmatpush.bf16.msrb.mxu2 %v5529_v54  ;;  %v5796_v54 = vld [vmem:[#allocation13 + $0x218] sm:$0xf] }
 0x4cf   :  { %v3042_v23 = vpop.f32.mrf.mxu0 }
 0x4d0   :  { %v3043_v40 = vadd.f32 %v3042_v23, %v570_v59  ;;  %v5765_v23 = vor.u32 %v6321_v15, %v5764_v55  ;;  %v6312_v59 = vld [vmem:[#allocation13 + $0x1b4] sm:$0xf]  ;;  %v5652_v55 = vld [vmem:[#allocation13 + $0xf8] sm:$0xf]  ;;  %v6292_v15 = vld [vmem:[#allocation13 + $0x10c] sm:$0xf0] }
 0x4d2   :  { %3950 = vmatpush.bf16.msrb.mxu1 %v5765_v23  ;;  %v6286_v23 = vld [vmem:[#allocation13 + $0xdc] sm:$0xf0] }
 0x4d3   :  { %v5629_v20 = vor.u32 %v6286_v23, %v5628_v50  ;;  %v5534_v50 = vld [vmem:[#allocation13 + $0x20] sm:$0xf0] }
 0x4d5   :  { %v3055_v33 = vpop.f32.mrf.mxu1  ;;  %v3068_v48 = vpop.f32.mrf.mxu2 }
 0x4d6   :  { %v3056_v41 = vadd.f32 %v3055_v33, %v3043_v40  ;;  %v3069_v19 = vadd.f32 %v3068_v48, %v571_v39  ;;  %v5702_v40 = vld [vmem:[#allocation13 + $0x170] sm:$0xf0]  ;;  %v5701_v33 = vor.u32 %v6304_v31, %v5700_v29  ;;  %v5745_v48 = vor.u32 %v6312_v59, %v5742_v28  ;;  %3951 = vmatpush.bf16.msrb.mxu1 %v5741_v10  ;;  %v6295_v39 = vld [vmem:[#allocation13 + $0x12c] sm:$0xf]  ;;  %v6340_v29 = vld [vmem:[#allocation13 + $0x28c] sm:$0xf0] }
 0x4d7   :  { %v3044_v1 = vpop.f32.mrf.mxu0  ;;  %v5705_v25 = vor.u32 %v6301_v44, %v5702_v40  ;;  %v5845_v35 = vor.u32 %v6340_v29, %v5844_v14  ;;  %v6280_v31 = vld [vmem:[#allocation13 + $0xac] sm:$0xf0]  ;;  %v6334_v44 = vld [vmem:[#allocation13 + $0x25c] sm:$0xf0]  ;;  %v6331_v40 = vld [vmem:[#allocation13 + $0x24c] sm:$0xf] }
 0x4d8   :  { %v3085_v57 = vmul.f32 0.2, %v3056_v41  ;;  %v6349_v1 = vld [vmem:[#allocation13 + $0x2dc] sm:$0xf]  ;;  %3977 = vmatpush.bf16.msrb.mxu3 %v5745_v48  ;;  %v5605_v28 = vor.u32 %v6280_v31, %v5604_v5  ;;  %v5822_v10 = vld [vmem:[#allocation13 + $0x260] sm:$0xf0]  ;;  %v5821_v9 = vor.u32 %v6334_v44, %v5820_v60 }
 0x4d9   :  { %v5580_v48 = vld [vmem:[#allocation13 + $0x68] sm:$0xf]  ;;  %v5750_v29 = vld [vmem:[#allocation13 + $0x1d0] sm:$0xf0] }
 0x4da   :  { %v3087_v0 = vmax.f32 %v3056_v41, %v3085_v57  ;;  %v6306_v41 = vld [vmem:[#allocation13 + $0x184] sm:$0xf]  ;;  %v5894_v57 = vld [vmem:[#allocation13 + $0x2f0] sm:$0xf0]  ;;  %3952 = vmatpush.bf16.msrb.mxu1 %v5717_v62  ;;  %v5581_v56 = vor.u32 %v6274_v46, %v5580_v48  ;;  %v5724_v31 = vld [vmem:[#allocation13 + $0x188] sm:$0xf] }
 0x4db   :  { %v3081_v11 = vpop.f32.mrf.mxu3  ;;  %v5721_v7 = vor.u32 %v6306_v41, %v5718_v32  ;;  %v5897_v18 = vor.u32 %v6349_v1, %v5894_v57  ;;  %v6328_v41 = vld [vmem:[#allocation13 + $0x22c] sm:$0xf0]  ;;  %v5556_v1 = vld [vmem:[#allocation13 + $0x38] sm:$0xf]  ;;  %v5558_v62 = vld [vmem:[#allocation13 + $0x50] sm:$0xf0] }
 0x4dc   :  { %v3089_v63 = vpack.c.bf16 %v3087_v0, %v3087_v0  ;;  %v3082_v45 = vadd.f32 %v3081_v11, %v3069_v19  ;;  %v5868_v0 = vld [vmem:[#allocation13 + $0x2a8] sm:$0xf]  ;;  %v5681_v19 = vor.u32 %v6295_v39, %v5678_v52  ;;  %v6289_v11 = vld [vmem:[#allocation13 + $0xfc] sm:$0xf]  ;;  %v5797_v2 = vor.u32 %v6328_v41, %v5796_v54  ;;  %v6268_v39 = vld [vmem:[#allocation13 + $0x4c] sm:$0xf0] }
 0x4dd   :  { %v3057_v24 = vpop.f32.mrf.mxu1  ;;  %v3070_v53 = vpop.f32.mrf.mxu2  ;;  %3978 = vmatpush.bf16.msrb.mxu3 %v5721_v7  ;;  %v6265_v52 = vld [vmem:[#allocation13 + $0x3c] sm:$0xf]  ;;  %v5557_v7 = vor.u32 %v6268_v39, %v5556_v1 }
 0x4de   :  { %v3086_v51 = vmul.f32 0.2, %v3082_v45  ;;  %3292 = vmatmul.bf16.vlgmr.msra.gmra.mxu0 %v3089_v63  ;;  %3318 = vmatmul.bf16.vlgmr.msra.gmra.mxu2 %v3089_v63  ;;  %v5653_v63 = vor.u32 %v6292_v15, %v5652_v55  ;;  %v5657_v24 = vor.u32 %v6289_v11, %v5654_v22  ;;  %v6283_v53 = vld [vmem:[#allocation13 + $0xcc] sm:$0xf]  ;;  %v5772_v55 = vld [vmem:[#allocation13 + $0x1e8] sm:$0xf] }
 0x4df   :  { %3984 = vmatpush.bf16.msra.mxu0 %v5701_v33  ;;  %4010 = vmatpush.bf16.msra.mxu2 %v5705_v25  ;;  %v5633_v34 = vor.u32 %v6283_v53, %v5630_v27  ;;  %v6963_v33 = vld [vmem:[#allocation5 + $0x40] sm:$0xff]  ;;  %v6325_v25 = vld [vmem:[#allocation13 + $0x21c] sm:$0xf]  ;;  %v6322_v15 = vld [vmem:[#allocation13 + $0x1fc] sm:$0xf0] }
 0x4e0   :  { %v3088_v38 = vmax.f32 %v3082_v45, %v3086_v51  ;;  %v5869_v45 = vor.u32 %v6346_v8, %v5868_v0  ;;  %v6337_v51 = vld [vmem:[#allocation13 + $0x27c] sm:$0xf]  ;;  %v5801_v57 = vor.u32 %v6325_v25, %v5798_v3  ;;  %v6319_v0 = vld [vmem:[#allocation13 + $0x1ec] sm:$0xf]  ;;  %v5774_v8 = vld [vmem:[#allocation13 + $0x200] sm:$0xf0] }
 0x4e1   :  { %v5849_v59 = vor.u32 %v6337_v51, %v5846_v36  ;;  %v312_v22 = vperm.slane %v6963_v33, 1  ;;  %v180_v23 = vperm.slane %v6963_v33, 4  ;;  %v5748_v53 = vld [vmem:[#allocation13 + $0x1b8] sm:$0xf]  ;;  %v6316_v27 = vld [vmem:[#allocation13 + $0x1cc] sm:$0xf0] }
 0x4e2   :  { %v3090_v13 = vpack.c.bf16 %v3088_v38, %v3088_v38  ;;  %v6277_v38 = vld [vmem:[#allocation13 + $0x9c] sm:$0xf]  ;;  %v5749_v14 = vor.u32 %v6316_v27, %v5748_v53  ;;  %v406_v36 = vperm.slane %v6963_v33, 2  ;;  %v313_v60 = vperm.slane %v6963_v33, 5 }
 0x4e3   :  { %v3083_v49 = vpop.f32.mrf.mxu3  ;;  %3985 = vmatpush.bf16.msra.mxu0 %v5677_v4  ;;  %4011 = vmatpush.bf16.msra.mxu2 %v5681_v19  ;;  %v5609_v43 = vor.u32 %v6277_v38, %v5606_v12  ;;  %v179_v4 = vperm.slane %v6963_v33, 0  ;;  %v5773_v19 = vor.u32 %v6322_v15, %v5772_v55  ;;  %v5726_v38 = vld [vmem:[#allocation13 + $0x1a0] sm:$0xf0]  ;;  %v216_v12 = vperm.slane %v180_v23, 0  ;;  %v5708_v55 = vld [vmem:[#allocation13 + $0x160] sm:$0xf] }
 0x4e4   :  { %3305 = vmatmul.bf16.vlgmr.msra.gmra.mxu1 %v3090_v13  ;;  %3331 = vmatmul.bf16.vlgmr.msra.gmra.mxu3 %v3090_v13  ;;  %v5825_v13 = vor.u32 %v6331_v40, %v5822_v10  ;;  %v5582_v49 = vld [vmem:[#allocation13 + $0x80] sm:$0xf0]  ;;  %v501_v1 = vperm.slane %v6963_v33, 7  ;;  %v6296_v23 = vld [vmem:[#allocation13 + $0x134] sm:$0xf] }
 0x4e5   :  { %3997 = vmatpush.bf16.msra.mxu1 %v5893_v17  ;;  %4023 = vmatpush.bf16.msra.mxu3 %v5897_v18  ;;  %v5585_v32 = vor.u32 %v6271_v47, %v5582_v49  ;;  %v5561_v17 = vor.u32 %v6265_v52, %v5558_v62  ;;  %v148_v18 = vld [vmem:[#allocation7 + $0x10] sm:$0x3]  ;;  %v215_v11 = vperm.slane %v179_v4, 0  ;;  %v234_v48 = vmul.f32 %v216_v12, %v6711_v26 }
 0x4e6   :  { %v255_v46 = vperm.slane %v148_v18, 1  ;;  %v349_v47 = vperm.slane %v313_v60, 1  ;;  %v5876_v60 = vld [vmem:[#allocation13 + $0x2b0] sm:$0xf] }
 0x4e7   :  { %3986 = vmatpush.bf16.msra.mxu0 %v5653_v63  ;;  %4012 = vmatpush.bf16.msra.mxu2 %v5657_v24  ;;  %v5777_v63 = vor.u32 %v6319_v0, %v5774_v8  ;;  %v233_v51 = vmul.f32 %v215_v11, %v6711_v26  ;;  %v5710_v8 = vld [vmem:[#allocation13 + $0x178] sm:$0xf0] }
 0x4e8   :  { %v367_v25 = vmul.f32 %v349_v47, %v6721_v42  ;;  %v6284_v47 = vld [vmem:[#allocation13 + $0xd4] sm:$0xf] }
 0x4e9   :  { %3998 = vmatpush.bf16.msra.mxu1 %v5869_v45  ;;  %4024 = vmatpush.bf16.msra.mxu3 %v5873_v37  ;;  %v5533_v45 = vor.u32 %v6262_v61, %v5532_v21  ;;  %v6259_v37 = vld [vmem:[#allocation13 + $0xc] sm:$0xf] }
 0x4ea   :  { %v5537_v24 = vor.u32 %v6259_v37, %v5534_v50  ;;  %v6299_v50 = vld [vmem:[#allocation13 + $0x144] sm:$0xf0] }
 0x4eb   :  { %3987 = vmatpush.bf16.msra.mxu0 %v5629_v20  ;;  %4013 = vmatpush.bf16.msra.mxu2 %v5633_v34  ;;  %v6313_v20 = vld [vmem:[#allocation13 + $0x1bc] sm:$0xf]  ;;  %v254_v34 = vperm.slane %v148_v18, 0 }
 0x4ec   :  { %v5753_v5 = vor.u32 %v6313_v20, %v5750_v29  ;;  %v5902_v29 = vld [vmem:[#allocation13 + $0x2f8] sm:$0xf0] }
 0x4ed   :  { %3999 = vmatpush.bf16.msra.mxu1 %v5845_v35  ;;  %4025 = vmatpush.bf16.msra.mxu3 %v5849_v59  ;;  %v348_v35 = vperm.slane %v312_v22, 1  ;;  %v6310_v59 = vld [vmem:[#allocation13 + $0x19c] sm:$0xf0]  ;;  %v290_v40 = vadd.f32 %v254_v34, %v233_v51 }
 0x4ef   :  { %3988 = vmatpush.bf16.msra.mxu0 %v5605_v28  ;;  %4014 = vmatpush.bf16.msra.mxu2 %v5609_v43  ;;  %v6307_v28 = vld [vmem:[#allocation13 + $0x18c] sm:$0xf]  ;;  %v5725_v43 = vor.u32 %v6310_v59, %v5724_v31  ;;  %v366_v10 = vmul.f32 %v348_v35, %v6721_v42  ;;  %v6302_v42 = vld [vmem:[#allocation13 + $0x164] sm:$0xf]  ;;  %v6293_v31 = vld [vmem:[#allocation13 + $0x114] sm:$0xf0] }
 0x4f0   :  { %v5729_v44 = vor.u32 %v6307_v28, %v5726_v38  ;;  %v6290_v59 = vld [vmem:[#allocation13 + $0x104] sm:$0xf]  ;;  %v5662_v28 = vld [vmem:[#allocation13 + $0x118] sm:$0xf0] }
 0x4f1   :  { %4000 = vmatpush.bf16.msra.mxu1 %v5821_v9  ;;  %4026 = vmatpush.bf16.msra.mxu3 %v5825_v13  ;;  %v442_v9 = vperm.slane %v406_v36, 2  ;;  %v500_v13 = vperm.slane %v6963_v33, 3  ;;  %v384_v54 = vadd.f32 %v366_v10, %v290_v40  ;;  %v5660_v36 = vld [vmem:[#allocation13 + $0x100] sm:$0xf]  ;;  %v5878_v40 = vld [vmem:[#allocation13 + $0x2c8] sm:$0xf0] }
 0x4f3   :  { %3989 = vmatpush.bf16.msra.mxu0 %v5581_v56  ;;  %4015 = vmatpush.bf16.msra.mxu2 %v5585_v32  ;;  %v407_v56 = vperm.slane %v6963_v33, 6  ;;  %v460_v41 = vmul.f32 %v442_v9, %v6716_v30  ;;  %v536_v32 = vperm.slane %v500_v13, 3  ;;  %v5661_v9 = vor.u32 %v6293_v31, %v5660_v36  ;;  %v5540_v36 = vld [vmem:[#allocation13 + $0x10] sm:$0xf]  ;;  %v6260_v31 = vld [vmem:[#allocation13 + $0x14] sm:$0xf] }
 0x4f4   :  { %v5665_v13 = vor.u32 %v6290_v59, %v5662_v28  ;;  %v5542_v59 = vld [vmem:[#allocation13 + $0x28] sm:$0xf0] }
 0x4f5   :  { %4001 = vmatpush.bf16.msra.mxu1 %v5797_v2  ;;  %4027 = vmatpush.bf16.msra.mxu3 %v5801_v57  ;;  %v291_v2 = vadd.f32 %v255_v46, %v234_v48  ;;  %v443_v3 = vperm.slane %v407_v56, 2  ;;  %v478_v57 = vadd.f32 %v460_v41, %v384_v54  ;;  %v554_v39 = vmul.f32 %v536_v32, %v6726_v58  ;;  %v5636_v48 = vld [vmem:[#allocation13 + $0xd0] sm:$0xf]  ;;  %v6287_v46 = vld [vmem:[#allocation13 + $0xe4] sm:$0xf0] }
 0x4f6   :  { %v5638_v56 = vld [vmem:[#allocation13 + $0xe8] sm:$0xf0]  ;;  %v5852_v41 = vld [vmem:[#allocation13 + $0x280] sm:$0xf]  ;;  %v6341_v32 = vld [vmem:[#allocation13 + $0x294] sm:$0xf0] }
 0x4f7   :  { %3990 = vmatpush.bf16.msra.mxu0 %v5557_v7  ;;  %4016 = vmatpush.bf16.msra.mxu2 %v5561_v17  ;;  %v385_v4 = vadd.f32 %v367_v25, %v291_v2  ;;  %v461_v7 = vmul.f32 %v443_v3, %v6716_v30  ;;  %v537_v17 = vperm.slane %v501_v1, 3  ;;  %v572_v15 = vadd.f32 %v554_v39, %v478_v57  ;;  %v6338_v2 = vld [vmem:[#allocation13 + $0x284] sm:$0xf]  ;;  %v5854_v25 = vld [vmem:[#allocation13 + $0x298] sm:$0xf0] }
 0x4f8   :  { %v5637_v3 = vor.u32 %v6287_v46, %v5636_v48  ;;  %v5641_v1 = vor.u32 %v6284_v47, %v5638_v56  ;;  %v5612_v57 = vld [vmem:[#allocation13 + $0xa0] sm:$0xf]  ;;  %v6281_v39 = vld [vmem:[#allocation13 + $0xb4] sm:$0xf0]  ;;  %v5732_v48 = vld [vmem:[#allocation13 + $0x190] sm:$0xf] }
 0x4f9   :  { %4002 = vmatpush.bf16.msra.mxu1 %v5773_v19  ;;  %4028 = vmatpush.bf16.msra.mxu3 %v5777_v63  ;;  %v6305_v19 = vld [vmem:[#allocation13 + $0x174] sm:$0xf0]  ;;  %v479_v33 = vadd.f32 %v461_v7, %v385_v4  ;;  %v555_v61 = vmul.f32 %v537_v17, %v6726_v58  ;;  %v5713_v63 = vor.u32 %v6302_v42, %v5710_v8  ;;  %v5828_v7 = vld [vmem:[#allocation13 + $0x250] sm:$0xf]  ;;  %v6335_v17 = vld [vmem:[#allocation13 + $0x264] sm:$0xf0] }
 0x4fa   :  { %v5709_v22 = vor.u32 %v6305_v19, %v5708_v55  ;;  %v6353_v58 = vld [vmem:[#allocation13 + $0x2f4] sm:$0xf0]  ;;  %v5857_v4 = vor.u32 %v6338_v2, %v5854_v25  ;;  %v5830_v55 = vld [vmem:[#allocation13 + $0x268] sm:$0xf0]  ;;  %v5588_v19 = vld [vmem:[#allocation13 + $0x70] sm:$0xf] }
 0x4fb   :  { %3991 = vmatpush.bf16.msra.mxu0 %v5533_v45  ;;  %4017 = vmatpush.bf16.msra.mxu2 %v5537_v24  ;;  %v5684_v45 = vld [vmem:[#allocation13 + $0x130] sm:$0xf]  ;;  %v5686_v24 = vld [vmem:[#allocation13 + $0x148] sm:$0xf0]  ;;  %v573_v20 = vadd.f32 %v555_v61, %v479_v33  ;;  %v6275_v42 = vld [vmem:[#allocation13 + $0x84] sm:$0xf0]  ;;  %v5829_v33 = vor.u32 %v6335_v17, %v5828_v7 }
 0x4fc   :  { %v5685_v51 = vor.u32 %v6299_v50, %v5684_v45  ;;  %v5689_v35 = vor.u32 %v6296_v23, %v5686_v24  ;;  %v6272_v8 = vld [vmem:[#allocation13 + $0x74] sm:$0xf]  ;;  %v5806_v45 = vld [vmem:[#allocation13 + $0x238] sm:$0xf0]  ;;  %v5564_v23 = vld [vmem:[#allocation13 + $0x40] sm:$0xf] }
 0x4fd   :  { %4003 = vmatpush.bf16.msra.mxu1 %v5749_v14  ;;  %4029 = vmatpush.bf16.msra.mxu3 %v5753_v5  ;;  %v6350_v14 = vld [vmem:[#allocation13 + $0x2e4] sm:$0xf]  ;;  %v6269_v24 = vld [vmem:[#allocation13 + $0x54] sm:$0xf0]  ;;  %v6311_v46 = vld [vmem:[#allocation13 + $0x1a4] sm:$0xf0] }
 0x4fe   :  { %v5905_v12 = vor.u32 %v6350_v14, %v5902_v29  ;;  %v6320_v14 = vld [vmem:[#allocation13 + $0x1f4] sm:$0xf]  ;;  %v5782_v29 = vld [vmem:[#allocation13 + $0x208] sm:$0xf0] }
 0x4ff   :  { %v6308_v47 = vld [vmem:[#allocation13 + $0x194] sm:$0xf]  ;;  %v5734_v56 = vld [vmem:[#allocation13 + $0x1a8] sm:$0xf0] }
 0x501   :  { %4004 = vmatpush.bf16.msra.mxu1 %v5725_v43  ;;  %4030 = vmatpush.bf16.msra.mxu3 %v5729_v44  ;;  %v6347_v43 = vld [vmem:[#allocation13 + $0x2c4] sm:$0xf0]  ;;  %v6344_v44 = vld [vmem:[#allocation13 + $0x2b4] sm:$0xf] }
 0x502   :  { %v5881_v54 = vor.u32 %v6344_v44, %v5878_v40  ;;  %v5758_v44 = vld [vmem:[#allocation13 + $0x1d8] sm:$0xf0] }
 0x55b   :  { %v3293_v49 = vpop.f32.mrf.mxu0 }
 0x561   :  { %v3306_v26 = vpop.f32.mrf.mxu1  ;;  %v3319_v52 = vpop.f32.mrf.mxu2 }
 0x562   :  { %v3307_v62 = vadd.f32 %v3306_v26, %v3293_v49  ;;  %v5877_v49 = vor.u32 %v6347_v43, %v5876_v60  ;;  %v6278_v26 = vld [vmem:[#allocation13 + $0xa4] sm:$0xf]  ;;  %v6317_v60 = vld [vmem:[#allocation13 + $0x1d4] sm:$0xf0] }
 0x563   :  { %v3295_v18 = vpop.f32.mrf.mxu0  ;;  %v6314_v43 = vld [vmem:[#allocation13 + $0x1c4] sm:$0xf] }
 0x564   :  { %v3336_v0 = vadd.f32 %v3307_v62, %v6924_v6  ;;  %v5900_v6 = vld [vmem:[#allocation13 + $0x2e0] sm:$0xf]  ;;  %v5853_v62 = vor.u32 %v6341_v32, %v5852_v41  ;;  %v6332_v18 = vld [vmem:[#allocation13 + $0x254] sm:$0xf]  ;;  %v3438_v41 = vld [vmem:[%s7013_s8] sm:$0x3f] }
 0x565   :  { %v5901_v38 = vor.u32 %v6353_v58, %v5900_v6  ;;  %v5833_v61 = vor.u32 %v6332_v18, %v5830_v55  ;;  %v6323_v58 = vld [vmem:[#allocation13 + $0x204] sm:$0xf0]  ;;  %v3440_v2 = vperm.slane %v3438_v41, 0  ;;  %v3442_v17 = vperm.slane %v3438_v41, 2  ;;  %s6594_s8 = smov [#allocation14]  }
 0x566   :  { %v3338_v21 = vadd.f32 %v3336_v0, %v572_v15  ;;  %v5613_v15 = vor.u32 %v6281_v39, %v5612_v57  ;;  %v3441_v39 = vperm.slane %v3438_v41, 1  ;;  %s4099_s22 = sshll.u32 %s6594_s8, 4  ;;  %s4100_s22 = int_to_ptr.vmem [resolvable:$true] %s4099_s22 }
 0x567   :  { %v3332_v11 = vpop.f32.mrf.mxu3 }
 0x568   :  { %v6982_v37 = vpack.c.bf16 %v3338_v21, %v3338_v21  ;;  %v3333_v30 = vadd.f32 %v3332_v11, %v3319_v52  ;;  %v5614_v52 = vld [vmem:[#allocation13 + $0xb8] sm:$0xf0]  ;;  %v5590_v21 = vld [vmem:[#allocation13 + $0x88] sm:$0xf0]  ;;  %v5804_v11 = vld [vmem:[#allocation13 + $0x220] sm:$0xf] }
 0x569   :  { %v3308_v53 = vpop.f32.mrf.mxu1  ;;  %v3321_v27 = vpop.f32.mrf.mxu2  ;;  %v5617_v0 = vor.u32 %v6278_v26, %v5614_v52  ;;  %v5593_v50 = vor.u32 %v6272_v8, %v5590_v21 }
 0x56a   :  { %v3337_v34 = vadd.f32 %v3333_v30, %v6930_v16  ;;  %3940 = vmatmul.bf16.vlgmr.msrb.gmra.mxu0 %v6982_v37  ;;  %3966 = vmatmul.bf16.vlgmr.msrb.gmra.mxu2 %v6982_v37  ;;  %v5589_v30 = vor.u32 %v6275_v42, %v5588_v19  ;;  %v6266_v53 = vld [vmem:[#allocation13 + $0x44] sm:$0xf]  ;;  %v5566_v27 = vld [vmem:[#allocation13 + $0x58] sm:$0xf0]  ;;  %v3443_v42 = vperm.slane %v3438_v41, 3 }
 0x56b   :  { %4036 = vmatpush.bf16.msrb.mxu0 %v5709_v22  ;;  %4062 = vmatpush.bf16.msrb.mxu2 %v5713_v63  ;;  %v6329_v22 = vld [vmem:[#allocation13 + $0x234] sm:$0xf0]  ;;  %v6326_v63 = vld [vmem:[#allocation13 + $0x224] sm:$0xf] }
 0x56c   :  { %v3339_v5 = vadd.f32 %v3337_v34, %v573_v20  ;;  %v5805_v6 = vor.u32 %v6329_v22, %v5804_v11  ;;  %v5809_v20 = vor.u32 %v6326_v63, %v5806_v45  ;;  %v5780_v34 = vld [vmem:[#allocation13 + $0x1f0] sm:$0xf]  ;;  %v3444_v45 = vperm.slane %v3438_v41, 4 }
 0x56d   :  { %v5781_v28 = vor.u32 %v6323_v58, %v5780_v34 }
 0x56e   :  { %v6987_v16 = vpack.c.bf16 %v3339_v5, %v3339_v5  ;;  %v6263_v5 = vld [vmem:[#allocation13 + $0x24] sm:$0xf0] }
 0x56f   :  { %v3334_v10 = vpop.f32.mrf.mxu3  ;;  %4037 = vmatpush.bf16.msrb.mxu0 %v5685_v51  ;;  %4063 = vmatpush.bf16.msrb.mxu2 %v5689_v35  ;;  %v5565_v51 = vor.u32 %v6269_v24, %v5564_v23  ;;  %v5569_v35 = vor.u32 %v6266_v53, %v5566_v27  ;;  %v5541_v40 = vor.u32 %v6263_v5, %v5540_v36  ;;  %v3445_v27 = vperm.slane %v3438_v41, 5 }
 0x570   :  { %3953 = vmatmul.bf16.vlgmr.msrb.gmra.mxu1 %v6987_v16  ;;  %3979 = vmatmul.bf16.vlgmr.msrb.gmra.mxu3 %v6987_v16  ;;  %v5545_v10 = vor.u32 %v6260_v31, %v5542_v59 }
 0x571   :  { %4049 = vmatpush.bf16.msrb.mxu1 %v5901_v38  ;;  %4075 = vmatpush.bf16.msrb.mxu3 %v5905_v12  ;;  %v5785_v38 = vor.u32 %v6320_v14, %v5782_v29  ;;  %v5756_v12 = vld [vmem:[#allocation13 + $0x1c0] sm:$0xf] }
 0x573   :  { %4038 = vmatpush.bf16.msrb.mxu0 %v5661_v9  ;;  %4064 = vmatpush.bf16.msrb.mxu2 %v5665_v13  ;;  %v5757_v9 = vor.u32 %v6317_v60, %v5756_v12  ;;  %v5761_v13 = vor.u32 %v6314_v43, %v5758_v44 }
 0x575   :  { %4050 = vmatpush.bf16.msrb.mxu1 %v5877_v49  ;;  %4076 = vmatpush.bf16.msrb.mxu3 %v5881_v54  ;;  %v5733_v49 = vor.u32 %v6311_v46, %v5732_v48  ;;  %v5737_v54 = vor.u32 %v6308_v47, %v5734_v56 }
 0x577   :  { %4039 = vmatpush.bf16.msrb.mxu0 %v5637_v3  ;;  %4065 = vmatpush.bf16.msrb.mxu2 %v5641_v1 }
 0x579   :  { %4051 = vmatpush.bf16.msrb.mxu1 %v5853_v62  ;;  %4077 = vmatpush.bf16.msrb.mxu3 %v5857_v4 }
 0x57a   :  { %3992 = vmatmul.bf16.vlgmr.msra.gmra.mxu0 %v6982_v37  ;;  %4018 = vmatmul.bf16.vlgmr.msra.gmra.mxu2 %v6982_v37 }
 0x57b   :  { %4040 = vmatpush.bf16.msrb.mxu0 %v5613_v15  ;;  %4066 = vmatpush.bf16.msrb.mxu2 %v5617_v0 }
 0x57d   :  { %4052 = vmatpush.bf16.msrb.mxu1 %v5829_v33  ;;  %4078 = vmatpush.bf16.msrb.mxu3 %v5833_v61 }
 0x57f   :  { %4041 = vmatpush.bf16.msrb.mxu0 %v5589_v30  ;;  %4067 = vmatpush.bf16.msrb.mxu2 %v5593_v50 }
 0x580   :  { %4005 = vmatmul.bf16.vlgmr.msra.gmra.mxu1 %v6987_v16  ;;  %4031 = vmatmul.bf16.vlgmr.msra.gmra.mxu3 %v6987_v16 }
 0x581   :  { %4053 = vmatpush.bf16.msrb.mxu1 %v5805_v6  ;;  %4079 = vmatpush.bf16.msrb.mxu3 %v5809_v20 }
 0x583   :  { %4042 = vmatpush.bf16.msrb.mxu0 %v5565_v51  ;;  %4068 = vmatpush.bf16.msrb.mxu2 %v5569_v35 }
 0x585   :  { %4054 = vmatpush.bf16.msrb.mxu1 %v5781_v28  ;;  %4080 = vmatpush.bf16.msrb.mxu3 %v5785_v38 }
 0x587   :  { %4043 = vmatpush.bf16.msrb.mxu0 %v5541_v40  ;;  %4069 = vmatpush.bf16.msrb.mxu2 %v5545_v10 }
 0x589   :  { %4055 = vmatpush.bf16.msrb.mxu1 %v5757_v9  ;;  %4081 = vmatpush.bf16.msrb.mxu3 %v5761_v13 }
 0x58a   :  { %4044 = vmatmul.bf16.vlgmr.msrb.gmra.mxu0 %v6982_v37  ;;  %4070 = vmatmul.bf16.vlgmr.msrb.gmra.mxu2 %v6982_v37 }
 0x58d   :  { %4056 = vmatpush.bf16.msrb.mxu1 %v5733_v49  ;;  %4082 = vmatpush.bf16.msrb.mxu3 %v5737_v54 }
 0x590   :  { %4057 = vmatmul.bf16.vlgmr.msrb.gmra.mxu1 %v6987_v16  ;;  %4083 = vmatmul.bf16.vlgmr.msrb.gmra.mxu3 %v6987_v16 }
 0x5e7   :  { %v3941_v32 = vpop.f32.mrf.mxu0 }
 0x5e8   :  { %v3942_v25 = vadd.f32 %v3941_v32, %v3440_v2 }
 0x5ed   :  { %v3954_v3 = vpop.f32.mrf.mxu1  ;;  %v3967_v1 = vpop.f32.mrf.mxu2 }
 0x5ee   :  { %v3955_v57 = vadd.f32 %v3954_v3, %v3942_v25  ;;  %v3968_v37 = vadd.f32 %v3967_v1, %v3441_v39 }
 0x5ef   :  { %v3943_v26 = vpop.f32.mrf.mxu0 }
 0x5f0   :  { %4088 = vst [vmem:[#allocation14] sm:$0xff] %v3955_v57 }
 0x5f3   :  { %v3980_v52 = vpop.f32.mrf.mxu3 }
 0x5f4   :  { %v3981_v62 = vadd.f32 %v3980_v52, %v3968_v37 }
 0x5f5   :  { %v3956_v4 = vpop.f32.mrf.mxu1  ;;  %v3969_v7 = vpop.f32.mrf.mxu2 }
 0x5f6   :  { %4089 = vst [vmem:[#allocation14 + $0x8] sm:$0xff] %v3981_v62 }
 0x5f7   :  { %v3993_v16 = vpop.f32.mrf.mxu0 }
 0x5f8   :  { %v3994_v55 = vadd.f32 %v3993_v16, %v3442_v17 }
 0x5fb   :  { %v3982_v18 = vpop.f32.mrf.mxu3 }
 0x5fd   :  { %v4006_v15 = vpop.f32.mrf.mxu1  ;;  %v4019_v0 = vpop.f32.mrf.mxu2 }
 0x5fe   :  { %v4007_v19 = vadd.f32 %v4006_v15, %v3994_v55  ;;  %v4020_v21 = vadd.f32 %v4019_v0, %v3443_v42 }
 0x5ff   :  { %v3995_v8 = vpop.f32.mrf.mxu0 }
 0x600   :  { %4090 = vst [vmem:[#allocation14 + $0x10] sm:$0xff] %v4007_v19 }
 0x603   :  { %v4032_v33 = vpop.f32.mrf.mxu3 }
 0x604   :  { %v4033_v61 = vadd.f32 %v4032_v33, %v4020_v21 }
 0x605   :  { %v4008_v11 = vpop.f32.mrf.mxu1  ;;  %v4021_v22 = vpop.f32.mrf.mxu2 }
 0x606   :  { %4091 = vst [vmem:[#allocation14 + $0x18] sm:$0xff] %v4033_v61 }
 0x607   :  { %v4045_v63 = vpop.f32.mrf.mxu0 }
 0x608   :  { %v4046_v50 = vadd.f32 %v4045_v63, %v3444_v45 }
 0x60b   :  { %v4034_v30 = vpop.f32.mrf.mxu3 }
 0x60d   :  { %v4058_v23 = vpop.f32.mrf.mxu1  ;;  %v4071_v24 = vpop.f32.mrf.mxu2 }
 0x60e   :  { %v4059_v53 = vadd.f32 %v4058_v23, %v4046_v50  ;;  %v4072_v20 = vadd.f32 %v4071_v24, %v3445_v27 }
 0x60f   :  { %v4047_v6 = vpop.f32.mrf.mxu0 }
 0x610   :  { %4092 = vst [vmem:[#allocation14 + $0x20] sm:$0xff] %v4059_v53 }
 0x613   :  { %v4084_v34 = vpop.f32.mrf.mxu3 }
 0x614   :  { %v4085_v58 = vadd.f32 %v4084_v34, %v4072_v20 }
 0x615   :  { %v4060_v14 = vpop.f32.mrf.mxu1  ;;  %v4073_v29 = vpop.f32.mrf.mxu2 }
 0x616   :  { %4093 = vst [vmem:[#allocation14 + $0x28] sm:$0xff] %v4085_v58 }
 0x617   :  { %4104 = dma.vmem_to_hbm [thread:$0]  %s4100_s22, 768, %s4102_s4, [#allocation4]  }
 0x61b   :  { %v4086_v51 = vpop.f32.mrf.mxu3 }
 0x61c   :  { %6577 = dma.done.wait [#allocation4], 768  }
 0x61d   :  { %6578 = vsyncadd [#allocation4], 4294966528 }
 0x61e   :  { %4109 = vsyncpa [#allocation3], 1 }
 0x61f   :  { %4110 = vsyncpa [#allocation6], 1 }
 0x620   :  { %4111 = vsyncpa [#allocation9], 1 }
 0x621   :  { %4112 = vsyncpa [#allocation12], 1 }
 0x622   :  { %4113 = vsyncpa [#allocation4], 1 }

</bundles_post_ra>
